<compile_context>
chip_gen: v5e
topology: v5e:2x2
jax: 0.10.0
libtpu: 0.0.40
codegen_flags: <defaults>
</compile_context>

<pallas_src>
import functools
import math

import jax
import jax.numpy as jnp
import numpy as np
from jax.experimental import pallas as pl
from jax.experimental.pallas import tpu as pltpu  # noqa: F401  (kept for TPU-specific tuning hooks)

# ---------------- config (small but consistent with the module) ----------------
B = 2            # batch
L = 16           # input_size (sequence length); must be divisible by 4
C = 32           # model_config['channels']; must be divisible by 16
KD = 3           # model_config['kernel_size']
N_LAYERS = 2     # model_config['layers']
Z_DIM = 16
VOCAB = 40       # embeddings_static[0]
EMB = 16         # embeddings_static[1]
H_DIM = L * C
BL = B * L       # fused batch*length lane axis
ZL = Z_DIM * L

MAIN_W = 48      # narrow slab width (>= widest narrow leaf: emb_T has VOCAB=40 cols)
WIDE_W = ZL      # wide slab width (fc weights / d_mask)


# ============================ fused Pallas kernel ============================

def _fused_vae_kernel(index, tok_ref, eps_ref, main_ref, wide_ref, out_ref, mulv_ref):
    f32 = jnp.float32
    slabs = (main_ref, wide_ref)

    def get(name):
        sid, off, r, c = index[name]
        return slabs[sid][off:off + r, 0:c]

    def mm(a, b):
        return jnp.dot(a, b, preferred_element_type=f32)

    # ---- hoisted constant loads (used many times) ----
    s0 = get('S0')
    s2 = get('S2')
    col_even = get('col_even')
    col_odd = get('col_odd')
    prow_e = get('prow_e')
    prow_o = get('prow_o')
    pexp_e = get('pexp_e')
    pexp_o = get('pexp_o')
    vcol_a = get('vcol_a')
    vcol_b = get('vcol_b')
    addmask_t = get('addmask_t')
    d_mask = get('d_mask')
    d_mask_t = get('d_mask_t')
    colsum_zl = get('colsum_zl')
    rowsum_b = get('rowsum_b')

    # ---- token embedding lookup as a one-hot matmul + padding-mask row ----
    tok = tok_ref[...]                                                # (1, BL) int32
    vocab_iota = jax.lax.broadcasted_iota(jnp.int32, (VOCAB, BL), 0)
    onehot = (vocab_iota == tok).astype(f32)                          # (VOCAB, BL)
    mask_row = (tok <= 20).astype(f32)                                # (1, BL)
    x = mm(get('emb_T'), onehot)                                      # (EMB, BL)

    # ---- K=3 'same' conv: ONE fused (3*Co, Ci) weight matmul + 2 shift matmuls ----
    def conv3(xin, wcat, bias=None, relu=False):
        co = wcat.shape[0] // 3
        y = mm(wcat, xin)                                             # (3*Co, BL)
        acc = y[co:2 * co, :] + mm(y[0:co, :], s0) + mm(y[2 * co:, :], s2)
        if bias is not None:
            acc = acc + bias
        if relu:
            acc = jnp.maximum(acc, 0.0)
        return acc

    # ---- NonLocalSelfAttention (both batches together, cross-batch masked) ----
    def attention(xa, pfx):
        ch = xa.shape[0]
        c8 = ch // 8
        tpg = mm(get(pfx + '_w_tpg'), xa)                             # (c8+c8+ch//2, BL)
        theta = tpg[0:c8, :]                                          # (c8, BL)
        pg = tpg[c8:, :]                                              # [phi; g] (c8+ch//2, BL)
        # fused MaxPool2d(2,2) + PyTorch .view() for phi and g in one merged pass
        colmax = jnp.maximum(mm(pg, col_even), mm(pg, col_odd))       # (c8+ch//2, BL//2)
        pooled = jnp.maximum(mm(prow_e, colmax), mm(prow_o, colmax))  # ((c8+ch//2)//2, BL//2)
        view = mm(mm(pexp_e, pooled), vcol_a) + mm(mm(pexp_o, pooled), vcol_b)
        phi_v = view[0:c8, :]                                         # (c8,    BL//4)
        g_v = view[c8:, :]                                            # (ch//2, BL//4)
        # softmax(theta^T @ phi_view, dim=-1) in transposed layout; cross-batch
        # logits get -1e30 so one un-batched matmul handles both batch elements.
        logits_t = mm(phi_v.T, theta) + addmask_t                     # (BL//4, BL)
        e = jnp.exp(logits_t - jnp.max(logits_t, axis=0, keepdims=True))
        attn_t = e * pl.reciprocal(jnp.sum(e, axis=0, keepdims=True), approx=True)
        o = mm(get(pfx + '_w_o'), mm(g_v, attn_t))                    # (ch, BL)
        return xa + get(pfx + '_gamma') * o

    def mutate(xm, pfx):
        h2 = xm
        for j in range(4):
            h2 = conv3(h2, get(f'{pfx}_conv{j}_w'), get(f'{pfx}_conv{j}_b'), relu=True)
        return h2

    # ---- embedder conv + transformer encoder ----
    h = conv3(x, get('embedder_wcat'))                                # (C, BL)
    for i in range(N_LAYERS):
        pfx = f'enc{i}'
        residual = h
        h = h + attention(h, pfx)         # src = src + dropout1(self_attn(src))
        h = mutate(h, pfx) + residual     # src = mutate(src) + residual

    # ---- VAE bottleneck on h.view(B, C*L) without in-kernel reshapes ----
    h_t = h.T                                                         # (BL, C)

    def fc_in(wp, b):
        g2 = mm(h_t, wp) * d_mask                                     # (BL, ZL)
        return mm(mm(rowsum_b, g2), colsum_zl) + b                    # (B, Z)

    mu = fc_in(get('fc1_wp'), get('fc1_b'))
    log_var = fc_in(get('fc2_wp'), get('fc2_b'))
    z = mu + eps_ref[...] * jnp.exp(0.5 * log_var)                    # (B, Z)

    # fc3(z).view(B, C, L) -> (C, BL)
    z_cols = mm(colsum_zl, z.T)                                       # (ZL, B)
    z_exp = mm(z_cols, rowsum_b) * d_mask_t                           # (ZL, BL)
    data = mm(get('fc3_wp'), z_exp) + get('fc3_bmat')                 # (C, BL)

    # ---- resize_channels on cat([data, mask], channel dim); mask column folded in
    data = (mm(get('resize_main'), data)
            + get('resize_mask') * mask_row
            + get('resize_b'))
    data = jnp.maximum(data, 0.0)

    # ---- transformer decoder ----
    for i in range(N_LAYERS):
        pfx = f'dec{i}'
        residual = data
        data = mutate(data, pfx) + residual      # src = mutate(src) + residual
        data = data + attention(data, pfx)       # src = src + dropout1(self_attn(src))

    # ---- de-embed + Softmax(dim=1) over the vocab channel (exact divide) ----
    logits = conv3(data, get('deembed_wcat'))                         # (VOCAB, BL)
    e2 = jnp.exp(logits - jnp.max(logits, axis=0, keepdims=True))
    probs = e2 / jnp.sum(e2, axis=0, keepdims=True)

    out_ref[...] = probs                                              # lane-dense (VOCAB, BL)
    mulv_ref[...] = jnp.concatenate([mu, log_var], axis=0)            # (2B, Z)


def build_forward(index):
    kernel = functools.partial(_fused_vae_kernel, index)

    def forward(main_slab, wide_slab, tokens, eps):
        tok2 = tokens.reshape(1, BL).astype(jnp.int32)
        probs, mulv = pl.pallas_call(
            kernel,
            out_shape=(jax.ShapeDtypeStruct((VOCAB, BL), jnp.float32),
                       jax.ShapeDtypeStruct((2 * B, Z_DIM), jnp.float32)),
        )(tok2, eps.astype(jnp.float32), main_slab, wide_slab)
        # Layout plumbing stays in the wrapper (kernel output is lane-dense).
        out = probs.reshape(VOCAB, B, L).transpose(1, 0, 2)           # (B, VOCAB, L)
        return out, mulv[:B], mulv[B:]

    return jax.jit(forward)


# ============================ slab packing ============================

class _SlabPacker:
    def __init__(self, slab_id, width):
        self.slab_id = slab_id
        self.width = width
        self.rows = 0
        self.chunks = []

    def add(self, index, name, arr):
        a = np.asarray(arr, np.float32)
        assert a.ndim == 2 and a.shape[1] <= self.width, (name, a.shape)
        r, c = a.shape
        rp = ((r + 7) // 8) * 8                 # 8-row align every leaf
        buf = np.zeros((rp, self.width), np.float32)
        buf[:r, :c] = a
        index[name] = (self.slab_id, self.rows, r, c)
        self.chunks.append(buf)
        self.rows += rp

    def finalize(self):
        if not self.chunks:
            return np.zeros((8, self.width), np.float32)
        return np.concatenate(self.chunks, axis=0)


# ============================ constant routing matrices ============================

def _np_constants():
    def even_sel(n):
        m = np.zeros((n, n // 2), np.float32)
        m[np.arange(0, n, 2), np.arange(n // 2)] = 1.0
        return m

    def odd_sel(n):
        m = np.zeros((n, n // 2), np.float32)
        m[np.arange(1, n, 2), np.arange(n // 2)] = 1.0
        return m

    # Shift matrices for 'same' K=3 convs on the (C, B*L) layout (block-diag per batch).
    s0 = np.zeros((BL, BL), np.float32)
    s2 = np.zeros((BL, BL), np.float32)
    for p in range(BL):
        mp = p - 1
        if mp >= 0 and (mp // L) == (p // L):
            s0[mp, p] = 1.0
        mn = p + 1
        if mn < BL and (mn // L) == (p // L):
            s2[mn, p] = 1.0

    # MaxPool(2,2)+view helpers, merged for [phi; g] (C//8 + C//2 rows).
    PG = C // 8 + C // 2
    prow_e = even_sel(PG).T.copy()              # (PG//2, PG)
    prow_o = odd_sel(PG).T.copy()
    pexp_e = np.zeros((PG, PG // 2), np.float32)
    pexp_o = np.zeros((PG, PG // 2), np.float32)
    # groups: (view row offset, pooled row offset, number of view rows)
    for v_off, p_off, vrows in [(0, 0, C // 8), (C // 8, C // 16, C // 2)]:
        for cpr in range(vrows):
            if cpr % 2 == 0:
                pexp_e[v_off + cpr, p_off + cpr // 2] = 1.0
            else:
                pexp_o[v_off + cpr, p_off + cpr // 2] = 1.0

    q = L // 4
    half = L // 2
    vcol_a = np.zeros((BL // 2, BL // 4), np.float32)
    vcol_b = np.zeros((BL // 2, BL // 4), np.float32)
    for b in range(B):
        for j in range(q):
            vcol_a[b * half + j, b * q + j] = 1.0
            vcol_b[b * half + q + j, b * q + j] = 1.0

    # Cross-batch attention-logit mask (transposed layout).
    addmask_t = np.full((BL // 4, BL), -1e30, np.float32)
    for pp in range(BL):
        b = pp // L
        addmask_t[b * q:(b + 1) * q, pp] = 0.0

    # (B, C, L) <-> (B, C*L) flatten helpers for the fully-connected bottleneck.
    d_mask = (np.arange(BL)[:, None] % L == np.arange(ZL)[None, :] % L).astype(np.float32)
    colsum_zl = np.zeros((ZL, Z_DIM), np.float32)
    for z in range(Z_DIM):
        colsum_zl[z * L:(z + 1) * L, z] = 1.0
    rowsum_b = np.zeros((B, BL), np.float32)
    for b in range(B):
        rowsum_b[b, b * L:(b + 1) * L] = 1.0

    return {
        'S0': s0, 'S2': s2,
        'col_even': even_sel(BL), 'col_odd': odd_sel(BL),
        'prow_e': prow_e, 'prow_o': prow_o,
        'pexp_e': pexp_e, 'pexp_o': pexp_o,
        'vcol_a': vcol_a, 'vcol_b': vcol_b,
        'addmask_t': addmask_t,
        'd_mask': d_mask, 'd_mask_t': d_mask.T.copy(),
        'colsum_zl': colsum_zl, 'rowsum_b': rowsum_b,
    }


# ============================ parameter preparation (hoisted) ============================

def prepare_slabs(params):
    idx = {}
    main = _SlabPacker(0, MAIN_W)
    wide = _SlabPacker(1, WIDE_W)

    def np2(x):
        return np.asarray(x, np.float32)

    def conv_cat(w):            # Conv1d weight (Co, Ci, K) -> fused taps (3*Co, Ci)
        w = np2(w)
        return np.concatenate([w[:, :, 0], w[:, :, 1], w[:, :, 2]], axis=0)

    def convT_cat(w):           # ConvTranspose1d weight (Ci, Co, K) -> conv-equivalent taps
        w = np2(w)
        wc = np.flip(np.transpose(w, (1, 0, 2)), axis=2)
        return np.concatenate([wc[:, :, 0], wc[:, :, 1], wc[:, :, 2]], axis=0)

    def col(b):
        return np2(b).reshape(-1, 1)

    for k, v in _np_constants().items():
        (wide if v.shape[1] > MAIN_W else main).add(idx, k, v)

    main.add(idx, 'emb_T', np2(params['embedding']).T)                       # (EMB, VOCAB)
    main.add(idx, 'embedder_wcat', conv_cat(params['embedder_w']))           # (3C, EMB)
    main.add(idx, 'deembed_wcat', convT_cat(params['deembed_w']))            # (3*VOCAB, C)

    w_rs = np2(params['resize_w'])[:, :, 0].T                                # (C, C+1)
    main.add(idx, 'resize_main', w_rs[:, :C])
    main.add(idx, 'resize_mask', w_rs[:, C:C + 1])
    main.add(idx, 'resize_b', col(params['resize_b']))

    fc1_wp = np2(params['fc1_w']).reshape(Z_DIM, C, L).transpose(1, 0, 2).reshape(C, ZL)
    fc2_wp = np2(params['fc2_w']).reshape(Z_DIM, C, L).transpose(1, 0, 2).reshape(C, ZL)
    fc3_wp = np2(params['fc3_w']).reshape(C, L, Z_DIM).transpose(0, 2, 1).reshape(C, ZL)
    wide.add(idx, 'fc1_wp', fc1_wp)
    wide.add(idx, 'fc2_wp', fc2_wp)
    wide.add(idx, 'fc3_wp', fc3_wp)
    main.add(idx, 'fc1_b', np2(params['fc1_b']).reshape(1, Z_DIM))
    main.add(idx, 'fc2_b', np2(params['fc2_b']).reshape(1, Z_DIM))
    main.add(idx, 'fc3_bmat', np.tile(np2(params['fc3_b']).reshape(C, L), (1, B)))

    def add_layer(pfx, lp, transposed):
        a = lp['attn']
        w_tpg = np.concatenate([np2(a['w_theta'])[:, :, 0],
                                np2(a['w_phi'])[:, :, 0],
                                np2(a['w_g'])[:, :, 0]], axis=0)
        main.add(idx, pfx + '_w_tpg', w_tpg)
        main.add(idx, pfx + '_w_o', np2(a['w_o'])[:, :, 0])
        main.add(idx, pfx + '_gamma', np2(a['gamma']).reshape(1, 1))
        cat = convT_cat if transposed else conv_cat
        for j, (w, b) in enumerate(lp['mutate']):
            main.add(idx, f'{pfx}_conv{j}_w', cat(w))
            main.add(idx, f'{pfx}_conv{j}_b', col(b))

    for i, lp in enumerate(params['enc_layers']):
        add_layer(f'enc{i}', lp, False)
    for i, lp in enumerate(params['dec_layers']):
        add_layer(f'dec{i}', lp, True)

    return jnp.asarray(main.finalize()), jnp.asarray(wide.finalize()), idx


# ============================ deterministic parameter init ============================

def _uniform(key, shape, fan_in):
    s = 1.0 / math.sqrt(float(fan_in))
    return jax.random.uniform(key, shape, jnp.float32, -s, s)


def _spectral_norm_weight(w, key, eps=1e-12):
    out = w.shape[0]
    wm = w.reshape(out, -1)
    u = jax.random.normal(key, (out,), jnp.float32)
    u = u / (jnp.linalg.norm(u) + eps)
    v = wm.T @ u
    v = v / (jnp.linalg.norm(v) + eps)
    u = wm @ v
    u = u / (jnp.linalg.norm(u) + eps)
    sigma = u @ (wm @ v)
    return w / sigma


def init_params(key):
    ks = iter(jax.random.split(key, 256))

    def nk():
        return next(ks)

    def attn_params(ch):
        c8, c2 = ch // 8, ch // 2
        return {
            'w_theta': _spectral_norm_weight(_uniform(nk(), (c8, ch, 1), ch), nk()),
            'w_phi':   _spectral_norm_weight(_uniform(nk(), (c8, ch, 1), ch), nk()),
            'w_g':     _spectral_norm_weight(_uniform(nk(), (c2, ch, 1), ch), nk()),
            'w_o':     _spectral_norm_weight(_uniform(nk(), (ch, c2, 1), c2), nk()),
            'gamma': jnp.zeros((1,), jnp.float32),   # matches nn.Parameter(torch.zeros(1))
        }

    def conv_block_params(in_c, out_c, k):
        return (_uniform(nk(), (out_c, in_c, k), in_c * k),
                _uniform(nk(), (out_c,), in_c * k))

    def conv_tblock_params(in_c, out_c, k):
        # ConvTranspose1d weight layout: (in_c, out_c, k)
        return (_uniform(nk(), (in_c, out_c, k), in_c * k),
                _uniform(nk(), (out_c,), in_c * k))

    half = C // 2
    enc_layers = []
    for _ in range(N_LAYERS):
        enc_layers.append({
            'attn': attn_params(C),
            'mutate': [conv_block_params(C, half, KD),
                       conv_block_params(half, half, KD),
                       conv_block_params(half, half, KD),
                       conv_block_params(half, C, KD)],
        })
    dec_layers = []
    for _ in range(N_LAYERS):
        dec_layers.append({
            'attn': attn_params(C),
            'mutate': [conv_tblock_params(C, half, KD),
                       conv_tblock_params(half, half, KD),
                       conv_tblock_params(half, half, KD),
                       conv_tblock_params(half, C, KD)],
        })

    return {
        'embedding': jax.random.normal(nk(), (VOCAB, EMB), jnp.float32),
        'embedder_w': jax.random.uniform(nk(), (C, EMB, 3), jnp.float32, -0.1, 0.1),
        'deembed_w': jax.random.uniform(nk(), (C, VOCAB, 3), jnp.float32, -0.1, 0.1),
        'resize_w': _uniform(nk(), (C + 1, C, 1), C + 1),
        'resize_b': _uniform(nk(), (C,), C + 1),
        'fc1_w': _uniform(nk(), (Z_DIM, H_DIM), H_DIM),
        'fc1_b': _uniform(nk(), (Z_DIM,), H_DIM),
        'fc2_w': _uniform(nk(), (Z_DIM, H_DIM), H_DIM),
        'fc2_b': _uniform(nk(), (Z_DIM,), H_DIM),
        'fc3_w': _uniform(nk(), (H_DIM, Z_DIM), Z_DIM),
        'fc3_b': _uniform(nk(), (H_DIM,), Z_DIM),
        'enc_layers': enc_layers,
        'dec_layers': dec_layers,
    }


# ============================ main ============================

if __name__ == "__main__":
    root = jax.random.PRNGKey(0)
    k_params, k_tokens, k_eps = jax.random.split(root, 3)

    params = init_params(k_params)
    main_slab, wide_slab, index = prepare_slabs(params)   # hoisted reshapes/flips + slab packing
    fwd = build_forward(index)

    x = jax.random.randint(k_tokens, (B, L), 0, VOCAB, dtype=jnp.int32)   # token ids
    eps = jax.random.normal(k_eps, (B, Z_DIM), jnp.float32)               # reparam noise

    out, mu, log_var = fwd(main_slab, wide_slab, x, eps)
    jax.block_until_ready((out, mu, log_var))

    assert out.shape == (B, VOCAB, L)
    assert mu.shape == (B, Z_DIM) and log_var.shape == (B, Z_DIM)
    assert bool(jnp.all(jnp.isfinite(out)))
    assert bool(jnp.all(jnp.isfinite(mu))) and bool(jnp.all(jnp.isfinite(log_var)))
    assert bool(jnp.allclose(out.sum(axis=1), 1.0, atol=1e-4))  # softmax over vocab dim
    print("KERNEL_OK")
</pallas_src>

<mosaic_0001>
module attributes {stable_mosaic.version = 11 : i64} {
  func.func @_fused_vae_kernel(%arg0: memref<1x32xi32, #tpu.memory_space<vmem>>, %arg1: memref<2x16xf32, #tpu.memory_space<vmem>>, %arg2: memref<2680x48xf32, #tpu.memory_space<vmem>>, %arg3: memref<128x256xf32, #tpu.memory_space<vmem>>, %arg4: memref<40x32xf32, #tpu.memory_space<vmem>>, %arg5: memref<4x16xf32, #tpu.memory_space<vmem>>) attributes {dimension_semantics = [], scalar_prefetch = 0 : i64, scratch_operands = 0 : i64, tpu.core_type = #tpu.core_type<tc>} {
    %c0 = arith.constant 0 : index
    %c0_0 = arith.constant 0 : index
    %0 = vector.load %arg2[%c0, %c0_0] : memref<2680x48xf32, #tpu.memory_space<vmem>>, vector<32x32xf32>
    %c32 = arith.constant 32 : index
    %c0_1 = arith.constant 0 : index
    %1 = vector.load %arg2[%c32, %c0_1] : memref<2680x48xf32, #tpu.memory_space<vmem>>, vector<32x32xf32>
    %c64 = arith.constant 64 : index
    %c0_2 = arith.constant 0 : index
    %2 = vector.load %arg2[%c64, %c0_2] : memref<2680x48xf32, #tpu.memory_space<vmem>>, vector<32x16xf32>
    %c96 = arith.constant 96 : index
    %c0_3 = arith.constant 0 : index
    %3 = vector.load %arg2[%c96, %c0_3] : memref<2680x48xf32, #tpu.memory_space<vmem>>, vector<32x16xf32>
    %c128 = arith.constant 128 : index
    %c0_4 = arith.constant 0 : index
    %4 = vector.load %arg2[%c128, %c0_4] : memref<2680x48xf32, #tpu.memory_space<vmem>>, vector<10x20xf32>
    %c144 = arith.constant 144 : index
    %c0_5 = arith.constant 0 : index
    %5 = vector.load %arg2[%c144, %c0_5] : memref<2680x48xf32, #tpu.memory_space<vmem>>, vector<10x20xf32>
    %c160 = arith.constant 160 : index
    %c0_6 = arith.constant 0 : index
    %6 = vector.load %arg2[%c160, %c0_6] : memref<2680x48xf32, #tpu.memory_space<vmem>>, vector<20x10xf32>
    %c184 = arith.constant 184 : index
    %c0_7 = arith.constant 0 : index
    %7 = vector.load %arg2[%c184, %c0_7] : memref<2680x48xf32, #tpu.memory_space<vmem>>, vector<20x10xf32>
    %c208 = arith.constant 208 : index
    %c0_8 = arith.constant 0 : index
    %8 = vector.load %arg2[%c208, %c0_8] : memref<2680x48xf32, #tpu.memory_space<vmem>>, vector<16x8xf32>
    %c224 = arith.constant 224 : index
    %c0_9 = arith.constant 0 : index
    %9 = vector.load %arg2[%c224, %c0_9] : memref<2680x48xf32, #tpu.memory_space<vmem>>, vector<16x8xf32>
    %c240 = arith.constant 240 : index
    %c0_10 = arith.constant 0 : index
    %10 = vector.load %arg2[%c240, %c0_10] : memref<2680x48xf32, #tpu.memory_space<vmem>>, vector<8x32xf32>
    %c0_11 = arith.constant 0 : index
    %c0_12 = arith.constant 0 : index
    %11 = vector.load %arg3[%c0_11, %c0_12] : memref<128x256xf32, #tpu.memory_space<vmem>>, vector<32x256xf32>
    %c248 = arith.constant 248 : index
    %c0_13 = arith.constant 0 : index
    %12 = vector.load %arg2[%c248, %c0_13] : memref<2680x48xf32, #tpu.memory_space<vmem>>, vector<256x32xf32>
    %c504 = arith.constant 504 : index
    %c0_14 = arith.constant 0 : index
    %13 = vector.load %arg2[%c504, %c0_14] : memref<2680x48xf32, #tpu.memory_space<vmem>>, vector<256x16xf32>
    %c760 = arith.constant 760 : index
    %c0_15 = arith.constant 0 : index
    %14 = vector.load %arg2[%c760, %c0_15] : memref<2680x48xf32, #tpu.memory_space<vmem>>, vector<2x32xf32>
    %c0_16 = arith.constant 0 : index
    %c0_17 = arith.constant 0 : index
    %15 = vector.load %arg0[%c0_16, %c0_17] : memref<1x32xi32, #tpu.memory_space<vmem>>, vector<1x32xi32>
    %16 = tpu.iota {dimensions = array<i32: 0>} : vector<40x32xi32>
    %17 = vector.broadcast %15 : vector<1x32xi32> to vector<40x32xi32>
    %18 = arith.cmpi eq, %16, %17 : vector<40x32xi32>
    %19 = arith.extui %18 : vector<40x32xi1> to vector<40x32xi32>
    %20 = arith.sitofp %19 : vector<40x32xi32> to vector<40x32xf32>
    %c20_i32 = arith.constant 20 : i32
    %21 = vector.broadcast %c20_i32 : i32 to vector<1x32xi32>
    %22 = arith.cmpi sle, %15, %21 : vector<1x32xi32>
    %23 = arith.extui %22 : vector<1x32xi1> to vector<1x32xi32>
    %24 = arith.sitofp %23 : vector<1x32xi32> to vector<1x32xf32>
    %c768 = arith.constant 768 : index
    %c0_18 = arith.constant 0 : index
    %25 = vector.load %arg2[%c768, %c0_18] : memref<2680x48xf32, #tpu.memory_space<vmem>>, vector<16x40xf32>
    %cst = arith.constant dense<0.000000e+00> : vector<16x32xf32>
    %26 = tpu.matmul %25, %20, %cst {dimension_numbers = #tpu.dot_dimension_numbers<[1], [0], [0], [1], [0, 0, 1, 1], [], []>} : vector<16x40xf32>, vector<40x32xf32>, vector<16x32xf32> -> vector<16x32xf32>
    %c784 = arith.constant 784 : index
    %c0_19 = arith.constant 0 : index
    %27 = vector.load %arg2[%c784, %c0_19] : memref<2680x48xf32, #tpu.memory_space<vmem>>, vector<96x16xf32>
    %cst_20 = arith.constant dense<0.000000e+00> : vector<96x32xf32>
    %28 = tpu.matmul %27, %26, %cst_20 {dimension_numbers = #tpu.dot_dimension_numbers<[1], [0], [0], [1], [0, 0, 1, 1], [], []>} : vector<96x16xf32>, vector<16x32xf32>, vector<96x32xf32> -> vector<96x32xf32>
    %29 = vector.extract_strided_slice %28 {offsets = [32, 0], sizes = [32, 32], strides = [1, 1]} : vector<96x32xf32> to vector<32x32xf32>
    %30 = vector.extract_strided_slice %28 {offsets = [0, 0], sizes = [32, 32], strides = [1, 1]} : vector<96x32xf32> to vector<32x32xf32>
    %cst_21 = arith.constant dense<0.000000e+00> : vector<32x32xf32>
    %31 = tpu.matmul %30, %0, %cst_21 {dimension_numbers = #tpu.dot_dimension_numbers<[1], [0], [0], [1], [0, 0, 1, 1], [], []>} : vector<32x32xf32>, vector<32x32xf32>, vector<32x32xf32> -> vector<32x32xf32>
    %32 = arith.addf %29, %31 : vector<32x32xf32>
    %33 = vector.extract_strided_slice %28 {offsets = [64, 0], sizes = [32, 32], strides = [1, 1]} : vector<96x32xf32> to vector<32x32xf32>
    %cst_22 = arith.constant dense<0.000000e+00> : vector<32x32xf32>
    %34 = tpu.matmul %33, %1, %cst_22 {dimension_numbers = #tpu.dot_dimension_numbers<[1], [0], [0], [1], [0, 0, 1, 1], [], []>} : vector<32x32xf32>, vector<32x32xf32>, vector<32x32xf32> -> vector<32x32xf32>
    %35 = arith.addf %32, %34 : vector<32x32xf32>
    %c1144 = arith.constant 1144 : index
    %c0_23 = arith.constant 0 : index
    %36 = vector.load %arg2[%c1144, %c0_23] : memref<2680x48xf32, #tpu.memory_space<vmem>>, vector<24x32xf32>
    %cst_24 = arith.constant dense<0.000000e+00> : vector<24x32xf32>
    %37 = tpu.matmul %36, %35, %cst_24 {dimension_numbers = #tpu.dot_dimension_numbers<[1], [0], [0], [1], [0, 0, 1, 1], [], []>} : vector<24x32xf32>, vector<32x32xf32>, vector<24x32xf32> -> vector<24x32xf32>
    %38 = vector.extract_strided_slice %37 {offsets = [0, 0], sizes = [4, 32], strides = [1, 1]} : vector<24x32xf32> to vector<4x32xf32>
    %39 = vector.extract_strided_slice %37 {offsets = [4, 0], sizes = [20, 32], strides = [1, 1]} : vector<24x32xf32> to vector<20x32xf32>
    %cst_25 = arith.constant dense<0.000000e+00> : vector<20x16xf32>
    %40 = tpu.matmul %39, %2, %cst_25 {dimension_numbers = #tpu.dot_dimension_numbers<[1], [0], [0], [1], [0, 0, 1, 1], [], []>} : vector<20x32xf32>, vector<32x16xf32>, vector<20x16xf32> -> vector<20x16xf32>
    %cst_26 = arith.constant dense<0.000000e+00> : vector<20x16xf32>
    %41 = tpu.matmul %39, %3, %cst_26 {dimension_numbers = #tpu.dot_dimension_numbers<[1], [0], [0], [1], [0, 0, 1, 1], [], []>} : vector<20x32xf32>, vector<32x16xf32>, vector<20x16xf32> -> vector<20x16xf32>
    %42 = arith.maximumf %40, %41 : vector<20x16xf32>
    %cst_27 = arith.constant dense<0.000000e+00> : vector<10x16xf32>
    %43 = tpu.matmul %4, %42, %cst_27 {dimension_numbers = #tpu.dot_dimension_numbers<[1], [0], [0], [1], [0, 0, 1, 1], [], []>} : vector<10x20xf32>, vector<20x16xf32>, vector<10x16xf32> -> vector<10x16xf32>
    %cst_28 = arith.constant dense<0.000000e+00> : vector<10x16xf32>
    %44 = tpu.matmul %5, %42, %cst_28 {dimension_numbers = #tpu.dot_dimension_numbers<[1], [0], [0], [1], [0, 0, 1, 1], [], []>} : vector<10x20xf32>, vector<20x16xf32>, vector<10x16xf32> -> vector<10x16xf32>
    %45 = arith.maximumf %43, %44 : vector<10x16xf32>
    %cst_29 = arith.constant dense<0.000000e+00> : vector<20x16xf32>
    %46 = tpu.matmul %6, %45, %cst_29 {dimension_numbers = #tpu.dot_dimension_numbers<[1], [0], [0], [1], [0, 0, 1, 1], [], []>} : vector<20x10xf32>, vector<10x16xf32>, vector<20x16xf32> -> vector<20x16xf32>
    %cst_30 = arith.constant dense<0.000000e+00> : vector<20x8xf32>
    %47 = tpu.matmul %46, %8, %cst_30 {dimension_numbers = #tpu.dot_dimension_numbers<[1], [0], [0], [1], [0, 0, 1, 1], [], []>} : vector<20x16xf32>, vector<16x8xf32>, vector<20x8xf32> -> vector<20x8xf32>
    %cst_31 = arith.constant dense<0.000000e+00> : vector<20x16xf32>
    %48 = tpu.matmul %7, %45, %cst_31 {dimension_numbers = #tpu.dot_dimension_numbers<[1], [0], [0], [1], [0, 0, 1, 1], [], []>} : vector<20x10xf32>, vector<10x16xf32>, vector<20x16xf32> -> vector<20x16xf32>
    %cst_32 = arith.constant dense<0.000000e+00> : vector<20x8xf32>
    %49 = tpu.matmul %48, %9, %cst_32 {dimension_numbers = #tpu.dot_dimension_numbers<[1], [0], [0], [1], [0, 0, 1, 1], [], []>} : vector<20x16xf32>, vector<16x8xf32>, vector<20x8xf32> -> vector<20x8xf32>
    %50 = arith.addf %47, %49 : vector<20x8xf32>
    %51 = vector.extract_strided_slice %50 {offsets = [0, 0], sizes = [4, 8], strides = [1, 1]} : vector<20x8xf32> to vector<4x8xf32>
    %52 = vector.extract_strided_slice %50 {offsets = [4, 0], sizes = [16, 8], strides = [1, 1]} : vector<20x8xf32> to vector<16x8xf32>
    %53 = tpu.transpose %51, [1, 0] : vector<4x8xf32> -> vector<8x4xf32>
    %cst_33 = arith.constant dense<0.000000e+00> : vector<8x32xf32>
    %54 = tpu.matmul %53, %38, %cst_33 {dimension_numbers = #tpu.dot_dimension_numbers<[1], [0], [0], [1], [0, 0, 1, 1], [], []>} : vector<8x4xf32>, vector<4x32xf32>, vector<8x32xf32> -> vector<8x32xf32>
    %55 = arith.addf %54, %10 : vector<8x32xf32>
    %cst_34 = arith.constant dense<0xFF800000> : vector<32xf32>
    %56 = vector.multi_reduction <maximumf>, %55, %cst_34 [0] : vector<8x32xf32> to vector<32xf32>
    %57 = vector.shape_cast %56 : vector<32xf32> to vector<1x32xf32>
    %58 = vector.broadcast %57 : vector<1x32xf32> to vector<8x32xf32>
    %59 = arith.subf %55, %58 : vector<8x32xf32>
    %60 = math.exp %59 : vector<8x32xf32>
    %cst_35 = arith.constant dense<0.000000e+00> : vector<32xf32>
    %61 = vector.multi_reduction <add>, %60, %cst_35 [0] : vector<8x32xf32> to vector<32xf32>
    %62 = vector.shape_cast %61 : vector<32xf32> to vector<1x32xf32>
    %63 = tpu.reciprocal %62 {approx = true} : vector<1x32xf32> -> vector<1x32xf32>
    %64 = vector.broadcast %63 : vector<1x32xf32> to vector<8x32xf32>
    %65 = arith.mulf %60, %64 : vector<8x32xf32>
    %c1168 = arith.constant 1168 : index
    %c0_36 = arith.constant 0 : index
    %66 = vector.load %arg2[%c1168, %c0_36] : memref<2680x48xf32, #tpu.memory_space<vmem>>, vector<32x16xf32>
    %cst_37 = arith.constant dense<0.000000e+00> : vector<16x32xf32>
    %67 = tpu.matmul %52, %65, %cst_37 {dimension_numbers = #tpu.dot_dimension_numbers<[1], [0], [0], [1], [0, 0, 1, 1], [], []>} : vector<16x8xf32>, vector<8x32xf32>, vector<16x32xf32> -> vector<16x32xf32>
    %cst_38 = arith.constant dense<0.000000e+00> : vector<32x32xf32>
    %68 = tpu.matmul %66, %67, %cst_38 {dimension_numbers = #tpu.dot_dimension_numbers<[1], [0], [0], [1], [0, 0, 1, 1], [], []>} : vector<32x16xf32>, vector<16x32xf32>, vector<32x32xf32> -> vector<32x32xf32>
    %c1200 = arith.constant 1200 : index
    %c0_39 = arith.constant 0 : index
    %69 = vector.load %arg2[%c1200, %c0_39] : memref<2680x48xf32, #tpu.memory_space<vmem>>, vector<1x1xf32>
    %70 = vector.broadcast %69 : vector<1x1xf32> to vector<32x32xf32>
    %71 = arith.mulf %70, %68 : vector<32x32xf32>
    %72 = arith.addf %35, %71 : vector<32x32xf32>
    %73 = arith.addf %35, %72 : vector<32x32xf32>
    %c1208 = arith.constant 1208 : index
    %c0_40 = arith.constant 0 : index
    %74 = vector.load %arg2[%c1208, %c0_40] : memref<2680x48xf32, #tpu.memory_space<vmem>>, vector<48x32xf32>
    %c1256 = arith.constant 1256 : index
    %c0_41 = arith.constant 0 : index
    %75 = vector.load %arg2[%c1256, %c0_41] : memref<2680x48xf32, #tpu.memory_space<vmem>>, vector<16x1xf32>
    %cst_42 = arith.constant dense<0.000000e+00> : vector<48x32xf32>
    %76 = tpu.matmul %74, %73, %cst_42 {dimension_numbers = #tpu.dot_dimension_numbers<[1], [0], [0], [1], [0, 0, 1, 1], [], []>} : vector<48x32xf32>, vector<32x32xf32>, vector<48x32xf32> -> vector<48x32xf32>
    %77 = vector.extract_strided_slice %76 {offsets = [16, 0], sizes = [16, 32], strides = [1, 1]} : vector<48x32xf32> to vector<16x32xf32>
    %78 = vector.extract_strided_slice %76 {offsets = [0, 0], sizes = [16, 32], strides = [1, 1]} : vector<48x32xf32> to vector<16x32xf32>
    %cst_43 = arith.constant dense<0.000000e+00> : vector<16x32xf32>
    %79 = tpu.matmul %78, %0, %cst_43 {dimension_numbers = #tpu.dot_dimension_numbers<[1], [0], [0], [1], [0, 0, 1, 1], [], []>} : vector<16x32xf32>, vector<32x32xf32>, vector<16x32xf32> -> vector<16x32xf32>
    %80 = arith.addf %77, %79 : vector<16x32xf32>
    %81 = vector.extract_strided_slice %76 {offsets = [32, 0], sizes = [16, 32], strides = [1, 1]} : vector<48x32xf32> to vector<16x32xf32>
    %cst_44 = arith.constant dense<0.000000e+00> : vector<16x32xf32>
    %82 = tpu.matmul %81, %1, %cst_44 {dimension_numbers = #tpu.dot_dimension_numbers<[1], [0], [0], [1], [0, 0, 1, 1], [], []>} : vector<16x32xf32>, vector<32x32xf32>, vector<16x32xf32> -> vector<16x32xf32>
    %83 = arith.addf %80, %82 : vector<16x32xf32>
    %84 = vector.broadcast %75 : vector<16x1xf32> to vector<16x32xf32>
    %85 = arith.addf %83, %84 : vector<16x32xf32>
    %cst_45 = arith.constant 0.000000e+00 : f32
    %86 = vector.broadcast %cst_45 : f32 to vector<16x32xf32>
    %87 = arith.maximumf %85, %86 : vector<16x32xf32>
    %c1272 = arith.constant 1272 : index
    %c0_46 = arith.constant 0 : index
    %88 = vector.load %arg2[%c1272, %c0_46] : memref<2680x48xf32, #tpu.memory_space<vmem>>, vector<48x16xf32>
    %c1320 = arith.constant 1320 : index
    %c0_47 = arith.constant 0 : index
    %89 = vector.load %arg2[%c1320, %c0_47] : memref<2680x48xf32, #tpu.memory_space<vmem>>, vector<16x1xf32>
    %cst_48 = arith.constant dense<0.000000e+00> : vector<48x32xf32>
    %90 = tpu.matmul %88, %87, %cst_48 {dimension_numbers = #tpu.dot_dimension_numbers<[1], [0], [0], [1], [0, 0, 1, 1], [], []>} : vector<48x16xf32>, vector<16x32xf32>, vector<48x32xf32> -> vector<48x32xf32>
    %91 = vector.extract_strided_slice %90 {offsets = [16, 0], sizes = [16, 32], strides = [1, 1]} : vector<48x32xf32> to vector<16x32xf32>
    %92 = vector.extract_strided_slice %90 {offsets = [0, 0], sizes = [16, 32], strides = [1, 1]} : vector<48x32xf32> to vector<16x32xf32>
    %cst_49 = arith.constant dense<0.000000e+00> : vector<16x32xf32>
    %93 = tpu.matmul %92, %0, %cst_49 {dimension_numbers = #tpu.dot_dimension_numbers<[1], [0], [0], [1], [0, 0, 1, 1], [], []>} : vector<16x32xf32>, vector<32x32xf32>, vector<16x32xf32> -> vector<16x32xf32>
    %94 = arith.addf %91, %93 : vector<16x32xf32>
    %95 = vector.extract_strided_slice %90 {offsets = [32, 0], sizes = [16, 32], strides = [1, 1]} : vector<48x32xf32> to vector<16x32xf32>
    %cst_50 = arith.constant dense<0.000000e+00> : vector<16x32xf32>
    %96 = tpu.matmul %95, %1, %cst_50 {dimension_numbers = #tpu.dot_dimension_numbers<[1], [0], [0], [1], [0, 0, 1, 1], [], []>} : vector<16x32xf32>, vector<32x32xf32>, vector<16x32xf32> -> vector<16x32xf32>
    %97 = arith.addf %94, %96 : vector<16x32xf32>
    %98 = vector.broadcast %89 : vector<16x1xf32> to vector<16x32xf32>
    %99 = arith.addf %97, %98 : vector<16x32xf32>
    %cst_51 = arith.constant 0.000000e+00 : f32
    %100 = vector.broadcast %cst_51 : f32 to vector<16x32xf32>
    %101 = arith.maximumf %99, %100 : vector<16x32xf32>
    %c1336 = arith.constant 1336 : index
    %c0_52 = arith.constant 0 : index
    %102 = vector.load %arg2[%c1336, %c0_52] : memref<2680x48xf32, #tpu.memory_space<vmem>>, vector<48x16xf32>
    %c1384 = arith.constant 1384 : index
    %c0_53 = arith.constant 0 : index
    %103 = vector.load %arg2[%c1384, %c0_53] : memref<2680x48xf32, #tpu.memory_space<vmem>>, vector<16x1xf32>
    %cst_54 = arith.constant dense<0.000000e+00> : vector<48x32xf32>
    %104 = tpu.matmul %102, %101, %cst_54 {dimension_numbers = #tpu.dot_dimension_numbers<[1], [0], [0], [1], [0, 0, 1, 1], [], []>} : vector<48x16xf32>, vector<16x32xf32>, vector<48x32xf32> -> vector<48x32xf32>
    %105 = vector.extract_strided_slice %104 {offsets = [16, 0], sizes = [16, 32], strides = [1, 1]} : vector<48x32xf32> to vector<16x32xf32>
    %106 = vector.extract_strided_slice %104 {offsets = [0, 0], sizes = [16, 32], strides = [1, 1]} : vector<48x32xf32> to vector<16x32xf32>
    %cst_55 = arith.constant dense<0.000000e+00> : vector<16x32xf32>
    %107 = tpu.matmul %106, %0, %cst_55 {dimension_numbers = #tpu.dot_dimension_numbers<[1], [0], [0], [1], [0, 0, 1, 1], [], []>} : vector<16x32xf32>, vector<32x32xf32>, vector<16x32xf32> -> vector<16x32xf32>
    %108 = arith.addf %105, %107 : vector<16x32xf32>
    %109 = vector.extract_strided_slice %104 {offsets = [32, 0], sizes = [16, 32], strides = [1, 1]} : vector<48x32xf32> to vector<16x32xf32>
    %cst_56 = arith.constant dense<0.000000e+00> : vector<16x32xf32>
    %110 = tpu.matmul %109, %1, %cst_56 {dimension_numbers = #tpu.dot_dimension_numbers<[1], [0], [0], [1], [0, 0, 1, 1], [], []>} : vector<16x32xf32>, vector<32x32xf32>, vector<16x32xf32> -> vector<16x32xf32>
    %111 = arith.addf %108, %110 : vector<16x32xf32>
    %112 = vector.broadcast %103 : vector<16x1xf32> to vector<16x32xf32>
    %113 = arith.addf %111, %112 : vector<16x32xf32>
    %cst_57 = arith.constant 0.000000e+00 : f32
    %114 = vector.broadcast %cst_57 : f32 to vector<16x32xf32>
    %115 = arith.maximumf %113, %114 : vector<16x32xf32>
    %c1400 = arith.constant 1400 : index
    %c0_58 = arith.constant 0 : index
    %116 = vector.load %arg2[%c1400, %c0_58] : memref<2680x48xf32, #tpu.memory_space<vmem>>, vector<96x16xf32>
    %c1496 = arith.constant 1496 : index
    %c0_59 = arith.constant 0 : index
    %117 = vector.load %arg2[%c1496, %c0_59] : memref<2680x48xf32, #tpu.memory_space<vmem>>, vector<32x1xf32>
    %cst_60 = arith.constant dense<0.000000e+00> : vector<96x32xf32>
    %118 = tpu.matmul %116, %115, %cst_60 {dimension_numbers = #tpu.dot_dimension_numbers<[1], [0], [0], [1], [0, 0, 1, 1], [], []>} : vector<96x16xf32>, vector<16x32xf32>, vector<96x32xf32> -> vector<96x32xf32>
    %119 = vector.extract_strided_slice %118 {offsets = [32, 0], sizes = [32, 32], strides = [1, 1]} : vector<96x32xf32> to vector<32x32xf32>
    %120 = vector.extract_strided_slice %118 {offsets = [0, 0], sizes = [32, 32], strides = [1, 1]} : vector<96x32xf32> to vector<32x32xf32>
    %cst_61 = arith.constant dense<0.000000e+00> : vector<32x32xf32>
    %121 = tpu.matmul %120, %0, %cst_61 {dimension_numbers = #tpu.dot_dimension_numbers<[1], [0], [0], [1], [0, 0, 1, 1], [], []>} : vector<32x32xf32>, vector<32x32xf32>, vector<32x32xf32> -> vector<32x32xf32>
    %122 = arith.addf %119, %121 : vector<32x32xf32>
    %123 = vector.extract_strided_slice %118 {offsets = [64, 0], sizes = [32, 32], strides = [1, 1]} : vector<96x32xf32> to vector<32x32xf32>
    %cst_62 = arith.constant dense<0.000000e+00> : vector<32x32xf32>
    %124 = tpu.matmul %123, %1, %cst_62 {dimension_numbers = #tpu.dot_dimension_numbers<[1], [0], [0], [1], [0, 0, 1, 1], [], []>} : vector<32x32xf32>, vector<32x32xf32>, vector<32x32xf32> -> vector<32x32xf32>
    %125 = arith.addf %122, %124 : vector<32x32xf32>
    %126 = vector.broadcast %117 : vector<32x1xf32> to vector<32x32xf32>
    %127 = arith.addf %125, %126 : vector<32x32xf32>
    %cst_63 = arith.constant 0.000000e+00 : f32
    %128 = vector.broadcast %cst_63 : f32 to vector<32x32xf32>
    %129 = arith.maximumf %127, %128 : vector<32x32xf32>
    %130 = arith.addf %129, %35 : vector<32x32xf32>
    %c1528 = arith.constant 1528 : index
    %c0_64 = arith.constant 0 : index
    %131 = vector.load %arg2[%c1528, %c0_64] : memref<2680x48xf32, #tpu.memory_space<vmem>>, vector<24x32xf32>
    %cst_65 = arith.constant dense<0.000000e+00> : vector<24x32xf32>
    %132 = tpu.matmul %131, %130, %cst_65 {dimension_numbers = #tpu.dot_dimension_numbers<[1], [0], [0], [1], [0, 0, 1, 1], [], []>} : vector<24x32xf32>, vector<32x32xf32>, vector<24x32xf32> -> vector<24x32xf32>
    %133 = vector.extract_strided_slice %132 {offsets = [0, 0], sizes = [4, 32], strides = [1, 1]} : vector<24x32xf32> to vector<4x32xf32>
    %134 = vector.extract_strided_slice %132 {offsets = [4, 0], sizes = [20, 32], strides = [1, 1]} : vector<24x32xf32> to vector<20x32xf32>
    %cst_66 = arith.constant dense<0.000000e+00> : vector<20x16xf32>
    %135 = tpu.matmul %134, %2, %cst_66 {dimension_numbers = #tpu.dot_dimension_numbers<[1], [0], [0], [1], [0, 0, 1, 1], [], []>} : vector<20x32xf32>, vector<32x16xf32>, vector<20x16xf32> -> vector<20x16xf32>
    %cst_67 = arith.constant dense<0.000000e+00> : vector<20x16xf32>
    %136 = tpu.matmul %134, %3, %cst_67 {dimension_numbers = #tpu.dot_dimension_numbers<[1], [0], [0], [1], [0, 0, 1, 1], [], []>} : vector<20x32xf32>, vector<32x16xf32>, vector<20x16xf32> -> vector<20x16xf32>
    %137 = arith.maximumf %135, %136 : vector<20x16xf32>
    %cst_68 = arith.constant dense<0.000000e+00> : vector<10x16xf32>
    %138 = tpu.matmul %4, %137, %cst_68 {dimension_numbers = #tpu.dot_dimension_numbers<[1], [0], [0], [1], [0, 0, 1, 1], [], []>} : vector<10x20xf32>, vector<20x16xf32>, vector<10x16xf32> -> vector<10x16xf32>
    %cst_69 = arith.constant dense<0.000000e+00> : vector<10x16xf32>
    %139 = tpu.matmul %5, %137, %cst_69 {dimension_numbers = #tpu.dot_dimension_numbers<[1], [0], [0], [1], [0, 0, 1, 1], [], []>} : vector<10x20xf32>, vector<20x16xf32>, vector<10x16xf32> -> vector<10x16xf32>
    %140 = arith.maximumf %138, %139 : vector<10x16xf32>
    %cst_70 = arith.constant dense<0.000000e+00> : vector<20x16xf32>
    %141 = tpu.matmul %6, %140, %cst_70 {dimension_numbers = #tpu.dot_dimension_numbers<[1], [0], [0], [1], [0, 0, 1, 1], [], []>} : vector<20x10xf32>, vector<10x16xf32>, vector<20x16xf32> -> vector<20x16xf32>
    %cst_71 = arith.constant dense<0.000000e+00> : vector<20x8xf32>
    %142 = tpu.matmul %141, %8, %cst_71 {dimension_numbers = #tpu.dot_dimension_numbers<[1], [0], [0], [1], [0, 0, 1, 1], [], []>} : vector<20x16xf32>, vector<16x8xf32>, vector<20x8xf32> -> vector<20x8xf32>
    %cst_72 = arith.constant dense<0.000000e+00> : vector<20x16xf32>
    %143 = tpu.matmul %7, %140, %cst_72 {dimension_numbers = #tpu.dot_dimension_numbers<[1], [0], [0], [1], [0, 0, 1, 1], [], []>} : vector<20x10xf32>, vector<10x16xf32>, vector<20x16xf32> -> vector<20x16xf32>
    %cst_73 = arith.constant dense<0.000000e+00> : vector<20x8xf32>
    %144 = tpu.matmul %143, %9, %cst_73 {dimension_numbers = #tpu.dot_dimension_numbers<[1], [0], [0], [1], [0, 0, 1, 1], [], []>} : vector<20x16xf32>, vector<16x8xf32>, vector<20x8xf32> -> vector<20x8xf32>
    %145 = arith.addf %142, %144 : vector<20x8xf32>
    %146 = vector.extract_strided_slice %145 {offsets = [0, 0], sizes = [4, 8], strides = [1, 1]} : vector<20x8xf32> to vector<4x8xf32>
    %147 = vector.extract_strided_slice %145 {offsets = [4, 0], sizes = [16, 8], strides = [1, 1]} : vector<20x8xf32> to vector<16x8xf32>
    %148 = tpu.transpose %146, [1, 0] : vector<4x8xf32> -> vector<8x4xf32>
    %cst_74 = arith.constant dense<0.000000e+00> : vector<8x32xf32>
    %149 = tpu.matmul %148, %133, %cst_74 {dimension_numbers = #tpu.dot_dimension_numbers<[1], [0], [0], [1], [0, 0, 1, 1], [], []>} : vector<8x4xf32>, vector<4x32xf32>, vector<8x32xf32> -> vector<8x32xf32>
    %150 = arith.addf %149, %10 : vector<8x32xf32>
    %cst_75 = arith.constant dense<0xFF800000> : vector<32xf32>
    %151 = vector.multi_reduction <maximumf>, %150, %cst_75 [0] : vector<8x32xf32> to vector<32xf32>
    %152 = vector.shape_cast %151 : vector<32xf32> to vector<1x32xf32>
    %153 = vector.broadcast %152 : vector<1x32xf32> to vector<8x32xf32>
    %154 = arith.subf %150, %153 : vector<8x32xf32>
    %155 = math.exp %154 : vector<8x32xf32>
    %cst_76 = arith.constant dense<0.000000e+00> : vector<32xf32>
    %156 = vector.multi_reduction <add>, %155, %cst_76 [0] : vector<8x32xf32> to vector<32xf32>
    %157 = vector.shape_cast %156 : vector<32xf32> to vector<1x32xf32>
    %158 = tpu.reciprocal %157 {approx = true} : vector<1x32xf32> -> vector<1x32xf32>
    %159 = vector.broadcast %158 : vector<1x32xf32> to vector<8x32xf32>
    %160 = arith.mulf %155, %159 : vector<8x32xf32>
    %c1552 = arith.constant 1552 : index
    %c0_77 = arith.constant 0 : index
    %161 = vector.load %arg2[%c1552, %c0_77] : memref<2680x48xf32, #tpu.memory_space<vmem>>, vector<32x16xf32>
    %cst_78 = arith.constant dense<0.000000e+00> : vector<16x32xf32>
    %162 = tpu.matmul %147, %160, %cst_78 {dimension_numbers = #tpu.dot_dimension_numbers<[1], [0], [0], [1], [0, 0, 1, 1], [], []>} : vector<16x8xf32>, vector<8x32xf32>, vector<16x32xf32> -> vector<16x32xf32>
    %cst_79 = arith.constant dense<0.000000e+00> : vector<32x32xf32>
    %163 = tpu.matmul %161, %162, %cst_79 {dimension_numbers = #tpu.dot_dimension_numbers<[1], [0], [0], [1], [0, 0, 1, 1], [], []>} : vector<32x16xf32>, vector<16x32xf32>, vector<32x32xf32> -> vector<32x32xf32>
    %c1584 = arith.constant 1584 : index
    %c0_80 = arith.constant 0 : index
    %164 = vector.load %arg2[%c1584, %c0_80] : memref<2680x48xf32, #tpu.memory_space<vmem>>, vector<1x1xf32>
    %165 = vector.broadcast %164 : vector<1x1xf32> to vector<32x32xf32>
    %166 = arith.mulf %165, %163 : vector<32x32xf32>
    %167 = arith.addf %130, %166 : vector<32x32xf32>
    %168 = arith.addf %130, %167 : vector<32x32xf32>
    %c1592 = arith.constant 1592 : index
    %c0_81 = arith.constant 0 : index
    %169 = vector.load %arg2[%c1592, %c0_81] : memref<2680x48xf32, #tpu.memory_space<vmem>>, vector<48x32xf32>
    %c1640 = arith.constant 1640 : index
    %c0_82 = arith.constant 0 : index
    %170 = vector.load %arg2[%c1640, %c0_82] : memref<2680x48xf32, #tpu.memory_space<vmem>>, vector<16x1xf32>
    %cst_83 = arith.constant dense<0.000000e+00> : vector<48x32xf32>
    %171 = tpu.matmul %169, %168, %cst_83 {dimension_numbers = #tpu.dot_dimension_numbers<[1], [0], [0], [1], [0, 0, 1, 1], [], []>} : vector<48x32xf32>, vector<32x32xf32>, vector<48x32xf32> -> vector<48x32xf32>
    %172 = vector.extract_strided_slice %171 {offsets = [16, 0], sizes = [16, 32], strides = [1, 1]} : vector<48x32xf32> to vector<16x32xf32>
    %173 = vector.extract_strided_slice %171 {offsets = [0, 0], sizes = [16, 32], strides = [1, 1]} : vector<48x32xf32> to vector<16x32xf32>
    %cst_84 = arith.constant dense<0.000000e+00> : vector<16x32xf32>
    %174 = tpu.matmul %173, %0, %cst_84 {dimension_numbers = #tpu.dot_dimension_numbers<[1], [0], [0], [1], [0, 0, 1, 1], [], []>} : vector<16x32xf32>, vector<32x32xf32>, vector<16x32xf32> -> vector<16x32xf32>
    %175 = arith.addf %172, %174 : vector<16x32xf32>
    %176 = vector.extract_strided_slice %171 {offsets = [32, 0], sizes = [16, 32], strides = [1, 1]} : vector<48x32xf32> to vector<16x32xf32>
    %cst_85 = arith.constant dense<0.000000e+00> : vector<16x32xf32>
    %177 = tpu.matmul %176, %1, %cst_85 {dimension_numbers = #tpu.dot_dimension_numbers<[1], [0], [0], [1], [0, 0, 1, 1], [], []>} : vector<16x32xf32>, vector<32x32xf32>, vector<16x32xf32> -> vector<16x32xf32>
    %178 = arith.addf %175, %177 : vector<16x32xf32>
    %179 = vector.broadcast %170 : vector<16x1xf32> to vector<16x32xf32>
    %180 = arith.addf %178, %179 : vector<16x32xf32>
    %cst_86 = arith.constant 0.000000e+00 : f32
    %181 = vector.broadcast %cst_86 : f32 to vector<16x32xf32>
    %182 = arith.maximumf %180, %181 : vector<16x32xf32>
    %c1656 = arith.constant 1656 : index
    %c0_87 = arith.constant 0 : index
    %183 = vector.load %arg2[%c1656, %c0_87] : memref<2680x48xf32, #tpu.memory_space<vmem>>, vector<48x16xf32>
    %c1704 = arith.constant 1704 : index
    %c0_88 = arith.constant 0 : index
    %184 = vector.load %arg2[%c1704, %c0_88] : memref<2680x48xf32, #tpu.memory_space<vmem>>, vector<16x1xf32>
    %cst_89 = arith.constant dense<0.000000e+00> : vector<48x32xf32>
    %185 = tpu.matmul %183, %182, %cst_89 {dimension_numbers = #tpu.dot_dimension_numbers<[1], [0], [0], [1], [0, 0, 1, 1], [], []>} : vector<48x16xf32>, vector<16x32xf32>, vector<48x32xf32> -> vector<48x32xf32>
    %186 = vector.extract_strided_slice %185 {offsets = [16, 0], sizes = [16, 32], strides = [1, 1]} : vector<48x32xf32> to vector<16x32xf32>
    %187 = vector.extract_strided_slice %185 {offsets = [0, 0], sizes = [16, 32], strides = [1, 1]} : vector<48x32xf32> to vector<16x32xf32>
    %cst_90 = arith.constant dense<0.000000e+00> : vector<16x32xf32>
    %188 = tpu.matmul %187, %0, %cst_90 {dimension_numbers = #tpu.dot_dimension_numbers<[1], [0], [0], [1], [0, 0, 1, 1], [], []>} : vector<16x32xf32>, vector<32x32xf32>, vector<16x32xf32> -> vector<16x32xf32>
    %189 = arith.addf %186, %188 : vector<16x32xf32>
    %190 = vector.extract_strided_slice %185 {offsets = [32, 0], sizes = [16, 32], strides = [1, 1]} : vector<48x32xf32> to vector<16x32xf32>
    %cst_91 = arith.constant dense<0.000000e+00> : vector<16x32xf32>
    %191 = tpu.matmul %190, %1, %cst_91 {dimension_numbers = #tpu.dot_dimension_numbers<[1], [0], [0], [1], [0, 0, 1, 1], [], []>} : vector<16x32xf32>, vector<32x32xf32>, vector<16x32xf32> -> vector<16x32xf32>
    %192 = arith.addf %189, %191 : vector<16x32xf32>
    %193 = vector.broadcast %184 : vector<16x1xf32> to vector<16x32xf32>
    %194 = arith.addf %192, %193 : vector<16x32xf32>
    %cst_92 = arith.constant 0.000000e+00 : f32
    %195 = vector.broadcast %cst_92 : f32 to vector<16x32xf32>
    %196 = arith.maximumf %194, %195 : vector<16x32xf32>
    %c1720 = arith.constant 1720 : index
    %c0_93 = arith.constant 0 : index
    %197 = vector.load %arg2[%c1720, %c0_93] : memref<2680x48xf32, #tpu.memory_space<vmem>>, vector<48x16xf32>
    %c1768 = arith.constant 1768 : index
    %c0_94 = arith.constant 0 : index
    %198 = vector.load %arg2[%c1768, %c0_94] : memref<2680x48xf32, #tpu.memory_space<vmem>>, vector<16x1xf32>
    %cst_95 = arith.constant dense<0.000000e+00> : vector<48x32xf32>
    %199 = tpu.matmul %197, %196, %cst_95 {dimension_numbers = #tpu.dot_dimension_numbers<[1], [0], [0], [1], [0, 0, 1, 1], [], []>} : vector<48x16xf32>, vector<16x32xf32>, vector<48x32xf32> -> vector<48x32xf32>
    %200 = vector.extract_strided_slice %199 {offsets = [16, 0], sizes = [16, 32], strides = [1, 1]} : vector<48x32xf32> to vector<16x32xf32>
    %201 = vector.extract_strided_slice %199 {offsets = [0, 0], sizes = [16, 32], strides = [1, 1]} : vector<48x32xf32> to vector<16x32xf32>
    %cst_96 = arith.constant dense<0.000000e+00> : vector<16x32xf32>
    %202 = tpu.matmul %201, %0, %cst_96 {dimension_numbers = #tpu.dot_dimension_numbers<[1], [0], [0], [1], [0, 0, 1, 1], [], []>} : vector<16x32xf32>, vector<32x32xf32>, vector<16x32xf32> -> vector<16x32xf32>
    %203 = arith.addf %200, %202 : vector<16x32xf32>
    %204 = vector.extract_strided_slice %199 {offsets = [32, 0], sizes = [16, 32], strides = [1, 1]} : vector<48x32xf32> to vector<16x32xf32>
    %cst_97 = arith.constant dense<0.000000e+00> : vector<16x32xf32>
    %205 = tpu.matmul %204, %1, %cst_97 {dimension_numbers = #tpu.dot_dimension_numbers<[1], [0], [0], [1], [0, 0, 1, 1], [], []>} : vector<16x32xf32>, vector<32x32xf32>, vector<16x32xf32> -> vector<16x32xf32>
    %206 = arith.addf %203, %205 : vector<16x32xf32>
    %207 = vector.broadcast %198 : vector<16x1xf32> to vector<16x32xf32>
    %208 = arith.addf %206, %207 : vector<16x32xf32>
    %cst_98 = arith.constant 0.000000e+00 : f32
    %209 = vector.broadcast %cst_98 : f32 to vector<16x32xf32>
    %210 = arith.maximumf %208, %209 : vector<16x32xf32>
    %c1784 = arith.constant 1784 : index
    %c0_99 = arith.constant 0 : index
    %211 = vector.load %arg2[%c1784, %c0_99] : memref<2680x48xf32, #tpu.memory_space<vmem>>, vector<96x16xf32>
    %c1880 = arith.constant 1880 : index
    %c0_100 = arith.constant 0 : index
    %212 = vector.load %arg2[%c1880, %c0_100] : memref<2680x48xf32, #tpu.memory_space<vmem>>, vector<32x1xf32>
    %cst_101 = arith.constant dense<0.000000e+00> : vector<96x32xf32>
    %213 = tpu.matmul %211, %210, %cst_101 {dimension_numbers = #tpu.dot_dimension_numbers<[1], [0], [0], [1], [0, 0, 1, 1], [], []>} : vector<96x16xf32>, vector<16x32xf32>, vector<96x32xf32> -> vector<96x32xf32>
    %214 = vector.extract_strided_slice %213 {offsets = [32, 0], sizes = [32, 32], strides = [1, 1]} : vector<96x32xf32> to vector<32x32xf32>
    %215 = vector.extract_strided_slice %213 {offsets = [0, 0], sizes = [32, 32], strides = [1, 1]} : vector<96x32xf32> to vector<32x32xf32>
    %cst_102 = arith.constant dense<0.000000e+00> : vector<32x32xf32>
    %216 = tpu.matmul %215, %0, %cst_102 {dimension_numbers = #tpu.dot_dimension_numbers<[1], [0], [0], [1], [0, 0, 1, 1], [], []>} : vector<32x32xf32>, vector<32x32xf32>, vector<32x32xf32> -> vector<32x32xf32>
    %217 = arith.addf %214, %216 : vector<32x32xf32>
    %218 = vector.extract_strided_slice %213 {offsets = [64, 0], sizes = [32, 32], strides = [1, 1]} : vector<96x32xf32> to vector<32x32xf32>
    %cst_103 = arith.constant dense<0.000000e+00> : vector<32x32xf32>
    %219 = tpu.matmul %218, %1, %cst_103 {dimension_numbers = #tpu.dot_dimension_numbers<[1], [0], [0], [1], [0, 0, 1, 1], [], []>} : vector<32x32xf32>, vector<32x32xf32>, vector<32x32xf32> -> vector<32x32xf32>
    %220 = arith.addf %217, %219 : vector<32x32xf32>
    %221 = vector.broadcast %212 : vector<32x1xf32> to vector<32x32xf32>
    %222 = arith.addf %220, %221 : vector<32x32xf32>
    %cst_104 = arith.constant 0.000000e+00 : f32
    %223 = vector.broadcast %cst_104 : f32 to vector<32x32xf32>
    %224 = arith.maximumf %222, %223 : vector<32x32xf32>
    %225 = arith.addf %224, %130 : vector<32x32xf32>
    %226 = tpu.transpose %225, [1, 0] : vector<32x32xf32> -> vector<32x32xf32>
    %c32_105 = arith.constant 32 : index
    %c0_106 = arith.constant 0 : index
    %227 = vector.load %arg3[%c32_105, %c0_106] : memref<128x256xf32, #tpu.memory_space<vmem>>, vector<32x256xf32>
    %c1096 = arith.constant 1096 : index
    %c0_107 = arith.constant 0 : index
    %228 = vector.load %arg2[%c1096, %c0_107] : memref<2680x48xf32, #tpu.memory_space<vmem>>, vector<1x16xf32>
    %cst_108 = arith.constant dense<0.000000e+00> : vector<32x256xf32>
    %229 = tpu.matmul %226, %227, %cst_108 {dimension_numbers = #tpu.dot_dimension_numbers<[1], [0], [0], [1], [0, 0, 1, 1], [], []>} : vector<32x32xf32>, vector<32x256xf32>, vector<32x256xf32> -> vector<32x256xf32>
    %230 = arith.mulf %229, %11 : vector<32x256xf32>
    %cst_109 = arith.constant dense<0.000000e+00> : vector<2x256xf32>
    %231 = tpu.matmul %14, %230, %cst_109 {dimension_numbers = #tpu.dot_dimension_numbers<[1], [0], [0], [1], [0, 0, 1, 1], [], []>} : vector<2x32xf32>, vector<32x256xf32>, vector<2x256xf32> -> vector<2x256xf32>
    %cst_110 = arith.constant dense<0.000000e+00> : vector<2x16xf32>
    %232 = tpu.matmul %231, %13, %cst_110 {dimension_numbers = #tpu.dot_dimension_numbers<[1], [0], [0], [1], [0, 0, 1, 1], [], []>} : vector<2x256xf32>, vector<256x16xf32>, vector<2x16xf32> -> vector<2x16xf32>
    %233 = vector.broadcast %228 : vector<1x16xf32> to vector<2x16xf32>
    %234 = arith.addf %232, %233 : vector<2x16xf32>
    %c64_111 = arith.constant 64 : index
    %c0_112 = arith.constant 0 : index
    %235 = vector.load %arg3[%c64_111, %c0_112] : memref<128x256xf32, #tpu.memory_space<vmem>>, vector<32x256xf32>
    %c1104 = arith.constant 1104 : index
    %c0_113 = arith.constant 0 : index
    %236 = vector.load %arg2[%c1104, %c0_113] : memref<2680x48xf32, #tpu.memory_space<vmem>>, vector<1x16xf32>
    %cst_114 = arith.constant dense<0.000000e+00> : vector<32x256xf32>
    %237 = tpu.matmul %226, %235, %cst_114 {dimension_numbers = #tpu.dot_dimension_numbers<[1], [0], [0], [1], [0, 0, 1, 1], [], []>} : vector<32x32xf32>, vector<32x256xf32>, vector<32x256xf32> -> vector<32x256xf32>
    %238 = arith.mulf %237, %11 : vector<32x256xf32>
    %cst_115 = arith.constant dense<0.000000e+00> : vector<2x256xf32>
    %239 = tpu.matmul %14, %238, %cst_115 {dimension_numbers = #tpu.dot_dimension_numbers<[1], [0], [0], [1], [0, 0, 1, 1], [], []>} : vector<2x32xf32>, vector<32x256xf32>, vector<2x256xf32> -> vector<2x256xf32>
    %cst_116 = arith.constant dense<0.000000e+00> : vector<2x16xf32>
    %240 = tpu.matmul %239, %13, %cst_116 {dimension_numbers = #tpu.dot_dimension_numbers<[1], [0], [0], [1], [0, 0, 1, 1], [], []>} : vector<2x256xf32>, vector<256x16xf32>, vector<2x16xf32> -> vector<2x16xf32>
    %241 = vector.broadcast %236 : vector<1x16xf32> to vector<2x16xf32>
    %242 = arith.addf %240, %241 : vector<2x16xf32>
    %c0_117 = arith.constant 0 : index
    %c0_118 = arith.constant 0 : index
    %243 = vector.load %arg1[%c0_117, %c0_118] : memref<2x16xf32, #tpu.memory_space<vmem>>, vector<2x16xf32>
    %cst_119 = arith.constant 5.000000e-01 : f32
    %244 = vector.broadcast %cst_119 : f32 to vector<2x16xf32>
    %245 = arith.mulf %244, %242 : vector<2x16xf32>
    %246 = math.exp %245 : vector<2x16xf32>
    %247 = arith.mulf %243, %246 : vector<2x16xf32>
    %248 = arith.addf %234, %247 : vector<2x16xf32>
    %249 = tpu.transpose %248, [1, 0] : vector<2x16xf32> -> vector<16x2xf32>
    %cst_120 = arith.constant dense<0.000000e+00> : vector<256x2xf32>
    %250 = tpu.matmul %13, %249, %cst_120 {dimension_numbers = #tpu.dot_dimension_numbers<[1], [0], [0], [1], [0, 0, 1, 1], [], []>} : vector<256x16xf32>, vector<16x2xf32>, vector<256x2xf32> -> vector<256x2xf32>
    %cst_121 = arith.constant dense<0.000000e+00> : vector<256x32xf32>
    %251 = tpu.matmul %250, %14, %cst_121 {dimension_numbers = #tpu.dot_dimension_numbers<[1], [0], [0], [1], [0, 0, 1, 1], [], []>} : vector<256x2xf32>, vector<2x32xf32>, vector<256x32xf32> -> vector<256x32xf32>
    %252 = arith.mulf %251, %12 : vector<256x32xf32>
    %c96_122 = arith.constant 96 : index
    %c0_123 = arith.constant 0 : index
    %253 = vector.load %arg3[%c96_122, %c0_123] : memref<128x256xf32, #tpu.memory_space<vmem>>, vector<32x256xf32>
    %cst_124 = arith.constant dense<0.000000e+00> : vector<32x32xf32>
    %254 = tpu.matmul %253, %252, %cst_124 {dimension_numbers = #tpu.dot_dimension_numbers<[1], [0], [0], [1], [0, 0, 1, 1], [], []>} : vector<32x256xf32>, vector<256x32xf32>, vector<32x32xf32> -> vector<32x32xf32>
    %c1112 = arith.constant 1112 : index
    %c0_125 = arith.constant 0 : index
    %255 = vector.load %arg2[%c1112, %c0_125] : memref<2680x48xf32, #tpu.memory_space<vmem>>, vector<32x32xf32>
    %256 = arith.addf %254, %255 : vector<32x32xf32>
    %c1000 = arith.constant 1000 : index
    %c0_126 = arith.constant 0 : index
    %257 = vector.load %arg2[%c1000, %c0_126] : memref<2680x48xf32, #tpu.memory_space<vmem>>, vector<32x32xf32>
    %cst_127 = arith.constant dense<0.000000e+00> : vector<32x32xf32>
    %258 = tpu.matmul %257, %256, %cst_127 {dimension_numbers = #tpu.dot_dimension_numbers<[1], [0], [0], [1], [0, 0, 1, 1], [], []>} : vector<32x32xf32>, vector<32x32xf32>, vector<32x32xf32> -> vector<32x32xf32>
    %c1032 = arith.constant 1032 : index
    %c0_128 = arith.constant 0 : index
    %259 = vector.load %arg2[%c1032, %c0_128] : memref<2680x48xf32, #tpu.memory_space<vmem>>, vector<32x1xf32>
    %260 = vector.broadcast %259 : vector<32x1xf32> to vector<32x32xf32>
    %261 = vector.broadcast %24 : vector<1x32xf32> to vector<32x32xf32>
    %262 = arith.mulf %260, %261 : vector<32x32xf32>
    %263 = arith.addf %258, %262 : vector<32x32xf32>
    %c1064 = arith.constant 1064 : index
    %c0_129 = arith.constant 0 : index
    %264 = vector.load %arg2[%c1064, %c0_129] : memref<2680x48xf32, #tpu.memory_space<vmem>>, vector<32x1xf32>
    %265 = vector.broadcast %264 : vector<32x1xf32> to vector<32x32xf32>
    %266 = arith.addf %263, %265 : vector<32x32xf32>
    %cst_130 = arith.constant 0.000000e+00 : f32
    %267 = vector.broadcast %cst_130 : f32 to vector<32x32xf32>
    %268 = arith.maximumf %266, %267 : vector<32x32xf32>
    %c1976 = arith.constant 1976 : index
    %c0_131 = arith.constant 0 : index
    %269 = vector.load %arg2[%c1976, %c0_131] : memref<2680x48xf32, #tpu.memory_space<vmem>>, vector<48x32xf32>
    %c2024 = arith.constant 2024 : index
    %c0_132 = arith.constant 0 : index
    %270 = vector.load %arg2[%c2024, %c0_132] : memref<2680x48xf32, #tpu.memory_space<vmem>>, vector<16x1xf32>
    %cst_133 = arith.constant dense<0.000000e+00> : vector<48x32xf32>
    %271 = tpu.matmul %269, %268, %cst_133 {dimension_numbers = #tpu.dot_dimension_numbers<[1], [0], [0], [1], [0, 0, 1, 1], [], []>} : vector<48x32xf32>, vector<32x32xf32>, vector<48x32xf32> -> vector<48x32xf32>
    %272 = vector.extract_strided_slice %271 {offsets = [16, 0], sizes = [16, 32], strides = [1, 1]} : vector<48x32xf32> to vector<16x32xf32>
    %273 = vector.extract_strided_slice %271 {offsets = [0, 0], sizes = [16, 32], strides = [1, 1]} : vector<48x32xf32> to vector<16x32xf32>
    %cst_134 = arith.constant dense<0.000000e+00> : vector<16x32xf32>
    %274 = tpu.matmul %273, %0, %cst_134 {dimension_numbers = #tpu.dot_dimension_numbers<[1], [0], [0], [1], [0, 0, 1, 1], [], []>} : vector<16x32xf32>, vector<32x32xf32>, vector<16x32xf32> -> vector<16x32xf32>
    %275 = arith.addf %272, %274 : vector<16x32xf32>
    %276 = vector.extract_strided_slice %271 {offsets = [32, 0], sizes = [16, 32], strides = [1, 1]} : vector<48x32xf32> to vector<16x32xf32>
    %cst_135 = arith.constant dense<0.000000e+00> : vector<16x32xf32>
    %277 = tpu.matmul %276, %1, %cst_135 {dimension_numbers = #tpu.dot_dimension_numbers<[1], [0], [0], [1], [0, 0, 1, 1], [], []>} : vector<16x32xf32>, vector<32x32xf32>, vector<16x32xf32> -> vector<16x32xf32>
    %278 = arith.addf %275, %277 : vector<16x32xf32>
    %279 = vector.broadcast %270 : vector<16x1xf32> to vector<16x32xf32>
    %280 = arith.addf %278, %279 : vector<16x32xf32>
    %cst_136 = arith.constant 0.000000e+00 : f32
    %281 = vector.broadcast %cst_136 : f32 to vector<16x32xf32>
    %282 = arith.maximumf %280, %281 : vector<16x32xf32>
    %c2040 = arith.constant 2040 : index
    %c0_137 = arith.constant 0 : index
    %283 = vector.load %arg2[%c2040, %c0_137] : memref<2680x48xf32, #tpu.memory_space<vmem>>, vector<48x16xf32>
    %c2088 = arith.constant 2088 : index
    %c0_138 = arith.constant 0 : index
    %284 = vector.load %arg2[%c2088, %c0_138] : memref<2680x48xf32, #tpu.memory_space<vmem>>, vector<16x1xf32>
    %cst_139 = arith.constant dense<0.000000e+00> : vector<48x32xf32>
    %285 = tpu.matmul %283, %282, %cst_139 {dimension_numbers = #tpu.dot_dimension_numbers<[1], [0], [0], [1], [0, 0, 1, 1], [], []>} : vector<48x16xf32>, vector<16x32xf32>, vector<48x32xf32> -> vector<48x32xf32>
    %286 = vector.extract_strided_slice %285 {offsets = [16, 0], sizes = [16, 32], strides = [1, 1]} : vector<48x32xf32> to vector<16x32xf32>
    %287 = vector.extract_strided_slice %285 {offsets = [0, 0], sizes = [16, 32], strides = [1, 1]} : vector<48x32xf32> to vector<16x32xf32>
    %cst_140 = arith.constant dense<0.000000e+00> : vector<16x32xf32>
    %288 = tpu.matmul %287, %0, %cst_140 {dimension_numbers = #tpu.dot_dimension_numbers<[1], [0], [0], [1], [0, 0, 1, 1], [], []>} : vector<16x32xf32>, vector<32x32xf32>, vector<16x32xf32> -> vector<16x32xf32>
    %289 = arith.addf %286, %288 : vector<16x32xf32>
    %290 = vector.extract_strided_slice %285 {offsets = [32, 0], sizes = [16, 32], strides = [1, 1]} : vector<48x32xf32> to vector<16x32xf32>
    %cst_141 = arith.constant dense<0.000000e+00> : vector<16x32xf32>
    %291 = tpu.matmul %290, %1, %cst_141 {dimension_numbers = #tpu.dot_dimension_numbers<[1], [0], [0], [1], [0, 0, 1, 1], [], []>} : vector<16x32xf32>, vector<32x32xf32>, vector<16x32xf32> -> vector<16x32xf32>
    %292 = arith.addf %289, %291 : vector<16x32xf32>
    %293 = vector.broadcast %284 : vector<16x1xf32> to vector<16x32xf32>
    %294 = arith.addf %292, %293 : vector<16x32xf32>
    %cst_142 = arith.constant 0.000000e+00 : f32
    %295 = vector.broadcast %cst_142 : f32 to vector<16x32xf32>
    %296 = arith.maximumf %294, %295 : vector<16x32xf32>
    %c2104 = arith.constant 2104 : index
    %c0_143 = arith.constant 0 : index
    %297 = vector.load %arg2[%c2104, %c0_143] : memref<2680x48xf32, #tpu.memory_space<vmem>>, vector<48x16xf32>
    %c2152 = arith.constant 2152 : index
    %c0_144 = arith.constant 0 : index
    %298 = vector.load %arg2[%c2152, %c0_144] : memref<2680x48xf32, #tpu.memory_space<vmem>>, vector<16x1xf32>
    %cst_145 = arith.constant dense<0.000000e+00> : vector<48x32xf32>
    %299 = tpu.matmul %297, %296, %cst_145 {dimension_numbers = #tpu.dot_dimension_numbers<[1], [0], [0], [1], [0, 0, 1, 1], [], []>} : vector<48x16xf32>, vector<16x32xf32>, vector<48x32xf32> -> vector<48x32xf32>
    %300 = vector.extract_strided_slice %299 {offsets = [16, 0], sizes = [16, 32], strides = [1, 1]} : vector<48x32xf32> to vector<16x32xf32>
    %301 = vector.extract_strided_slice %299 {offsets = [0, 0], sizes = [16, 32], strides = [1, 1]} : vector<48x32xf32> to vector<16x32xf32>
    %cst_146 = arith.constant dense<0.000000e+00> : vector<16x32xf32>
    %302 = tpu.matmul %301, %0, %cst_146 {dimension_numbers = #tpu.dot_dimension_numbers<[1], [0], [0], [1], [0, 0, 1, 1], [], []>} : vector<16x32xf32>, vector<32x32xf32>, vector<16x32xf32> -> vector<16x32xf32>
    %303 = arith.addf %300, %302 : vector<16x32xf32>
    %304 = vector.extract_strided_slice %299 {offsets = [32, 0], sizes = [16, 32], strides = [1, 1]} : vector<48x32xf32> to vector<16x32xf32>
    %cst_147 = arith.constant dense<0.000000e+00> : vector<16x32xf32>
    %305 = tpu.matmul %304, %1, %cst_147 {dimension_numbers = #tpu.dot_dimension_numbers<[1], [0], [0], [1], [0, 0, 1, 1], [], []>} : vector<16x32xf32>, vector<32x32xf32>, vector<16x32xf32> -> vector<16x32xf32>
    %306 = arith.addf %303, %305 : vector<16x32xf32>
    %307 = vector.broadcast %298 : vector<16x1xf32> to vector<16x32xf32>
    %308 = arith.addf %306, %307 : vector<16x32xf32>
    %cst_148 = arith.constant 0.000000e+00 : f32
    %309 = vector.broadcast %cst_148 : f32 to vector<16x32xf32>
    %310 = arith.maximumf %308, %309 : vector<16x32xf32>
    %c2168 = arith.constant 2168 : index
    %c0_149 = arith.constant 0 : index
    %311 = vector.load %arg2[%c2168, %c0_149] : memref<2680x48xf32, #tpu.memory_space<vmem>>, vector<96x16xf32>
    %c2264 = arith.constant 2264 : index
    %c0_150 = arith.constant 0 : index
    %312 = vector.load %arg2[%c2264, %c0_150] : memref<2680x48xf32, #tpu.memory_space<vmem>>, vector<32x1xf32>
    %cst_151 = arith.constant dense<0.000000e+00> : vector<96x32xf32>
    %313 = tpu.matmul %311, %310, %cst_151 {dimension_numbers = #tpu.dot_dimension_numbers<[1], [0], [0], [1], [0, 0, 1, 1], [], []>} : vector<96x16xf32>, vector<16x32xf32>, vector<96x32xf32> -> vector<96x32xf32>
    %314 = vector.extract_strided_slice %313 {offsets = [32, 0], sizes = [32, 32], strides = [1, 1]} : vector<96x32xf32> to vector<32x32xf32>
    %315 = vector.extract_strided_slice %313 {offsets = [0, 0], sizes = [32, 32], strides = [1, 1]} : vector<96x32xf32> to vector<32x32xf32>
    %cst_152 = arith.constant dense<0.000000e+00> : vector<32x32xf32>
    %316 = tpu.matmul %315, %0, %cst_152 {dimension_numbers = #tpu.dot_dimension_numbers<[1], [0], [0], [1], [0, 0, 1, 1], [], []>} : vector<32x32xf32>, vector<32x32xf32>, vector<32x32xf32> -> vector<32x32xf32>
    %317 = arith.addf %314, %316 : vector<32x32xf32>
    %318 = vector.extract_strided_slice %313 {offsets = [64, 0], sizes = [32, 32], strides = [1, 1]} : vector<96x32xf32> to vector<32x32xf32>
    %cst_153 = arith.constant dense<0.000000e+00> : vector<32x32xf32>
    %319 = tpu.matmul %318, %1, %cst_153 {dimension_numbers = #tpu.dot_dimension_numbers<[1], [0], [0], [1], [0, 0, 1, 1], [], []>} : vector<32x32xf32>, vector<32x32xf32>, vector<32x32xf32> -> vector<32x32xf32>
    %320 = arith.addf %317, %319 : vector<32x32xf32>
    %321 = vector.broadcast %312 : vector<32x1xf32> to vector<32x32xf32>
    %322 = arith.addf %320, %321 : vector<32x32xf32>
    %cst_154 = arith.constant 0.000000e+00 : f32
    %323 = vector.broadcast %cst_154 : f32 to vector<32x32xf32>
    %324 = arith.maximumf %322, %323 : vector<32x32xf32>
    %325 = arith.addf %324, %268 : vector<32x32xf32>
    %c1912 = arith.constant 1912 : index
    %c0_155 = arith.constant 0 : index
    %326 = vector.load %arg2[%c1912, %c0_155] : memref<2680x48xf32, #tpu.memory_space<vmem>>, vector<24x32xf32>
    %cst_156 = arith.constant dense<0.000000e+00> : vector<24x32xf32>
    %327 = tpu.matmul %326, %325, %cst_156 {dimension_numbers = #tpu.dot_dimension_numbers<[1], [0], [0], [1], [0, 0, 1, 1], [], []>} : vector<24x32xf32>, vector<32x32xf32>, vector<24x32xf32> -> vector<24x32xf32>
    %328 = vector.extract_strided_slice %327 {offsets = [0, 0], sizes = [4, 32], strides = [1, 1]} : vector<24x32xf32> to vector<4x32xf32>
    %329 = vector.extract_strided_slice %327 {offsets = [4, 0], sizes = [20, 32], strides = [1, 1]} : vector<24x32xf32> to vector<20x32xf32>
    %cst_157 = arith.constant dense<0.000000e+00> : vector<20x16xf32>
    %330 = tpu.matmul %329, %2, %cst_157 {dimension_numbers = #tpu.dot_dimension_numbers<[1], [0], [0], [1], [0, 0, 1, 1], [], []>} : vector<20x32xf32>, vector<32x16xf32>, vector<20x16xf32> -> vector<20x16xf32>
    %cst_158 = arith.constant dense<0.000000e+00> : vector<20x16xf32>
    %331 = tpu.matmul %329, %3, %cst_158 {dimension_numbers = #tpu.dot_dimension_numbers<[1], [0], [0], [1], [0, 0, 1, 1], [], []>} : vector<20x32xf32>, vector<32x16xf32>, vector<20x16xf32> -> vector<20x16xf32>
    %332 = arith.maximumf %330, %331 : vector<20x16xf32>
    %cst_159 = arith.constant dense<0.000000e+00> : vector<10x16xf32>
    %333 = tpu.matmul %4, %332, %cst_159 {dimension_numbers = #tpu.dot_dimension_numbers<[1], [0], [0], [1], [0, 0, 1, 1], [], []>} : vector<10x20xf32>, vector<20x16xf32>, vector<10x16xf32> -> vector<10x16xf32>
    %cst_160 = arith.constant dense<0.000000e+00> : vector<10x16xf32>
    %334 = tpu.matmul %5, %332, %cst_160 {dimension_numbers = #tpu.dot_dimension_numbers<[1], [0], [0], [1], [0, 0, 1, 1], [], []>} : vector<10x20xf32>, vector<20x16xf32>, vector<10x16xf32> -> vector<10x16xf32>
    %335 = arith.maximumf %333, %334 : vector<10x16xf32>
    %cst_161 = arith.constant dense<0.000000e+00> : vector<20x16xf32>
    %336 = tpu.matmul %6, %335, %cst_161 {dimension_numbers = #tpu.dot_dimension_numbers<[1], [0], [0], [1], [0, 0, 1, 1], [], []>} : vector<20x10xf32>, vector<10x16xf32>, vector<20x16xf32> -> vector<20x16xf32>
    %cst_162 = arith.constant dense<0.000000e+00> : vector<20x8xf32>
    %337 = tpu.matmul %336, %8, %cst_162 {dimension_numbers = #tpu.dot_dimension_numbers<[1], [0], [0], [1], [0, 0, 1, 1], [], []>} : vector<20x16xf32>, vector<16x8xf32>, vector<20x8xf32> -> vector<20x8xf32>
    %cst_163 = arith.constant dense<0.000000e+00> : vector<20x16xf32>
    %338 = tpu.matmul %7, %335, %cst_163 {dimension_numbers = #tpu.dot_dimension_numbers<[1], [0], [0], [1], [0, 0, 1, 1], [], []>} : vector<20x10xf32>, vector<10x16xf32>, vector<20x16xf32> -> vector<20x16xf32>
    %cst_164 = arith.constant dense<0.000000e+00> : vector<20x8xf32>
    %339 = tpu.matmul %338, %9, %cst_164 {dimension_numbers = #tpu.dot_dimension_numbers<[1], [0], [0], [1], [0, 0, 1, 1], [], []>} : vector<20x16xf32>, vector<16x8xf32>, vector<20x8xf32> -> vector<20x8xf32>
    %340 = arith.addf %337, %339 : vector<20x8xf32>
    %341 = vector.extract_strided_slice %340 {offsets = [0, 0], sizes = [4, 8], strides = [1, 1]} : vector<20x8xf32> to vector<4x8xf32>
    %342 = vector.extract_strided_slice %340 {offsets = [4, 0], sizes = [16, 8], strides = [1, 1]} : vector<20x8xf32> to vector<16x8xf32>
    %343 = tpu.transpose %341, [1, 0] : vector<4x8xf32> -> vector<8x4xf32>
    %cst_165 = arith.constant dense<0.000000e+00> : vector<8x32xf32>
    %344 = tpu.matmul %343, %328, %cst_165 {dimension_numbers = #tpu.dot_dimension_numbers<[1], [0], [0], [1], [0, 0, 1, 1], [], []>} : vector<8x4xf32>, vector<4x32xf32>, vector<8x32xf32> -> vector<8x32xf32>
    %345 = arith.addf %344, %10 : vector<8x32xf32>
    %cst_166 = arith.constant dense<0xFF800000> : vector<32xf32>
    %346 = vector.multi_reduction <maximumf>, %345, %cst_166 [0] : vector<8x32xf32> to vector<32xf32>
    %347 = vector.shape_cast %346 : vector<32xf32> to vector<1x32xf32>
    %348 = vector.broadcast %347 : vector<1x32xf32> to vector<8x32xf32>
    %349 = arith.subf %345, %348 : vector<8x32xf32>
    %350 = math.exp %349 : vector<8x32xf32>
    %cst_167 = arith.constant dense<0.000000e+00> : vector<32xf32>
    %351 = vector.multi_reduction <add>, %350, %cst_167 [0] : vector<8x32xf32> to vector<32xf32>
    %352 = vector.shape_cast %351 : vector<32xf32> to vector<1x32xf32>
    %353 = tpu.reciprocal %352 {approx = true} : vector<1x32xf32> -> vector<1x32xf32>
    %354 = vector.broadcast %353 : vector<1x32xf32> to vector<8x32xf32>
    %355 = arith.mulf %350, %354 : vector<8x32xf32>
    %c1936 = arith.constant 1936 : index
    %c0_168 = arith.constant 0 : index
    %356 = vector.load %arg2[%c1936, %c0_168] : memref<2680x48xf32, #tpu.memory_space<vmem>>, vector<32x16xf32>
    %cst_169 = arith.constant dense<0.000000e+00> : vector<16x32xf32>
    %357 = tpu.matmul %342, %355, %cst_169 {dimension_numbers = #tpu.dot_dimension_numbers<[1], [0], [0], [1], [0, 0, 1, 1], [], []>} : vector<16x8xf32>, vector<8x32xf32>, vector<16x32xf32> -> vector<16x32xf32>
    %cst_170 = arith.constant dense<0.000000e+00> : vector<32x32xf32>
    %358 = tpu.matmul %356, %357, %cst_170 {dimension_numbers = #tpu.dot_dimension_numbers<[1], [0], [0], [1], [0, 0, 1, 1], [], []>} : vector<32x16xf32>, vector<16x32xf32>, vector<32x32xf32> -> vector<32x32xf32>
    %c1968 = arith.constant 1968 : index
    %c0_171 = arith.constant 0 : index
    %359 = vector.load %arg2[%c1968, %c0_171] : memref<2680x48xf32, #tpu.memory_space<vmem>>, vector<1x1xf32>
    %360 = vector.broadcast %359 : vector<1x1xf32> to vector<32x32xf32>
    %361 = arith.mulf %360, %358 : vector<32x32xf32>
    %362 = arith.addf %325, %361 : vector<32x32xf32>
    %363 = arith.addf %325, %362 : vector<32x32xf32>
    %c2360 = arith.constant 2360 : index
    %c0_172 = arith.constant 0 : index
    %364 = vector.load %arg2[%c2360, %c0_172] : memref<2680x48xf32, #tpu.memory_space<vmem>>, vector<48x32xf32>
    %c2408 = arith.constant 2408 : index
    %c0_173 = arith.constant 0 : index
    %365 = vector.load %arg2[%c2408, %c0_173] : memref<2680x48xf32, #tpu.memory_space<vmem>>, vector<16x1xf32>
    %cst_174 = arith.constant dense<0.000000e+00> : vector<48x32xf32>
    %366 = tpu.matmul %364, %363, %cst_174 {dimension_numbers = #tpu.dot_dimension_numbers<[1], [0], [0], [1], [0, 0, 1, 1], [], []>} : vector<48x32xf32>, vector<32x32xf32>, vector<48x32xf32> -> vector<48x32xf32>
    %367 = vector.extract_strided_slice %366 {offsets = [16, 0], sizes = [16, 32], strides = [1, 1]} : vector<48x32xf32> to vector<16x32xf32>
    %368 = vector.extract_strided_slice %366 {offsets = [0, 0], sizes = [16, 32], strides = [1, 1]} : vector<48x32xf32> to vector<16x32xf32>
    %cst_175 = arith.constant dense<0.000000e+00> : vector<16x32xf32>
    %369 = tpu.matmul %368, %0, %cst_175 {dimension_numbers = #tpu.dot_dimension_numbers<[1], [0], [0], [1], [0, 0, 1, 1], [], []>} : vector<16x32xf32>, vector<32x32xf32>, vector<16x32xf32> -> vector<16x32xf32>
    %370 = arith.addf %367, %369 : vector<16x32xf32>
    %371 = vector.extract_strided_slice %366 {offsets = [32, 0], sizes = [16, 32], strides = [1, 1]} : vector<48x32xf32> to vector<16x32xf32>
    %cst_176 = arith.constant dense<0.000000e+00> : vector<16x32xf32>
    %372 = tpu.matmul %371, %1, %cst_176 {dimension_numbers = #tpu.dot_dimension_numbers<[1], [0], [0], [1], [0, 0, 1, 1], [], []>} : vector<16x32xf32>, vector<32x32xf32>, vector<16x32xf32> -> vector<16x32xf32>
    %373 = arith.addf %370, %372 : vector<16x32xf32>
    %374 = vector.broadcast %365 : vector<16x1xf32> to vector<16x32xf32>
    %375 = arith.addf %373, %374 : vector<16x32xf32>
    %cst_177 = arith.constant 0.000000e+00 : f32
    %376 = vector.broadcast %cst_177 : f32 to vector<16x32xf32>
    %377 = arith.maximumf %375, %376 : vector<16x32xf32>
    %c2424 = arith.constant 2424 : index
    %c0_178 = arith.constant 0 : index
    %378 = vector.load %arg2[%c2424, %c0_178] : memref<2680x48xf32, #tpu.memory_space<vmem>>, vector<48x16xf32>
    %c2472 = arith.constant 2472 : index
    %c0_179 = arith.constant 0 : index
    %379 = vector.load %arg2[%c2472, %c0_179] : memref<2680x48xf32, #tpu.memory_space<vmem>>, vector<16x1xf32>
    %cst_180 = arith.constant dense<0.000000e+00> : vector<48x32xf32>
    %380 = tpu.matmul %378, %377, %cst_180 {dimension_numbers = #tpu.dot_dimension_numbers<[1], [0], [0], [1], [0, 0, 1, 1], [], []>} : vector<48x16xf32>, vector<16x32xf32>, vector<48x32xf32> -> vector<48x32xf32>
    %381 = vector.extract_strided_slice %380 {offsets = [16, 0], sizes = [16, 32], strides = [1, 1]} : vector<48x32xf32> to vector<16x32xf32>
    %382 = vector.extract_strided_slice %380 {offsets = [0, 0], sizes = [16, 32], strides = [1, 1]} : vector<48x32xf32> to vector<16x32xf32>
    %cst_181 = arith.constant dense<0.000000e+00> : vector<16x32xf32>
    %383 = tpu.matmul %382, %0, %cst_181 {dimension_numbers = #tpu.dot_dimension_numbers<[1], [0], [0], [1], [0, 0, 1, 1], [], []>} : vector<16x32xf32>, vector<32x32xf32>, vector<16x32xf32> -> vector<16x32xf32>
    %384 = arith.addf %381, %383 : vector<16x32xf32>
    %385 = vector.extract_strided_slice %380 {offsets = [32, 0], sizes = [16, 32], strides = [1, 1]} : vector<48x32xf32> to vector<16x32xf32>
    %cst_182 = arith.constant dense<0.000000e+00> : vector<16x32xf32>
    %386 = tpu.matmul %385, %1, %cst_182 {dimension_numbers = #tpu.dot_dimension_numbers<[1], [0], [0], [1], [0, 0, 1, 1], [], []>} : vector<16x32xf32>, vector<32x32xf32>, vector<16x32xf32> -> vector<16x32xf32>
    %387 = arith.addf %384, %386 : vector<16x32xf32>
    %388 = vector.broadcast %379 : vector<16x1xf32> to vector<16x32xf32>
    %389 = arith.addf %387, %388 : vector<16x32xf32>
    %cst_183 = arith.constant 0.000000e+00 : f32
    %390 = vector.broadcast %cst_183 : f32 to vector<16x32xf32>
    %391 = arith.maximumf %389, %390 : vector<16x32xf32>
    %c2488 = arith.constant 2488 : index
    %c0_184 = arith.constant 0 : index
    %392 = vector.load %arg2[%c2488, %c0_184] : memref<2680x48xf32, #tpu.memory_space<vmem>>, vector<48x16xf32>
    %c2536 = arith.constant 2536 : index
    %c0_185 = arith.constant 0 : index
    %393 = vector.load %arg2[%c2536, %c0_185] : memref<2680x48xf32, #tpu.memory_space<vmem>>, vector<16x1xf32>
    %cst_186 = arith.constant dense<0.000000e+00> : vector<48x32xf32>
    %394 = tpu.matmul %392, %391, %cst_186 {dimension_numbers = #tpu.dot_dimension_numbers<[1], [0], [0], [1], [0, 0, 1, 1], [], []>} : vector<48x16xf32>, vector<16x32xf32>, vector<48x32xf32> -> vector<48x32xf32>
    %395 = vector.extract_strided_slice %394 {offsets = [16, 0], sizes = [16, 32], strides = [1, 1]} : vector<48x32xf32> to vector<16x32xf32>
    %396 = vector.extract_strided_slice %394 {offsets = [0, 0], sizes = [16, 32], strides = [1, 1]} : vector<48x32xf32> to vector<16x32xf32>
    %cst_187 = arith.constant dense<0.000000e+00> : vector<16x32xf32>
    %397 = tpu.matmul %396, %0, %cst_187 {dimension_numbers = #tpu.dot_dimension_numbers<[1], [0], [0], [1], [0, 0, 1, 1], [], []>} : vector<16x32xf32>, vector<32x32xf32>, vector<16x32xf32> -> vector<16x32xf32>
    %398 = arith.addf %395, %397 : vector<16x32xf32>
    %399 = vector.extract_strided_slice %394 {offsets = [32, 0], sizes = [16, 32], strides = [1, 1]} : vector<48x32xf32> to vector<16x32xf32>
    %cst_188 = arith.constant dense<0.000000e+00> : vector<16x32xf32>
    %400 = tpu.matmul %399, %1, %cst_188 {dimension_numbers = #tpu.dot_dimension_numbers<[1], [0], [0], [1], [0, 0, 1, 1], [], []>} : vector<16x32xf32>, vector<32x32xf32>, vector<16x32xf32> -> vector<16x32xf32>
    %401 = arith.addf %398, %400 : vector<16x32xf32>
    %402 = vector.broadcast %393 : vector<16x1xf32> to vector<16x32xf32>
    %403 = arith.addf %401, %402 : vector<16x32xf32>
    %cst_189 = arith.constant 0.000000e+00 : f32
    %404 = vector.broadcast %cst_189 : f32 to vector<16x32xf32>
    %405 = arith.maximumf %403, %404 : vector<16x32xf32>
    %c2552 = arith.constant 2552 : index
    %c0_190 = arith.constant 0 : index
    %406 = vector.load %arg2[%c2552, %c0_190] : memref<2680x48xf32, #tpu.memory_space<vmem>>, vector<96x16xf32>
    %c2648 = arith.constant 2648 : index
    %c0_191 = arith.constant 0 : index
    %407 = vector.load %arg2[%c2648, %c0_191] : memref<2680x48xf32, #tpu.memory_space<vmem>>, vector<32x1xf32>
    %cst_192 = arith.constant dense<0.000000e+00> : vector<96x32xf32>
    %408 = tpu.matmul %406, %405, %cst_192 {dimension_numbers = #tpu.dot_dimension_numbers<[1], [0], [0], [1], [0, 0, 1, 1], [], []>} : vector<96x16xf32>, vector<16x32xf32>, vector<96x32xf32> -> vector<96x32xf32>
    %409 = vector.extract_strided_slice %408 {offsets = [32, 0], sizes = [32, 32], strides = [1, 1]} : vector<96x32xf32> to vector<32x32xf32>
    %410 = vector.extract_strided_slice %408 {offsets = [0, 0], sizes = [32, 32], strides = [1, 1]} : vector<96x32xf32> to vector<32x32xf32>
    %cst_193 = arith.constant dense<0.000000e+00> : vector<32x32xf32>
    %411 = tpu.matmul %410, %0, %cst_193 {dimension_numbers = #tpu.dot_dimension_numbers<[1], [0], [0], [1], [0, 0, 1, 1], [], []>} : vector<32x32xf32>, vector<32x32xf32>, vector<32x32xf32> -> vector<32x32xf32>
    %412 = arith.addf %409, %411 : vector<32x32xf32>
    %413 = vector.extract_strided_slice %408 {offsets = [64, 0], sizes = [32, 32], strides = [1, 1]} : vector<96x32xf32> to vector<32x32xf32>
    %cst_194 = arith.constant dense<0.000000e+00> : vector<32x32xf32>
    %414 = tpu.matmul %413, %1, %cst_194 {dimension_numbers = #tpu.dot_dimension_numbers<[1], [0], [0], [1], [0, 0, 1, 1], [], []>} : vector<32x32xf32>, vector<32x32xf32>, vector<32x32xf32> -> vector<32x32xf32>
    %415 = arith.addf %412, %414 : vector<32x32xf32>
    %416 = vector.broadcast %407 : vector<32x1xf32> to vector<32x32xf32>
    %417 = arith.addf %415, %416 : vector<32x32xf32>
    %cst_195 = arith.constant 0.000000e+00 : f32
    %418 = vector.broadcast %cst_195 : f32 to vector<32x32xf32>
    %419 = arith.maximumf %417, %418 : vector<32x32xf32>
    %420 = arith.addf %419, %363 : vector<32x32xf32>
    %c2296 = arith.constant 2296 : index
    %c0_196 = arith.constant 0 : index
    %421 = vector.load %arg2[%c2296, %c0_196] : memref<2680x48xf32, #tpu.memory_space<vmem>>, vector<24x32xf32>
    %cst_197 = arith.constant dense<0.000000e+00> : vector<24x32xf32>
    %422 = tpu.matmul %421, %420, %cst_197 {dimension_numbers = #tpu.dot_dimension_numbers<[1], [0], [0], [1], [0, 0, 1, 1], [], []>} : vector<24x32xf32>, vector<32x32xf32>, vector<24x32xf32> -> vector<24x32xf32>
    %423 = vector.extract_strided_slice %422 {offsets = [0, 0], sizes = [4, 32], strides = [1, 1]} : vector<24x32xf32> to vector<4x32xf32>
    %424 = vector.extract_strided_slice %422 {offsets = [4, 0], sizes = [20, 32], strides = [1, 1]} : vector<24x32xf32> to vector<20x32xf32>
    %cst_198 = arith.constant dense<0.000000e+00> : vector<20x16xf32>
    %425 = tpu.matmul %424, %2, %cst_198 {dimension_numbers = #tpu.dot_dimension_numbers<[1], [0], [0], [1], [0, 0, 1, 1], [], []>} : vector<20x32xf32>, vector<32x16xf32>, vector<20x16xf32> -> vector<20x16xf32>
    %cst_199 = arith.constant dense<0.000000e+00> : vector<20x16xf32>
    %426 = tpu.matmul %424, %3, %cst_199 {dimension_numbers = #tpu.dot_dimension_numbers<[1], [0], [0], [1], [0, 0, 1, 1], [], []>} : vector<20x32xf32>, vector<32x16xf32>, vector<20x16xf32> -> vector<20x16xf32>
    %427 = arith.maximumf %425, %426 : vector<20x16xf32>
    %cst_200 = arith.constant dense<0.000000e+00> : vector<10x16xf32>
    %428 = tpu.matmul %4, %427, %cst_200 {dimension_numbers = #tpu.dot_dimension_numbers<[1], [0], [0], [1], [0, 0, 1, 1], [], []>} : vector<10x20xf32>, vector<20x16xf32>, vector<10x16xf32> -> vector<10x16xf32>
    %cst_201 = arith.constant dense<0.000000e+00> : vector<10x16xf32>
    %429 = tpu.matmul %5, %427, %cst_201 {dimension_numbers = #tpu.dot_dimension_numbers<[1], [0], [0], [1], [0, 0, 1, 1], [], []>} : vector<10x20xf32>, vector<20x16xf32>, vector<10x16xf32> -> vector<10x16xf32>
    %430 = arith.maximumf %428, %429 : vector<10x16xf32>
    %cst_202 = arith.constant dense<0.000000e+00> : vector<20x16xf32>
    %431 = tpu.matmul %6, %430, %cst_202 {dimension_numbers = #tpu.dot_dimension_numbers<[1], [0], [0], [1], [0, 0, 1, 1], [], []>} : vector<20x10xf32>, vector<10x16xf32>, vector<20x16xf32> -> vector<20x16xf32>
    %cst_203 = arith.constant dense<0.000000e+00> : vector<20x8xf32>
    %432 = tpu.matmul %431, %8, %cst_203 {dimension_numbers = #tpu.dot_dimension_numbers<[1], [0], [0], [1], [0, 0, 1, 1], [], []>} : vector<20x16xf32>, vector<16x8xf32>, vector<20x8xf32> -> vector<20x8xf32>
    %cst_204 = arith.constant dense<0.000000e+00> : vector<20x16xf32>
    %433 = tpu.matmul %7, %430, %cst_204 {dimension_numbers = #tpu.dot_dimension_numbers<[1], [0], [0], [1], [0, 0, 1, 1], [], []>} : vector<20x10xf32>, vector<10x16xf32>, vector<20x16xf32> -> vector<20x16xf32>
    %cst_205 = arith.constant dense<0.000000e+00> : vector<20x8xf32>
    %434 = tpu.matmul %433, %9, %cst_205 {dimension_numbers = #tpu.dot_dimension_numbers<[1], [0], [0], [1], [0, 0, 1, 1], [], []>} : vector<20x16xf32>, vector<16x8xf32>, vector<20x8xf32> -> vector<20x8xf32>
    %435 = arith.addf %432, %434 : vector<20x8xf32>
    %436 = vector.extract_strided_slice %435 {offsets = [0, 0], sizes = [4, 8], strides = [1, 1]} : vector<20x8xf32> to vector<4x8xf32>
    %437 = vector.extract_strided_slice %435 {offsets = [4, 0], sizes = [16, 8], strides = [1, 1]} : vector<20x8xf32> to vector<16x8xf32>
    %438 = tpu.transpose %436, [1, 0] : vector<4x8xf32> -> vector<8x4xf32>
    %cst_206 = arith.constant dense<0.000000e+00> : vector<8x32xf32>
    %439 = tpu.matmul %438, %423, %cst_206 {dimension_numbers = #tpu.dot_dimension_numbers<[1], [0], [0], [1], [0, 0, 1, 1], [], []>} : vector<8x4xf32>, vector<4x32xf32>, vector<8x32xf32> -> vector<8x32xf32>
    %440 = arith.addf %439, %10 : vector<8x32xf32>
    %cst_207 = arith.constant dense<0xFF800000> : vector<32xf32>
    %441 = vector.multi_reduction <maximumf>, %440, %cst_207 [0] : vector<8x32xf32> to vector<32xf32>
    %442 = vector.shape_cast %441 : vector<32xf32> to vector<1x32xf32>
    %443 = vector.broadcast %442 : vector<1x32xf32> to vector<8x32xf32>
    %444 = arith.subf %440, %443 : vector<8x32xf32>
    %445 = math.exp %444 : vector<8x32xf32>
    %cst_208 = arith.constant dense<0.000000e+00> : vector<32xf32>
    %446 = vector.multi_reduction <add>, %445, %cst_208 [0] : vector<8x32xf32> to vector<32xf32>
    %447 = vector.shape_cast %446 : vector<32xf32> to vector<1x32xf32>
    %448 = tpu.reciprocal %447 {approx = true} : vector<1x32xf32> -> vector<1x32xf32>
    %449 = vector.broadcast %448 : vector<1x32xf32> to vector<8x32xf32>
    %450 = arith.mulf %445, %449 : vector<8x32xf32>
    %c2320 = arith.constant 2320 : index
    %c0_209 = arith.constant 0 : index
    %451 = vector.load %arg2[%c2320, %c0_209] : memref<2680x48xf32, #tpu.memory_space<vmem>>, vector<32x16xf32>
    %cst_210 = arith.constant dense<0.000000e+00> : vector<16x32xf32>
    %452 = tpu.matmul %437, %450, %cst_210 {dimension_numbers = #tpu.dot_dimension_numbers<[1], [0], [0], [1], [0, 0, 1, 1], [], []>} : vector<16x8xf32>, vector<8x32xf32>, vector<16x32xf32> -> vector<16x32xf32>
    %cst_211 = arith.constant dense<0.000000e+00> : vector<32x32xf32>
    %453 = tpu.matmul %451, %452, %cst_211 {dimension_numbers = #tpu.dot_dimension_numbers<[1], [0], [0], [1], [0, 0, 1, 1], [], []>} : vector<32x16xf32>, vector<16x32xf32>, vector<32x32xf32> -> vector<32x32xf32>
    %c2352 = arith.constant 2352 : index
    %c0_212 = arith.constant 0 : index
    %454 = vector.load %arg2[%c2352, %c0_212] : memref<2680x48xf32, #tpu.memory_space<vmem>>, vector<1x1xf32>
    %455 = vector.broadcast %454 : vector<1x1xf32> to vector<32x32xf32>
    %456 = arith.mulf %455, %453 : vector<32x32xf32>
    %457 = arith.addf %420, %456 : vector<32x32xf32>
    %458 = arith.addf %420, %457 : vector<32x32xf32>
    %c880 = arith.constant 880 : index
    %c0_213 = arith.constant 0 : index
    %459 = vector.load %arg2[%c880, %c0_213] : memref<2680x48xf32, #tpu.memory_space<vmem>>, vector<120x32xf32>
    %cst_214 = arith.constant dense<0.000000e+00> : vector<120x32xf32>
    %460 = tpu.matmul %459, %458, %cst_214 {dimension_numbers = #tpu.dot_dimension_numbers<[1], [0], [0], [1], [0, 0, 1, 1], [], []>} : vector<120x32xf32>, vector<32x32xf32>, vector<120x32xf32> -> vector<120x32xf32>
    %461 = vector.extract_strided_slice %460 {offsets = [40, 0], sizes = [40, 32], strides = [1, 1]} : vector<120x32xf32> to vector<40x32xf32>
    %462 = vector.extract_strided_slice %460 {offsets = [0, 0], sizes = [40, 32], strides = [1, 1]} : vector<120x32xf32> to vector<40x32xf32>
    %cst_215 = arith.constant dense<0.000000e+00> : vector<40x32xf32>
    %463 = tpu.matmul %462, %0, %cst_215 {dimension_numbers = #tpu.dot_dimension_numbers<[1], [0], [0], [1], [0, 0, 1, 1], [], []>} : vector<40x32xf32>, vector<32x32xf32>, vector<40x32xf32> -> vector<40x32xf32>
    %464 = arith.addf %461, %463 : vector<40x32xf32>
    %465 = vector.extract_strided_slice %460 {offsets = [80, 0], sizes = [40, 32], strides = [1, 1]} : vector<120x32xf32> to vector<40x32xf32>
    %cst_216 = arith.constant dense<0.000000e+00> : vector<40x32xf32>
    %466 = tpu.matmul %465, %1, %cst_216 {dimension_numbers = #tpu.dot_dimension_numbers<[1], [0], [0], [1], [0, 0, 1, 1], [], []>} : vector<40x32xf32>, vector<32x32xf32>, vector<40x32xf32> -> vector<40x32xf32>
    %467 = arith.addf %464, %466 : vector<40x32xf32>
    %cst_217 = arith.constant dense<0xFF800000> : vector<32xf32>
    %468 = vector.multi_reduction <maximumf>, %467, %cst_217 [0] : vector<40x32xf32> to vector<32xf32>
    %469 = vector.shape_cast %468 : vector<32xf32> to vector<1x32xf32>
    %470 = vector.broadcast %469 : vector<1x32xf32> to vector<40x32xf32>
    %471 = arith.subf %467, %470 : vector<40x32xf32>
    %472 = math.exp %471 : vector<40x32xf32>
    %cst_218 = arith.constant dense<0.000000e+00> : vector<32xf32>
    %473 = vector.multi_reduction <add>, %472, %cst_218 [0] : vector<40x32xf32> to vector<32xf32>
    %474 = vector.shape_cast %473 : vector<32xf32> to vector<1x32xf32>
    %475 = vector.broadcast %474 : vector<1x32xf32> to vector<40x32xf32>
    %476 = arith.divf %472, %475 : vector<40x32xf32>
    %c0_219 = arith.constant 0 : index
    %c0_220 = arith.constant 0 : index
    %477 = vector.load %arg4[%c0_219, %c0_220] : memref<40x32xf32, #tpu.memory_space<vmem>>, vector<40x32xf32>
    tpu.vector_store %arg4[%c0_219, %c0_220], %476 {strides = array<i32>} : memref<40x32xf32, #tpu.memory_space<vmem>>, vector<40x32xf32>,
    %478 = tpu.concatenate %234, %242 in 0 : vector<2x16xf32>, vector<2x16xf32> -> vector<4x16xf32>
    %c0_221 = arith.constant 0 : index
    %c0_222 = arith.constant 0 : index
    %479 = vector.load %arg5[%c0_221, %c0_222] : memref<4x16xf32, #tpu.memory_space<vmem>>, vector<4x16xf32>
    tpu.vector_store %arg5[%c0_221, %c0_222], %478 {strides = array<i32>} : memref<4x16xf32, #tpu.memory_space<vmem>>, vector<4x16xf32>,
    return
  }
}

</mosaic_0001>

<bundles_post_ra>
// kernel: forward.1
= control target key start
LH: loop header
LB: loop body
LE: loop exit
PB: predicated region body
PF: predicated region fallthrough
CT: control target
= control target key end

     0   :  { %v124_v0 = vlaneseq  ;;  %v6698_v7 = vmov 1.0   ;;  %vm151_vm5 = vcmask 326656   ;;  %vm193_vm6 = vcmask 130048   ;;  %s9285_s0 = inlined_call_operand.vmem [shape: s32[1,32], index: 0, kind: input, shape index: {}]   ;;  %s9286_s2 = inlined_call_operand.vmem [shape: f32[2680,48], index: 2, kind: input, shape index: {}]   ;;  %s9287_s3 = inlined_call_operand.vmem [shape: f32[128,256], index: 3, kind: input, shape index: {}]   ;;  %s9288_s5 = inlined_call_operand.vmem [shape: f32[4,16], index: 5, kind: output, shape index: {1}]   ;;  %s9289_s1 = inlined_call_operand.vmem [shape: f32[2,16], index: 1, kind: input, shape index: {}]   ;;  %s9290_s4 = inlined_call_operand.vmem [shape: f32[40,32], index: 4, kind: output, shape index: {0}]  }
   0x1   :  { %v6614_v1 = vld [vmem:[%s9285_s0] ss:$0 sm:$0xff]  ;;  %v150_v9 = vld [vmem:[%s9286_s2 + $0x308] sm:$0xff]  ;;  %v181_v12 = vld [vmem:[%s9286_s2 + $0x310] sm:$0xff]  ;;  %vm283_vm7 = vcmask 261120   ;;  %vm415_vm8 = vcmask 1043456  }
   0x2   :  { %v125_v2 = vshrl.u32 %v124_v0, 7  ;;  %v149_v8 = vld [vmem:[%s9286_s2 + $0x300] sm:$0xff]  ;;  %v182_v13 = vld [vmem:[%s9286_s2 + $0x318] sm:$0xff]  ;;  %v184_v15 = vld [vmem:[%s9286_s2 + $0x328] sm:$0xff]  ;;  %vm482_vm9 = vcmask 162816   ;;  %vm556_vm10 = vcmask 1041408  }
   0x3   :  { %v183_v14 = vld [vmem:[%s9286_s2 + $0x320] sm:$0xff]  ;;  %v185_v16 = vld [vmem:[%s9286_s2 + $0x330] sm:$0xff]  ;;  %v186_v17 = vld [vmem:[%s9286_s2 + $0x338] sm:$0xff]  ;;  %vm546_vm11 = vcmask 80896   ;;  %vm723_vm12 = vcmask 31744   ;;  %vm780_vm13 = vcmask 64512  }
   0x4   :  { %v129_v3 = vadd.s32 32, %v125_v2  ;;  %v128_v4 = vadd.s32 24, %v125_v2  ;;  %v127_v5 = vadd.s32 16, %v125_v2  ;;  %v126_v6 = vadd.s32 8, %v125_v2  ;;  %v187_v18 = vld [vmem:[%s9286_s2 + $0x340] sm:$0xff]  ;;  %v192_v19 = vld [vmem:[%s9286_s2 + $0x368] sm:$0xff] }
   0x5   :  { %vm131_vm4 = vcmp.eq.s32.totalorder %v125_v2, %v6614_v1  ;;  %v6774_v20 = vld [vmem:[%s9286_s2 + $0x18] sm:$0xff]  ;;  %v6779_v21 = vld [vmem:[%s9286_s2 + $0x10] sm:$0xff]  ;;  %v6786_v22 = vld [vmem:[%s9286_s2 + $0x8] sm:$0xff]  ;;  %vm6084_vm14 = vcmask 125952   ;;  %vm3175_vm15 = vcmask 15360  }
   0x6   :  { %vm135_vm0 = vcmp.eq.s32.totalorder %v129_v3, %v6614_v1  ;;  %vm134_vm1 = vcmp.eq.s32.totalorder %v128_v4, %v6614_v1  ;;  %vm133_vm2 = vcmp.eq.s32.totalorder %v127_v5, %v6614_v1  ;;  %vm132_vm3 = vcmp.eq.s32.totalorder %v126_v6, %v6614_v1  ;;  %308 = vmatpush.msra.mxu2 %v6774_v20  ;;  %v188_v23 = vld [vmem:[%s9286_s2 + $0x348] sm:$0xff]  ;;  %v189_v24 = vld [vmem:[%s9286_s2 + $0x350] sm:$0xff]  ;;  %v190_v25 = vld [vmem:[%s9286_s2 + $0x358] sm:$0xff] }
   0x7   :  { %6100 = vmatpush.msk.msra.mxu0 %vm135_vm0, %v6698_v7  ;;  %v191_v26 = vld [vmem:[%s9286_s2 + $0x360] sm:$0xff]  ;;  %v6818_v32 = vld [vmem:[%s9286_s2 + $0x38] sm:$0xff]  ;;  %v6823_v33 = vld [vmem:[%s9286_s2 + $0x30] sm:$0xff] }
   0x8   :  { %309 = vmatpush.msra.mxu2 %v6779_v21  ;;  %v6809_v27 = vld [vmem:[%s9286_s2] sm:$0xff]  ;;  %v6830_v34 = vld [vmem:[%s9286_s2 + $0x28] sm:$0xff]  ;;  %v374_v62 = vld [vmem:[%s9286_s2 + $0x478] sm:$0xff] }
   0x9   :  { %6101 = vmatpush.msk.msra.mxu0 %vm134_vm1, %v6698_v7  ;;  %v6837_v35 = vld [vmem:[%s9286_s2 + $0x20] sm:$0xff]  ;;  %v376_v61 = vld [vmem:[%s9286_s2 + $0x488] sm:$0xff]  ;;  %v6875_v63 = vld [vmem:[%s9286_s2 + $0x58] sm:$0xff] }
   0xa   :  { %310 = vmatpush.msra.mxu2 %v6786_v22  ;;  %v375_v60 = vld [vmem:[%s9286_s2 + $0x480] sm:$0xff]  ;;  %v6880_v0 = vld [vmem:[%s9286_s2 + $0x78] sm:$0xff]  ;;  %v6889_v1 = vld [vmem:[%s9286_s2 + $0x50] sm:$0xff] }
   0xb   :  { %6102 = vmatpush.msk.msra.mxu0 %vm133_vm2, %v6698_v7  ;;  %v6894_v2 = vld [vmem:[%s9286_s2 + $0x70] sm:$0xff]  ;;  %v6903_v3 = vld [vmem:[%s9286_s2 + $0x48] sm:$0xff]  ;;  %v6915_v5 = vld [vmem:[%s9286_s2 + $0x40] sm:$0xff] }
   0xc   :  { %311 = vmatpush.msra.mxu2 %v6809_v27  ;;  %v6908_v4 = vld [vmem:[%s9286_s2 + $0x68] sm:$0xff]  ;;  %v6920_v6 = vld [vmem:[%s9286_s2 + $0x60] sm:$0xff] }
   0xd   :  { %6103 = vmatpush.msk.msra.mxu0 %vm132_vm3, %v6698_v7 }
   0xf   :  { %6104 = vmatpush.msk.msra.mxu0 %vm131_vm4, %v6698_v7 }
  0x10   :  { %6105 = vmatmul.msk.f32.vlgmr.msra.gmra.mxu0 %vm151_vm5, %v149_v8 }
  0x18   :  { %6106 = vmatmul.msk.f32.gmra.mxu0 %vm151_vm5, %v150_v9 }
  0x8d   :  { %v175_v10 = vpop.f32.mrf.mxu0 }
  0x95   :  { %v178_v11 = vpop.f32.mrf.mxu0 }
  0x96   :  { %244 = vmatpush.msra.mxu1 %v178_v11  ;;  %6590 = vmatpush.msra.mxu3 %v178_v11 }
  0x98   :  { %245 = vmatpush.msra.mxu1 %v175_v10  ;;  %6591 = vmatpush.msra.mxu3 %v175_v10 }
  0x99   :  { %6107 = vmatmul.msk.f32.vlgmr.msra.gmra.mxu1 %vm193_vm6, %v181_v12  ;;  %6118 = vmatmul.msk.f32.vlgmr.msra.gmra.mxu3 %vm193_vm6, %v192_v19 }
  0x9a   :  { %353 = vmatpush.msrb.mxu3 %v6818_v32 }
  0x9c   :  { %354 = vmatpush.msrb.mxu3 %v6823_v33 }
  0x9e   :  { %355 = vmatpush.msrb.mxu3 %v6830_v34 }
  0xa0   :  { %356 = vmatpush.msrb.mxu3 %v6837_v35 }
  0xa1   :  { %6108 = vmatmul.msk.f32.gmra.mxu1 %vm193_vm6, %v182_v13 }
  0xa9   :  { %6109 = vmatmul.msk.f32.gmra.mxu1 %vm193_vm6, %v183_v14 }
  0xb1   :  { %6110 = vmatmul.msk.f32.gmra.mxu1 %vm193_vm6, %v184_v15 }
  0xb9   :  { %6111 = vmatmul.msk.f32.gmra.mxu1 %vm193_vm6, %v185_v16 }
  0xc1   :  { %6112 = vmatmul.msk.f32.gmra.mxu1 %vm193_vm6, %v186_v17 }
  0xc9   :  { %6113 = vmatmul.msk.f32.gmra.mxu1 %vm193_vm6, %v187_v18 }
  0xd1   :  { %6114 = vmatmul.msk.f32.gmra.mxu1 %vm193_vm6, %v188_v23 }
  0xd9   :  { %6115 = vmatmul.msk.f32.gmra.mxu1 %vm193_vm6, %v189_v24 }
  0xe1   :  { %6116 = vmatmul.msk.f32.gmra.mxu1 %vm193_vm6, %v190_v25 }
  0xe9   :  { %6117 = vmatmul.msk.f32.gmra.mxu1 %vm193_vm6, %v191_v26 }
 0x116   :  { %v247_v28 = vpop.f32.mrf.mxu1 }
 0x117   :  { %6119 = vmatmul.msk.f32.vlgmr.msra.gmra.mxu2 %vm283_vm7, %v247_v28  ;;  %v6937_v28 = vld [vmem:[%s9286_s2 + $0x90] sm:$0xff] }
 0x11c   :  { %v280_v43 = vpop.f32.mrf.mxu3 }
 0x11e   :  { %v250_v29 = vpop.f32.mrf.mxu1 }
 0x11f   :  { %6120 = vmatmul.msk.f32.gmra.mxu2 %vm283_vm7, %v250_v29  ;;  %v6942_v29 = vld [vmem:[%s9286_s2 + $0x80] sm:$0xff] }
 0x126   :  { %v253_v30 = vpop.f32.mrf.mxu1 }
 0x127   :  { %6121 = vmatmul.msk.f32.gmra.mxu2 %vm283_vm7, %v253_v30  ;;  %v6951_v30 = vld [vmem:[%s9286_s2 + $0x98] sm:$0x3] }
 0x12e   :  { %v256_v31 = vpop.f32.mrf.mxu1 }
 0x12f   :  { %6122 = vmatmul.msk.f32.gmra.mxu2 %vm283_vm7, %v256_v31  ;;  %v6956_v31 = vld [vmem:[%s9286_s2 + $0x88] sm:$0x3] }
 0x136   :  { %v259_v36 = vpop.f32.mrf.mxu1 }
 0x13e   :  { %v262_v37 = vpop.f32.mrf.mxu1 }
 0x146   :  { %v265_v38 = vpop.f32.mrf.mxu1 }
 0x14e   :  { %v268_v39 = vpop.f32.mrf.mxu1 }
 0x156   :  { %v271_v40 = vpop.f32.mrf.mxu1 }
 0x157   :  { %6123 = vmatmul.msk.f32.vlgmr.msrb.gmra.mxu3 %vm283_vm7, %v271_v40 }
 0x15e   :  { %v274_v41 = vpop.f32.mrf.mxu1 }
 0x15f   :  { %6124 = vmatmul.msk.f32.gmra.mxu3 %vm283_vm7, %v274_v41 }
 0x166   :  { %v277_v42 = vpop.f32.mrf.mxu1 }
 0x167   :  { %6125 = vmatmul.msk.f32.gmra.mxu3 %vm283_vm7, %v277_v42 }
 0x16f   :  { %6126 = vmatmul.msk.f32.gmra.mxu3 %vm283_vm7, %v280_v43  ;;  %v6973_v43 = vld [vmem:[%s9286_s2 + $0xa0] sm:$0xff] }
 0x19a   :  { %v313_v44 = vpop.f32.mrf.mxu2 }
 0x19b   :  { %v325_v57 = vadd.f32 %v313_v44, %v259_v36  ;;  %v6978_v44 = vld [vmem:[%s9286_s2 + $0xb8] sm:$0xff] }
 0x1a2   :  { %v316_v45 = vpop.f32.mrf.mxu2 }
 0x1a3   :  { %v326_v55 = vadd.f32 %v316_v45, %v262_v37  ;;  %v6965_v37 = vld [vmem:[%s9286_s2 + $0xe8] sm:$0xff]  ;;  %v6983_v45 = vld [vmem:[%s9286_s2 + $0xd8] sm:$0xff] }
 0x1aa   :  { %v319_v48 = vpop.f32.mrf.mxu2 }
 0x1ab   :  { %v327_v53 = vadd.f32 %v319_v48, %v265_v38  ;;  %v7008_v48 = vld [vmem:[%s9286_s2 + $0xb0] sm:$0xf] }
 0x1b2   :  { %v322_v50 = vpop.f32.mrf.mxu2 }
 0x1b3   :  { %v328_v51 = vadd.f32 %v322_v50, %v268_v39  ;;  %v7022_v50 = vld [vmem:[%s9286_s2 + $0xe0] sm:$0xff] }
 0x1da   :  { %v358_v46 = vpop.f32.mrf.mxu3 }
 0x1db   :  { %v6856_v59 = vadd.f32 %v358_v46, %v325_v57  ;;  %v6994_v46 = vld [vmem:[%s9286_s2 + $0xa8] sm:$0xff] }
 0x1e2   :  { %v361_v47 = vpop.f32.mrf.mxu3 }
 0x1e3   :  { %v6851_v58 = vadd.f32 %v361_v47, %v326_v55  ;;  %v6999_v47 = vld [vmem:[%s9286_s2 + $0xc0] sm:$0xff] }
 0x1ea   :  { %v364_v49 = vpop.f32.mrf.mxu3 }
 0x1eb   :  { %v6846_v56 = vadd.f32 %v364_v49, %v327_v53  ;;  %v7013_v49 = vld [vmem:[%s9286_s2 + $0xc8] sm:$0xf] }
 0x1f2   :  { %v367_v52 = vpop.f32.mrf.mxu3 }
 0x1f3   :  { %v6844_v54 = vadd.f32 %v367_v52, %v328_v51  ;;  %v7027_v51 = vld [vmem:[%s9286_s2 + $0xd0] sm:$0xff] }
 0x1f5   :  { %398 = vmatpush.msrb.mxu0 %v6844_v54  ;;  %6592 = vmatpush.msrb.mxu2 %v6844_v54 }
 0x1f6   :  { %6593 = vmatpush.msra.mxu3 %v6844_v54 }
 0x1f7   :  { %399 = vmatpush.msrb.mxu0 %v6846_v56  ;;  %6594 = vmatpush.msrb.mxu2 %v6846_v56 }
 0x1f8   :  { %6595 = vmatpush.msra.mxu3 %v6846_v56 }
 0x1f9   :  { %400 = vmatpush.msrb.mxu0 %v6851_v58  ;;  %6596 = vmatpush.msrb.mxu2 %v6851_v58 }
 0x1fa   :  { %6597 = vmatpush.msra.mxu3 %v6851_v58 }
 0x1fb   :  { %401 = vmatpush.msrb.mxu0 %v6856_v59  ;;  %6598 = vmatpush.msrb.mxu2 %v6856_v59 }
 0x1fc   :  { %6599 = vmatpush.msra.mxu3 %v6856_v59  ;;  %6128 = vmatmul.msk.f32.vlgmr.msrb.gmra.mxu2 %vm283_vm7, %v375_v60 }
 0x1fd   :  { %6129 = vmatmul.msk.f32.vlgmr.msra.gmra.mxu3 %vm283_vm7, %v376_v61  ;;  %6127 = vmatmul.msk.f32.vlgmr.msrb.gmra.mxu0 %vm283_vm7, %v374_v62 }
 0x1fe   :  { %439 = vmatpush.msra.mxu2 %v6875_v63  ;;  %465 = vmatpush.msrb.mxu3 %v6880_v0 }
 0x200   :  { %440 = vmatpush.msra.mxu2 %v6889_v1  ;;  %466 = vmatpush.msrb.mxu3 %v6894_v2 }
 0x202   :  { %441 = vmatpush.msra.mxu2 %v6903_v3  ;;  %467 = vmatpush.msrb.mxu3 %v6908_v4 }
 0x204   :  { %442 = vmatpush.msra.mxu2 %v6915_v5  ;;  %468 = vmatpush.msrb.mxu3 %v6920_v6 }
 0x27a   :  { %v403_v7 = vpop.f32.mrf.mxu0 }
 0x27b   :  { %v416_v8 = vrot.slane %v403_v7, 4 }
 0x27f   :  { %v406_v9 = vpop.f32.mrf.mxu2 }
 0x280   :  { %v417_v10 = vrot.slane %v406_v9, 4  ;;  %v409_v12 = vpop.f32.mrf.mxu3 }
 0x281   :  { %v419_v13 = vrot.slane %v409_v12, 4 }
 0x282   :  { %v418_v11 = vsel %vm415_vm8, %v416_v8, %v417_v10 }
 0x283   :  { %6130 = vmatmul.msk.f32.vlgmr.msra.gmra.mxu2 %vm283_vm7, %v418_v11  ;;  %6133 = vmatmul.msk.f32.vlgmr.msrb.gmra.mxu3 %vm283_vm7, %v418_v11  ;;  %v420_v14 = vsel %vm415_vm8, %v417_v10, %v419_v13  ;;  %v7045_v10 = vld [vmem:[%s9286_s2 + $0xf0] sm:$0xff] }
 0x28b   :  { %6131 = vmatmul.msk.f32.gmra.mxu2 %vm283_vm7, %v420_v14  ;;  %6134 = vmatmul.msk.f32.gmra.mxu3 %vm283_vm7, %v420_v14 }
 0x293   :  { %6132 = vmatmul.msk.f32.gmra.mxu2 %vm283_vm7, %v419_v13  ;;  %6135 = vmatmul.msk.f32.gmra.mxu3 %vm283_vm7, %v419_v13 }
 0x306   :  { %v444_v15 = vpop.f32.mrf.mxu2  ;;  %v470_v16 = vpop.f32.mrf.mxu3 }
 0x307   :  { %v479_v26 = vmax.f32 %v444_v15, %v470_v16 }
 0x30e   :  { %v447_v17 = vpop.f32.mrf.mxu2  ;;  %v473_v18 = vpop.f32.mrf.mxu3 }
 0x30f   :  { %v480_v25 = vmax.f32 %v447_v17, %v473_v18 }
 0x316   :  { %v450_v19 = vpop.f32.mrf.mxu2  ;;  %v476_v23 = vpop.f32.mrf.mxu3 }
 0x317   :  { %v481_v24 = vmax.f32 %v450_v19, %v476_v23 }
 0x319   :  { %6136 = vmatpush.msk.msra.mxu0 %vm415_vm8, %v481_v24  ;;  %6139 = vmatpush.msk.msrb.mxu2 %vm415_vm8, %v481_v24 }
 0x31b   :  { %506 = vmatpush.msra.mxu0 %v480_v25  ;;  %535 = vmatpush.msrb.mxu2 %v480_v25 }
 0x31d   :  { %507 = vmatpush.msra.mxu0 %v479_v26  ;;  %536 = vmatpush.msrb.mxu2 %v479_v26 }
 0x31e   :  { %6140 = vmatmul.msk.f32.vlgmr.msrb.gmra.mxu2 %vm482_vm9, %v6937_v28  ;;  %6137 = vmatmul.msk.f32.vlgmr.msra.gmra.mxu0 %vm482_vm9, %v6942_v29 }
 0x31f   :  { %644 = vmatpush.msra.mxu2 %v6965_v37 }
 0x321   :  { %645 = vmatpush.msra.mxu2 %v7022_v50 }
 0x326   :  { %6141 = vmatmul.msk.f32.gmra.mxu2 %vm482_vm9, %v6951_v30  ;;  %6138 = vmatmul.msk.f32.gmra.mxu0 %vm482_vm9, %v6956_v31 }
 0x39b   :  { %v509_v36 = vpop.f32.mrf.mxu0 }
 0x3a1   :  { %v538_v38 = vpop.f32.mrf.mxu2 }
 0x3a2   :  { %v544_v42 = vmax.f32 %v509_v36, %v538_v38 }
 0x3a3   :  { %v512_v39 = vpop.f32.mrf.mxu0 }
 0x3a9   :  { %v541_v40 = vpop.f32.mrf.mxu2 }
 0x3aa   :  { %v545_v41 = vmax.f32 %v512_v39, %v541_v40 }
 0x3ac   :  { %6142 = vmatpush.msk.msra.mxu3 %vm556_vm10, %v545_v41  ;;  %6146 = vmatpush.msk.msrb.mxu0 %vm556_vm10, %v545_v41 }
 0x3ae   :  { %575 = vmatpush.msra.mxu3 %v544_v42  ;;  %610 = vmatpush.msrb.mxu0 %v544_v42 }
 0x3af   :  { %6143 = vmatmul.msk.f32.vlgmr.msra.gmra.mxu3 %vm546_vm11, %v6973_v43  ;;  %6147 = vmatmul.msk.f32.vlgmr.msrb.gmra.mxu0 %vm546_vm11, %v6978_v44 }
 0x3b0   :  { %6156 = vmatpush.msk.msra.mxu0 %vm415_vm8, %v403_v7  ;;  %679 = vmatpush.msrb.mxu3 %v6983_v45 }
 0x3b2   :  { %680 = vmatpush.msrb.mxu3 %v7027_v51 }
 0x3b4   :  { %945 = vmatpush.msra.mxu3 %v6774_v20 }
 0x3b6   :  { %946 = vmatpush.msra.mxu3 %v6779_v21 }
 0x3b7   :  { %6144 = vmatmul.msk.f32.gmra.mxu3 %vm546_vm11, %v6994_v46  ;;  %6148 = vmatmul.msk.f32.gmra.mxu0 %vm546_vm11, %v6999_v47 }
 0x3b8   :  { %947 = vmatpush.msra.mxu3 %v6786_v22 }
 0x3ba   :  { %948 = vmatpush.msra.mxu3 %v6809_v27 }
 0x3bf   :  { %6145 = vmatmul.msk.f32.gmra.mxu3 %vm546_vm11, %v7008_v48  ;;  %6149 = vmatmul.msk.f32.gmra.mxu0 %vm546_vm11, %v7013_v49 }
 0x42c   :  { %v612_v52 = vpop.f32.mrf.mxu0 }
 0x42d   :  { %6150 = vmatmul.msk.f32.vlgmr.msra.gmra.mxu2 %vm193_vm6, %v612_v52 }
 0x432   :  { %v577_v53 = vpop.f32.mrf.mxu3 }
 0x433   :  { %6153 = vmatmul.msk.f32.vlgmr.msrb.gmra.mxu3 %vm193_vm6, %v577_v53 }
 0x434   :  { %v615_v55 = vpop.f32.mrf.mxu0 }
 0x435   :  { %6151 = vmatmul.msk.f32.gmra.mxu2 %vm193_vm6, %v615_v55 }
 0x43a   :  { %v580_v57 = vpop.f32.mrf.mxu3 }
 0x43b   :  { %6154 = vmatmul.msk.f32.gmra.mxu3 %vm193_vm6, %v580_v57 }
 0x43c   :  { %v618_v60 = vpop.f32.mrf.mxu0 }
 0x43d   :  { %6152 = vmatmul.msk.f32.gmra.mxu2 %vm193_vm6, %v618_v60 }
 0x442   :  { %v583_v61 = vpop.f32.mrf.mxu3 }
 0x443   :  { %6155 = vmatmul.msk.f32.gmra.mxu3 %vm193_vm6, %v583_v61 }
 0x4b0   :  { %v647_v62 = vpop.f32.mrf.mxu2 }
 0x4b6   :  { %v682_v7 = vpop.f32.mrf.mxu3 }
 0x4b7   :  { %v683_v8 = vadd.f32 %v682_v7, %v647_v62 }
 0x4b8   :  { %v650_v42 = vpop.f32.mrf.mxu2 }
 0x4b9   :  { %691 = vxpose.xlu0.b32.start.end [1/1] (short) (narrow) %v683_v8, 8  ;;  %v775_v7 = vrot.slane %v683_v8, 4 }
 0x4be   :  { %v685_v52 = vpop.f32.mrf.mxu3 }
 0x4bf   :  { %v686_v55 = vadd.f32 %v685_v52, %v650_v42 }
 0x4c0   :  { %v653_v61 = vpop.f32.mrf.mxu2 }
 0x4c1   :  { %v776_v57 = vrot.slane %v686_v55, 4 }
 0x4c6   :  { %v688_v62 = vpop.f32.mrf.mxu3 }
 0x55d   :  { %v707_v9 = vpop.trf.xlu0 }
 0x55e   :  { %6157 = vmatmul.msk.f32.vlgmr.msra.gmra.mxu0 %vm723_vm12, %v707_v9 }
 0x5db   :  { %v746_v11 = vpop.f32.mrf.mxu0 }
 0x5dc   :  { %v747_v12 = vadd.f32 %v746_v11, %v7045_v10  ;;  %v689_v11 = vadd.f32 %v688_v62, %v653_v61 }
 0x5de   :  { %v749_v13 = vsel %vm283_vm7, %v747_v12, -inf }
 0x5df   :  { %v750_v14 = vrot.slane %v749_v13, 4 }
 0x5e1   :  { %v751_v15 = vmax.f32 %v749_v13, %v750_v14  ;;  %v778_v13 = vrot.slane %v689_v11, 4  ;;  %v867_v11 = vld [vmem:[%s9286_s2 + $0x4c0] sm:$0xff] }
 0x5e3   :  { %v752_v16 = vrot.slane %v751_v15, 2  ;;  %v779_v14 = vsel %vm415_vm8, %v776_v57, %v778_v13  ;;  %v873_v13 = vld [vmem:[%s9286_s2 + $0x4f0] sm:$0xff] }
 0x5e5   :  { %v753_v17 = vmax.f32 %v751_v15, %v752_v16  ;;  %v849_v15 = vld [vmem:[%s9286_s2 + $0x4b0] sm:$0x1] }
 0x5e6   :  { %6600 = vpush %v849_v15  ;;  %v1010_v15 = vld [vmem:[%s9286_s2 + $0x530] sm:$0xff] }
 0x5e7   :  { %v754_v18 = vrot.slane %v753_v17, 1 }
 0x5e9   :  { %v755_v19 = vmax.f32 %v753_v17, %v754_v18  ;;  %v768_v17 = vld [vmem:[%s9286_s2 + $0x490] sm:$0xff]  ;;  %v769_v18 = vld [vmem:[%s9286_s2 + $0x498] sm:$0xff] }
 0x5eb   :  { %v756_v23 = vsub.f32 %v747_v12, %v755_v19  ;;  %v777_v12 = vsel %vm415_vm8, %v775_v7, %v776_v57  ;;  %v770_v19 = vld [vmem:[%s9286_s2 + $0x4a0] sm:$0xff] }
 0x5ed   :  { %v757_v24 = vmul.f32 1.442695, %v756_v23  ;;  %v771_v23 = vld [vmem:[%s9286_s2 + $0x4a8] sm:$0xff] }
 0x5ef   :  { %6617 = vpow2.f32 %v757_v24 }
 0x5f5   :  { %v6618_v25 = vpop.eup %6617 }
 0x5f6   :  { %v759_v26 = vsel %vm283_vm7, %v6618_v25, 0.0 }
 0x5f7   :  { %v760_v36 = vrot.slane %v759_v26, 4 }
 0x5f9   :  { %v761_v38 = vadd.f32 %v760_v36, %v759_v26 }
 0x5fb   :  { %v762_v39 = vrot.slane %v761_v38, 2 }
 0x5fd   :  { %v763_v40 = vadd.f32 %v762_v39, %v761_v38 }
 0x5ff   :  { %v764_v41 = vrot.slane %v763_v40, 1 }
 0x601   :  { %v765_v53 = vadd.f32 %v764_v41, %v763_v40 }
 0x603   :  { %6619 = vrcp.f32 %v765_v53 }
 0x609   :  { %v6620_v60 = vpop.eup %6619 }
 0x60a   :  { %v767_v9 = vmul.f32 %v6620_v60, %v6618_v25 }
 0x60c   :  { %800 = vmatpush.msrb.mxu0 %v767_v9  ;;  %v866_v9 = vld [vmem:[%s9286_s2 + $0x4b8] sm:$0xff] }
 0x60d   :  { %6158 = vmatmul.msk.f32.vlgmr.msrb.gmra.mxu0 %vm780_vm13, %v777_v12  ;;  %v872_v12 = vld [vmem:[%s9286_s2 + $0x4e8] sm:$0xff] }
 0x60e   :  { %976 = vmatpush.msra.mxu0 %v6818_v32 }
 0x610   :  { %977 = vmatpush.msra.mxu0 %v6823_v33 }
 0x612   :  { %978 = vmatpush.msra.mxu0 %v6830_v34 }
 0x614   :  { %979 = vmatpush.msra.mxu0 %v6837_v35 }
 0x615   :  { %6159 = vmatmul.msk.f32.gmra.mxu0 %vm780_vm13, %v779_v14  ;;  %v6699_v14 = vmov 0  }
 0x616   :  { %1082 = vmatpush.msrb.mxu0 %v6774_v20  ;;  %6612 = vset.pattern.permute.xlu1 %v6699_v14 }
 0x617   :  { %s6601_s26 = spop %6600  ;;  %6611 = vset.pattern.permute.xlu0 %v6699_v14  ;;  %991 = vperm.xlu1 %6612, %v872_v12   ;;  %v2386_v12 = vld [vmem:[%s9286_s2 + $0x770] sm:$0xff] }
 0x618   :  { %1083 = vmatpush.msrb.mxu0 %v6779_v21  ;;  %v852_v36 = vstv %s6601_s26  ;;  %996 = vperm.xlu0 %6611, %v873_v13  }
 0x619   :  { %6613 = vset.pattern.permute.xlu2 %v6699_v14 }
 0x61a   :  { %1084 = vmatpush.msrb.mxu0 %v6786_v22 }
 0x61c   :  { %1085 = vmatpush.msrb.mxu0 %v6809_v27 }
 0x61f   :  { %1133 = vperm.xlu1 %6612, %v1010_v15  }
 0x68a   :  { %v802_v8 = vpop.f32.mrf.mxu0 }
 0x692   :  { %v805_v16 = vpop.f32.mrf.mxu0 }
 0x693   :  { %834 = vmatpush.msrb.mxu1 %v805_v16  ;;  %v3496_v16 = vld [vmem:[%s9286_s2 + $0x420] sm:$0xff] }
 0x694   :  { %3514 = vperm.xlu0 %6611, %v3496_v16  }
 0x695   :  { %835 = vmatpush.msrb.mxu1 %v802_v8  ;;  %v868_v8 = vld [vmem:[%s9286_s2 + $0x4c8] sm:$0xff] }
 0x696   :  { %6160 = vmatmul.msk.f32.vlgmr.msrb.gmra.mxu1 %vm193_vm6, %v768_v17  ;;  %v3495_v17 = vld [vmem:[%s9286_s2 + $0x418] sm:$0xff] }
 0x697   :  { %1113 = vmatpush.msra.mxu1 %v6818_v32 }
 0x699   :  { %1114 = vmatpush.msra.mxu1 %v6823_v33 }
 0x69b   :  { %1115 = vmatpush.msra.mxu1 %v6830_v34 }
 0x69c   :  { %3509 = vperm.xlu0 %6611, %v3495_v17  }
 0x69d   :  { %1116 = vmatpush.msra.mxu1 %v6837_v35 }
 0x69e   :  { %6161 = vmatmul.msk.f32.gmra.mxu1 %vm193_vm6, %v769_v18  ;;  %v3494_v18 = vld [vmem:[%s9286_s2 + $0x410] sm:$0xff] }
 0x69f   :  { %1219 = vmatpush.msrb.mxu1 %v6774_v20 }
 0x6a1   :  { %1220 = vmatpush.msrb.mxu1 %v6779_v21 }
 0x6a3   :  { %1221 = vmatpush.msrb.mxu1 %v6786_v22 }
 0x6a4   :  { %3504 = vperm.xlu0 %6611, %v3494_v18  }
 0x6a5   :  { %1222 = vmatpush.msrb.mxu1 %v6809_v27 }
 0x6a6   :  { %6162 = vmatmul.msk.f32.gmra.mxu1 %vm193_vm6, %v770_v19  ;;  %v871_v19 = vld [vmem:[%s9286_s2 + $0x4e0] sm:$0xff] }
 0x6ae   :  { %6163 = vmatmul.msk.f32.gmra.mxu1 %vm193_vm6, %v771_v23  ;;  %v1289_v23 = vld [vmem:[%s9286_s2 + $0x5d8] sm:$0xff] }
 0x713   :  { %v837_v24 = vpop.f32.mrf.mxu1 }
 0x714   :  { %v854_v42 = vmul.f32 %v852_v36, %v837_v24  ;;  %v3568_v24 = vld [vmem:[%s9286_s2 + $0x440] sm:$0xff] }
 0x715   :  { %3586 = vperm.xlu0 %6611, %v3568_v24   ;;  %v997_v24 = vpop.permute.xlu0 %996 }
 0x716   :  { %v858_v60 = vadd.f32 %v854_v42, %v6856_v59  ;;  %v3565_v42 = vld [vmem:[%s9286_s2 + $0x428] sm:$0xff] }
 0x718   :  { %v862_v7 = vadd.f32 %v858_v60, %v6856_v59  ;;  %v3878_v60 = vld [vmem:[%s9286_s2 + $0x870] sm:$0xff] }
 0x71b   :  { %v840_v25 = vpop.f32.mrf.mxu1 }
 0x71c   :  { %v855_v40 = vmul.f32 %v852_v36, %v840_v25  ;;  %v1967_v25 = vld [vmem:[%s9286_s2 + $0x670] sm:$0xff] }
 0x71e   :  { %v859_v55 = vadd.f32 %v855_v40, %v6851_v58  ;;  %v3566_v40 = vld [vmem:[%s9286_s2 + $0x430] sm:$0xff] }
 0x720   :  { %v863_v62 = vadd.f32 %v859_v55, %v6851_v58  ;;  %v2383_v55 = vld [vmem:[%s9286_s2 + $0x758] sm:$0xff] }
 0x723   :  { %v843_v26 = vpop.f32.mrf.mxu1 }
 0x724   :  { %v856_v38 = vmul.f32 %v852_v36, %v843_v26  ;;  %v3493_v26 = vld [vmem:[%s9286_s2 + $0x408] sm:$0xff] }
 0x725   :  { %3499 = vperm.xlu0 %6611, %v3493_v26  }
 0x726   :  { %v860_v52 = vadd.f32 %v856_v38, %v6846_v56  ;;  %v3567_v38 = vld [vmem:[%s9286_s2 + $0x438] sm:$0xff] }
 0x728   :  { %v864_v61 = vadd.f32 %v860_v52, %v6846_v56  ;;  %v2240_v52 = vld [vmem:[%s9286_s2 + $0x6e8] sm:$0xff] }
 0x72b   :  { %v846_v39 = vpop.f32.mrf.mxu1 }
 0x72c   :  { %v857_v41 = vmul.f32 %v852_v36, %v846_v39  ;;  %v1966_v36 = vld [vmem:[%s9286_s2 + $0x668] sm:$0xff]  ;;  %v2104_v39 = vld [vmem:[%s9286_s2 + $0x6b0] sm:$0xff] }
 0x72d   :  { %3581 = vperm.xlu0 %6611, %v3567_v38  }
 0x72e   :  { %v861_v53 = vadd.f32 %v857_v41, %v6844_v54  ;;  %v2103_v41 = vld [vmem:[%s9286_s2 + $0x6a8] sm:$0xff] }
 0x730   :  { %v865_v57 = vadd.f32 %v861_v53, %v6844_v54  ;;  %v3603_v53 = vld [vmem:[%s9286_s2 + $0x7e8] sm:$0xff] }
 0x732   :  { %904 = vmatpush.msrb.mxu2 %v865_v57 }
 0x734   :  { %905 = vmatpush.msrb.mxu2 %v864_v61  ;;  %v2384_v61 = vld [vmem:[%s9286_s2 + $0x760] sm:$0xff] }
 0x735   :  { %3576 = vperm.xlu0 %6611, %v3566_v40   ;;  %v1004_v40 = vld [vmem:[%s9286_s2 + $0x500] sm:$0xff] }
 0x736   :  { %906 = vmatpush.msrb.mxu2 %v863_v62 }
 0x738   :  { %907 = vmatpush.msrb.mxu2 %v862_v7  ;;  %v4023_v7 = vld [vmem:[%s9286_s2 + $0x8f0] sm:$0xff] }
 0x739   :  { %6164 = vmatmul.msk.f32.vlgmr.msrb.gmra.mxu2 %vm283_vm7, %v866_v9  ;;  %v2385_v9 = vld [vmem:[%s9286_s2 + $0x768] sm:$0xff] }
 0x73a   :  { %1250 = vmatpush.msra.mxu2 %v6818_v32 }
 0x73c   :  { %1251 = vmatpush.msra.mxu2 %v6823_v33 }
 0x73d   :  { %3571 = vperm.xlu0 %6611, %v3565_v42   ;;  %v1292_v42 = vld [vmem:[%s9286_s2 + $0x5f0] sm:$0xff] }
 0x73e   :  { %1252 = vmatpush.msra.mxu2 %v6830_v34 }
 0x740   :  { %1253 = vmatpush.msra.mxu2 %v6837_v35 }
 0x741   :  { %6165 = vmatmul.msk.f32.gmra.mxu2 %vm283_vm7, %v867_v11  ;;  %v4021_v11 = vld [vmem:[%s9286_s2 + $0x8e0] sm:$0xff] }
 0x742   :  { %1406 = vmatpush.msrb.mxu2 %v6774_v20  ;;  %v869_v20 = vld [vmem:[%s9286_s2 + $0x4d0] sm:$0xff] }
 0x744   :  { %1407 = vmatpush.msrb.mxu2 %v6779_v21  ;;  %v1146_v21 = vld [vmem:[%s9286_s2 + $0x568] sm:$0xff] }
 0x745   :  { %1265 = vperm.xlu1 %6612, %v1146_v21   ;;  %3722 = vperm.xlu0 %6611, %v3603_v53   ;;  %v1290_v53 = vld [vmem:[%s9286_s2 + $0x5e0] sm:$0xff] }
 0x746   :  { %1408 = vmatpush.msrb.mxu2 %v6786_v22  ;;  %v870_v22 = vld [vmem:[%s9286_s2 + $0x4d8] sm:$0xff] }
 0x748   :  { %1409 = vmatpush.msrb.mxu2 %v6809_v27  ;;  %v1291_v27 = vld [vmem:[%s9286_s2 + $0x5e8] sm:$0xff] }
 0x749   :  { %6166 = vmatmul.msk.f32.gmra.mxu2 %vm283_vm7, %v868_v8 }
 0x74d   :  { %1484 = vperm.xlu1 %6612, %v1291_v27   ;;  %4001 = vperm.xlu0 %6611, %v3878_v60  }
 0x751   :  { %6167 = vmatmul.msk.f32.gmra.mxu2 %vm283_vm7, %v869_v20 }
 0x755   :  { %1474 = vperm.xlu1 %6612, %v1289_v23   ;;  %4220 = vperm.xlu0 %6611, %v4023_v7   ;;  %v992_v23 = vpop.permute.xlu1 %991 }
 0x759   :  { %6168 = vmatmul.msk.f32.gmra.mxu2 %vm283_vm7, %v870_v22 }
 0x75d   :  { %2090 = vperm.xlu1 %6612, %v1967_v25   ;;  %4210 = vperm.xlu0 %6611, %v4021_v11  }
 0x761   :  { %6169 = vmatmul.msk.f32.gmra.mxu2 %vm283_vm7, %v871_v19 }
 0x765   :  { %2085 = vperm.xlu1 %6612, %v1966_v36  }
 0x76d   :  { %2227 = vperm.xlu1 %6612, %v2104_v39   ;;  %v1003_v39 = vld [vmem:[%s9286_s2 + $0x4f8] sm:$0xff] }
 0x775   :  { %2222 = vperm.xlu1 %6612, %v2103_v41  }
 0x77d   :  { %2359 = vperm.xlu1 %6612, %v2240_v52  }
 0x785   :  { %2568 = vperm.xlu1 %6612, %v2383_v55  }
 0x78d   :  { %2573 = vperm.xlu1 %6612, %v2384_v61  }
 0x795   :  { %2578 = vperm.xlu1 %6612, %v2385_v9  }
 0x79d   :  { %2583 = vperm.xlu1 %6612, %v2386_v12  }
 0x7bc   :  { %v909_v57 = vpop.f32.mrf.mxu2 }
 0x7bd   :  { %6170 = vmatmul.msk.f32.vlgmr.msra.gmra.mxu3 %vm283_vm7, %v909_v57 }
 0x7c4   :  { %v912_v62 = vpop.f32.mrf.mxu2 }
 0x7c5   :  { %6171 = vmatmul.msk.f32.gmra.mxu3 %vm283_vm7, %v912_v62 }
 0x7cc   :  { %v915_v13 = vpop.f32.mrf.mxu2 }
 0x7d4   :  { %v918_v14 = vpop.f32.mrf.mxu2 }
 0x7dc   :  { %v921_v8 = vpop.f32.mrf.mxu2 }
 0x7dd   :  { %6172 = vmatmul.msk.f32.vlgmr.msra.gmra.mxu0 %vm283_vm7, %v921_v8 }
 0x7e4   :  { %v924_v15 = vpop.f32.mrf.mxu2 }
 0x7e5   :  { %6173 = vmatmul.msk.f32.gmra.mxu0 %vm283_vm7, %v924_v15 }
 0x840   :  { %v950_v16 = vpop.f32.mrf.mxu3 }
 0x841   :  { %v956_v17 = vadd.f32 %v950_v16, %v915_v13 }
 0x848   :  { %v953_v21 = vpop.f32.mrf.mxu3 }
 0x849   :  { %v957_v22 = vadd.f32 %v953_v21, %v918_v14  ;;  %v1134_v14 = vpop.permute.xlu1 %1133 }
 0x85a   :  { %v981_v20 = vpop.f32.mrf.mxu0 }
 0x85b   :  { %v987_v27 = vadd.f32 %v981_v20, %v956_v17  ;;  %v1140_v17 = vld [vmem:[%s9286_s2 + $0x538] sm:$0xff] }
 0x85d   :  { %v999_v25 = vadd.f32 %v992_v23, %v987_v27  ;;  %v1142_v27 = vld [vmem:[%s9286_s2 + $0x548] sm:$0xff]  ;;  %v1145_v23 = vld [vmem:[%s9286_s2 + $0x560] sm:$0xff] }
 0x85f   :  { %v1001_v38 = vmax.f32 %v999_v25, 0.0 }
 0x862   :  { %v984_v18 = vpop.f32.mrf.mxu0 }
 0x863   :  { %v988_v19 = vadd.f32 %v984_v18, %v957_v22  ;;  %v1141_v22 = vld [vmem:[%s9286_s2 + $0x540] sm:$0xff]  ;;  %v1143_v18 = vld [vmem:[%s9286_s2 + $0x550] sm:$0xff] }
 0x865   :  { %v1000_v26 = vadd.f32 %v997_v24, %v988_v19  ;;  %v1144_v19 = vld [vmem:[%s9286_s2 + $0x558] sm:$0xff] }
 0x867   :  { %v1002_v36 = vmax.f32 %v1000_v26, 0.0 }
 0x869   :  { %1043 = vmatpush.msrb.mxu3 %v1002_v36 }
 0x86b   :  { %1044 = vmatpush.msrb.mxu3 %v1001_v38 }
 0x86c   :  { %6174 = vmatmul.msk.f32.vlgmr.msrb.gmra.mxu3 %vm193_vm6, %v1003_v39 }
 0x86d   :  { %1451 = vmatpush.msra.mxu3 %v6818_v32  ;;  %v1005_v32 = vld [vmem:[%s9286_s2 + $0x508] sm:$0xff] }
 0x86f   :  { %1452 = vmatpush.msra.mxu3 %v6823_v33  ;;  %v1006_v33 = vld [vmem:[%s9286_s2 + $0x510] sm:$0xff] }
 0x871   :  { %1453 = vmatpush.msra.mxu3 %v6830_v34  ;;  %v1007_v34 = vld [vmem:[%s9286_s2 + $0x518] sm:$0xff] }
 0x873   :  { %1454 = vmatpush.msra.mxu3 %v6837_v35  ;;  %v1008_v35 = vld [vmem:[%s9286_s2 + $0x520] sm:$0xff] }
 0x874   :  { %6175 = vmatmul.msk.f32.gmra.mxu3 %vm193_vm6, %v1004_v40 }
 0x875   :  { %1594 = vmatpush.msrb.mxu3 %v6880_v0 }
 0x877   :  { %1595 = vmatpush.msrb.mxu3 %v6894_v2 }
 0x879   :  { %1596 = vmatpush.msrb.mxu3 %v6908_v4  ;;  %v1009_v4 = vld [vmem:[%s9286_s2 + $0x528] sm:$0xff] }
 0x87a   :  { %1128 = vperm.xlu2 %6613, %v1009_v4  }
 0x87b   :  { %1597 = vmatpush.msrb.mxu3 %v6920_v6  ;;  %v1147_v6 = vld [vmem:[%s9286_s2 + $0x570] sm:$0xff] }
 0x87c   :  { %6176 = vmatmul.msk.f32.gmra.mxu3 %vm193_vm6, %v1005_v32 }
 0x882   :  { %1270 = vperm.xlu2 %6613, %v1147_v6   ;;  %v1266_v6 = vpop.permute.xlu1 %1265 }
 0x884   :  { %6177 = vmatmul.msk.f32.gmra.mxu3 %vm193_vm6, %v1006_v33 }
 0x88a   :  { %1489 = vperm.xlu2 %6613, %v1292_v42  }
 0x88c   :  { %6178 = vmatmul.msk.f32.gmra.mxu3 %vm193_vm6, %v1007_v34 }
 0x892   :  { %1479 = vperm.xlu2 %6613, %v1290_v53   ;;  %v1279_v53 = vld [vmem:[%s9286_s2 + $0x588] sm:$0xff] }
 0x894   :  { %6179 = vmatmul.msk.f32.gmra.mxu3 %vm193_vm6, %v1008_v35 }
 0x8d4   :  { %v1129_v8 = vpop.permute.xlu2 %1128 }
 0x8ef   :  { %v1046_v0 = vpop.f32.mrf.mxu3 }
 0x8f0   :  { %6180 = vmatmul.msk.f32.vlgmr.msrb.gmra.mxu0 %vm283_vm7, %v1046_v0 }
 0x8f7   :  { %v1049_v2 = vpop.f32.mrf.mxu3 }
 0x8f8   :  { %6181 = vmatmul.msk.f32.gmra.mxu0 %vm283_vm7, %v1049_v2 }
 0x8ff   :  { %v1052_v41 = vpop.f32.mrf.mxu3 }
 0x907   :  { %v1055_v52 = vpop.f32.mrf.mxu3 }
 0x90f   :  { %v1058_v55 = vpop.f32.mrf.mxu3 }
 0x910   :  { %6182 = vmatmul.msk.f32.vlgmr.msra.gmra.mxu1 %vm283_vm7, %v1058_v55  ;;  %v1280_v55 = vld [vmem:[%s9286_s2 + $0x590] sm:$0xff] }
 0x917   :  { %v1061_v57 = vpop.f32.mrf.mxu3 }
 0x918   :  { %6183 = vmatmul.msk.f32.gmra.mxu1 %vm283_vm7, %v1061_v57  ;;  %v1281_v57 = vld [vmem:[%s9286_s2 + $0x598] sm:$0xff] }
 0x96d   :  { %v1087_v60 = vpop.f32.mrf.mxu0 }
 0x96e   :  { %v1093_v7 = vadd.f32 %v1087_v60, %v1052_v41  ;;  %v1271_v41 = vpop.permute.xlu2 %1270  ;;  %v1282_v60 = vld [vmem:[%s9286_s2 + $0x5a0] sm:$0xff] }
 0x975   :  { %v1090_v62 = vpop.f32.mrf.mxu0 }
 0x976   :  { %v1094_v9 = vadd.f32 %v1090_v62, %v1055_v52  ;;  %v1278_v52 = vld [vmem:[%s9286_s2 + $0x580] sm:$0xff]  ;;  %v1284_v62 = vld [vmem:[%s9286_s2 + $0x5b0] sm:$0xff] }
 0x98d   :  { %v1118_v61 = vpop.f32.mrf.mxu1 }
 0x98e   :  { %v1124_v11 = vadd.f32 %v1118_v61, %v1093_v7  ;;  %v1283_v61 = vld [vmem:[%s9286_s2 + $0x5a8] sm:$0xff]  ;;  %v1285_v7 = vld [vmem:[%s9286_s2 + $0x5b8] sm:$0xff] }
 0x990   :  { %v1136_v15 = vadd.f32 %v1129_v8, %v1124_v11  ;;  %v1287_v11 = vld [vmem:[%s9286_s2 + $0x5c8] sm:$0xff] }
 0x992   :  { %v1138_v21 = vmax.f32 %v1136_v15, 0.0 }
 0x995   :  { %v1121_v12 = vpop.f32.mrf.mxu1 }
 0x996   :  { %v1125_v13 = vadd.f32 %v1121_v12, %v1094_v9  ;;  %v1286_v9 = vld [vmem:[%s9286_s2 + $0x5c0] sm:$0xff]  ;;  %v1288_v12 = vld [vmem:[%s9286_s2 + $0x5d0] sm:$0xff] }
 0x998   :  { %v1137_v16 = vadd.f32 %v1134_v14, %v1125_v13 }
 0x99a   :  { %v1139_v20 = vmax.f32 %v1137_v16, 0.0 }
 0x99c   :  { %1180 = vmatpush.msra.mxu0 %v1139_v20 }
 0x99e   :  { %1181 = vmatpush.msra.mxu0 %v1138_v21 }
 0x99f   :  { %6184 = vmatmul.msk.f32.vlgmr.msra.gmra.mxu0 %vm193_vm6, %v1140_v17 }
 0x9a7   :  { %6185 = vmatmul.msk.f32.gmra.mxu0 %vm193_vm6, %v1141_v22 }
 0x9af   :  { %6186 = vmatmul.msk.f32.gmra.mxu0 %vm193_vm6, %v1142_v27 }
 0x9b7   :  { %6187 = vmatmul.msk.f32.gmra.mxu0 %vm193_vm6, %v1143_v18 }
 0x9bf   :  { %6188 = vmatmul.msk.f32.gmra.mxu0 %vm193_vm6, %v1144_v19 }
 0x9c7   :  { %6189 = vmatmul.msk.f32.gmra.mxu0 %vm193_vm6, %v1145_v23 }
 0xa1c   :  { %v1183_v24 = vpop.f32.mrf.mxu0 }
 0xa1d   :  { %6190 = vmatmul.msk.f32.vlgmr.msrb.gmra.mxu1 %vm283_vm7, %v1183_v24 }
 0xa24   :  { %v1186_v25 = vpop.f32.mrf.mxu0 }
 0xa25   :  { %6191 = vmatmul.msk.f32.gmra.mxu1 %vm283_vm7, %v1186_v25 }
 0xa2c   :  { %v1189_v26 = vpop.f32.mrf.mxu0 }
 0xa34   :  { %v1192_v36 = vpop.f32.mrf.mxu0 }
 0xa3c   :  { %v1195_v38 = vpop.f32.mrf.mxu0 }
 0xa3d   :  { %6192 = vmatmul.msk.f32.vlgmr.msra.gmra.mxu2 %vm283_vm7, %v1195_v38  ;;  %v1490_v38 = vpop.permute.xlu2 %1489 }
 0xa3e   :  { %1568 = vmatpush.msra.mxu2 %v6875_v63 }
 0xa40   :  { %1569 = vmatpush.msra.mxu2 %v6889_v1 }
 0xa42   :  { %1570 = vmatpush.msra.mxu2 %v6903_v3 }
 0xa44   :  { %v1198_v39 = vpop.f32.mrf.mxu0  ;;  %1571 = vmatpush.msra.mxu2 %v6915_v5  ;;  %v1277_v5 = vld [vmem:[%s9286_s2 + $0x578] sm:$0xff] }
 0xa45   :  { %6193 = vmatmul.msk.f32.gmra.mxu2 %vm283_vm7, %v1198_v39 }
 0xa9a   :  { %v1224_v40 = vpop.f32.mrf.mxu1 }
 0xa9b   :  { %v1230_v34 = vadd.f32 %v1224_v40, %v1189_v26  ;;  %v1485_v40 = vpop.permute.xlu1 %1484 }
 0xaa2   :  { %v1227_v33 = vpop.f32.mrf.mxu1 }
 0xaa3   :  { %v1231_v35 = vadd.f32 %v1227_v33, %v1192_v36 }
 0xac0   :  { %v1255_v32 = vpop.f32.mrf.mxu2 }
 0xac1   :  { %v1261_v0 = vadd.f32 %v1255_v32, %v1230_v34 }
 0xac3   :  { %v1273_v63 = vadd.f32 %v1266_v6, %v1261_v0 }
 0xac5   :  { %v1275_v3 = vmax.f32 %v1273_v63, 0.0 }
 0xac8   :  { %v1258_v2 = vpop.f32.mrf.mxu2 }
 0xac9   :  { %v1262_v4 = vadd.f32 %v1258_v2, %v1231_v35 }
 0xacb   :  { %v1274_v42 = vadd.f32 %v1271_v41, %v1262_v4 }
 0xacd   :  { %v1276_v1 = vmax.f32 %v1274_v42, 0.0 }
 0xacf   :  { %1343 = vmatpush.msra.mxu1 %v1276_v1  ;;  %v1480_v1 = vpop.permute.xlu2 %1479 }
 0xad1   :  { %1344 = vmatpush.msra.mxu1 %v1275_v3 }
 0xad2   :  { %6194 = vmatmul.msk.f32.vlgmr.msra.gmra.mxu1 %vm193_vm6, %v1277_v5 }
 0xada   :  { %6195 = vmatmul.msk.f32.gmra.mxu1 %vm193_vm6, %v1278_v52  ;;  %v1475_v52 = vpop.permute.xlu1 %1474 }
 0xae2   :  { %6196 = vmatmul.msk.f32.gmra.mxu1 %vm193_vm6, %v1279_v53 }
 0xaea   :  { %6197 = vmatmul.msk.f32.gmra.mxu1 %vm193_vm6, %v1280_v55 }
 0xaf2   :  { %6198 = vmatmul.msk.f32.gmra.mxu1 %vm193_vm6, %v1281_v57 }
 0xafa   :  { %6199 = vmatmul.msk.f32.gmra.mxu1 %vm193_vm6, %v1282_v60 }
 0xb02   :  { %6200 = vmatmul.msk.f32.gmra.mxu1 %vm193_vm6, %v1283_v61 }
 0xb0a   :  { %6201 = vmatmul.msk.f32.gmra.mxu1 %vm193_vm6, %v1284_v62 }
 0xb12   :  { %6202 = vmatmul.msk.f32.gmra.mxu1 %vm193_vm6, %v1285_v7 }
 0xb1a   :  { %6203 = vmatmul.msk.f32.gmra.mxu1 %vm193_vm6, %v1286_v9 }
 0xb22   :  { %6204 = vmatmul.msk.f32.gmra.mxu1 %vm193_vm6, %v1287_v11 }
 0xb2a   :  { %6205 = vmatmul.msk.f32.gmra.mxu1 %vm193_vm6, %v1288_v12 }
 0xb4f   :  { %v1346_v13 = vpop.f32.mrf.mxu1 }
 0xb50   :  { %6206 = vmatmul.msk.f32.vlgmr.msrb.gmra.mxu2 %vm283_vm7, %v1346_v13 }
 0xb57   :  { %v1349_v14 = vpop.f32.mrf.mxu1 }
 0xb58   :  { %6207 = vmatmul.msk.f32.gmra.mxu2 %vm283_vm7, %v1349_v14 }
 0xb5f   :  { %v1352_v8 = vpop.f32.mrf.mxu1 }
 0xb60   :  { %6208 = vmatmul.msk.f32.gmra.mxu2 %vm283_vm7, %v1352_v8 }
 0xb67   :  { %v1355_v15 = vpop.f32.mrf.mxu1 }
 0xb68   :  { %6209 = vmatmul.msk.f32.gmra.mxu2 %vm283_vm7, %v1355_v15 }
 0xb6f   :  { %v1358_v16 = vpop.f32.mrf.mxu1 }
 0xb77   :  { %v1361_v20 = vpop.f32.mrf.mxu1 }
 0xb7f   :  { %v1364_v21 = vpop.f32.mrf.mxu1 }
 0xb87   :  { %v1367_v17 = vpop.f32.mrf.mxu1 }
 0xb8f   :  { %v1370_v22 = vpop.f32.mrf.mxu1 }
 0xb90   :  { %6210 = vmatmul.msk.f32.vlgmr.msra.gmra.mxu3 %vm283_vm7, %v1370_v22 }
 0xb97   :  { %v1373_v27 = vpop.f32.mrf.mxu1 }
 0xb98   :  { %6211 = vmatmul.msk.f32.gmra.mxu3 %vm283_vm7, %v1373_v27 }
 0xb9f   :  { %v1376_v18 = vpop.f32.mrf.mxu1 }
 0xba0   :  { %6212 = vmatmul.msk.f32.gmra.mxu3 %vm283_vm7, %v1376_v18 }
 0xba7   :  { %v1379_v19 = vpop.f32.mrf.mxu1 }
 0xba8   :  { %6213 = vmatmul.msk.f32.gmra.mxu3 %vm283_vm7, %v1379_v19 }
 0xbd3   :  { %v1411_v23 = vpop.f32.mrf.mxu2 }
 0xbd4   :  { %v1423_v0 = vadd.f32 %v1411_v23, %v1358_v16 }
 0xbdb   :  { %v1414_v24 = vpop.f32.mrf.mxu2 }
 0xbdc   :  { %v1424_v34 = vadd.f32 %v1414_v24, %v1361_v20 }
 0xbe3   :  { %v1417_v36 = vpop.f32.mrf.mxu2 }
 0xbe4   :  { %v1425_v32 = vadd.f32 %v1417_v36, %v1364_v21 }
 0xbeb   :  { %v1420_v33 = vpop.f32.mrf.mxu2 }
 0xbec   :  { %v1426_v2 = vadd.f32 %v1420_v33, %v1367_v17  ;;  %v3604_v33 = vld [vmem:[%s9286_s2 + $0x7f0] sm:$0xff] }
 0xc13   :  { %v1456_v25 = vpop.f32.mrf.mxu3 }
 0xc14   :  { %v1468_v41 = vadd.f32 %v1456_v25, %v1423_v0  ;;  %v4022_v0 = vld [vmem:[%s9286_s2 + $0x8e8] sm:$0xff] }
 0xc16   :  { %v1492_v53 = vadd.f32 %v1475_v52, %v1468_v41  ;;  %v4697_v41 = vld [vmem:[%s9286_s2 + $0x968] sm:$0xff]  ;;  %v5115_v52 = vld [vmem:[%s9286_s2 + $0xa60] sm:$0xff] }
 0xc18   :  { %v1496_v62 = vmax.f32 %v1492_v53, 0.0 }
 0xc1a   :  { %v7362_v11 = vadd.f32 %v1496_v62, %v6856_v59 }
 0xc1b   :  { %v1459_v26 = vpop.f32.mrf.mxu3 }
 0xc1c   :  { %v1469_v4 = vadd.f32 %v1459_v26, %v1424_v34  ;;  %v3741_v34 = vld [vmem:[%s9286_s2 + $0x830] sm:$0xff] }
 0xc1e   :  { %v1493_v3 = vadd.f32 %v1480_v1, %v1469_v4  ;;  %v4698_v4 = vld [vmem:[%s9286_s2 + $0x970] sm:$0xff] }
 0xc1f   :  { %v4972_v1 = vld [vmem:[%s9286_s2 + $0x9f0] sm:$0xff] }
 0xc20   :  { %v1497_v60 = vmax.f32 %v1493_v3, 0.0  ;;  %v5117_v3 = vld [vmem:[%s9286_s2 + $0xa70] sm:$0xff] }
 0xc22   :  { %v7358_v9 = vadd.f32 %v1497_v60, %v6851_v58  ;;  %v1506_v58 = vld [vmem:[%s9286_s2 + $0x608] sm:$0xff] }
 0xc23   :  { %v1462_v39 = vpop.f32.mrf.mxu3 }
 0xc24   :  { %v1470_v35 = vadd.f32 %v1462_v39, %v1425_v32 }
 0xc26   :  { %v1494_v63 = vadd.f32 %v1485_v40, %v1470_v35  ;;  %v3877_v35 = vld [vmem:[%s9286_s2 + $0x868] sm:$0xff] }
 0xc28   :  { %v1498_v55 = vmax.f32 %v1494_v63, 0.0  ;;  %v4835_v63 = vld [vmem:[%s9286_s2 + $0x9b0] sm:$0xff] }
 0xc2a   :  { %v7354_v7 = vadd.f32 %v1498_v55, %v6846_v56  ;;  %v1505_v56 = vld [vmem:[%s9286_s2 + $0x600] sm:$0xff] }
 0xc2b   :  { %v1465_v6 = vpop.f32.mrf.mxu3 }
 0xc2c   :  { %v1471_v42 = vadd.f32 %v1465_v6, %v1426_v2  ;;  %v4020_v2 = vld [vmem:[%s9286_s2 + $0x8d8] sm:$0xff] }
 0xc2e   :  { %v1495_v5 = vadd.f32 %v1490_v38, %v1471_v42  ;;  %v4834_v42 = vld [vmem:[%s9286_s2 + $0x9a8] sm:$0xff] }
 0xc30   :  { %v1499_v57 = vmax.f32 %v1495_v5, 0.0  ;;  %v5116_v5 = vld [vmem:[%s9286_s2 + $0xa68] sm:$0xff] }
 0xc32   :  { %v7351_v61 = vadd.f32 %v1499_v57, %v6844_v54  ;;  %v1504_v54 = vld [vmem:[%s9286_s2 + $0x5f8] sm:$0xff] }
 0xc34   :  { %1528 = vmatpush.msrb.mxu0 %v7351_v61 }
 0xc36   :  { %1529 = vmatpush.msrb.mxu0 %v7354_v7 }
 0xc38   :  { %1530 = vmatpush.msrb.mxu0 %v7358_v9 }
 0xc3a   :  { %1531 = vmatpush.msrb.mxu0 %v7362_v11 }
 0xc3b   :  { %6214 = vmatmul.msk.f32.vlgmr.msrb.gmra.mxu0 %vm283_vm7, %v1504_v54 }
 0xc43   :  { %6215 = vmatmul.msk.f32.gmra.mxu0 %vm283_vm7, %v1505_v56 }
 0xc4b   :  { %6216 = vmatmul.msk.f32.gmra.mxu0 %vm283_vm7, %v1506_v58 }
 0xcb8   :  { %v1533_v59 = vpop.f32.mrf.mxu0 }
 0xcb9   :  { %v1545_v13 = vrot.slane %v1533_v59, 4 }
 0xcc0   :  { %v1536_v12 = vpop.f32.mrf.mxu0 }
 0xcc1   :  { %v1546_v14 = vrot.slane %v1536_v12, 4 }
 0xcc3   :  { %v1547_v8 = vsel %vm415_vm8, %v1545_v13, %v1546_v14 }
 0xcc4   :  { %6217 = vmatmul.msk.f32.vlgmr.msra.gmra.mxu2 %vm283_vm7, %v1547_v8  ;;  %6220 = vmatmul.msk.f32.vlgmr.msrb.gmra.mxu3 %vm283_vm7, %v1547_v8 }
 0xcc8   :  { %v1539_v15 = vpop.f32.mrf.mxu0 }
 0xcc9   :  { %v1548_v16 = vrot.slane %v1539_v15, 4 }
 0xccb   :  { %v1549_v20 = vsel %vm415_vm8, %v1546_v14, %v1548_v16 }
 0xccc   :  { %6218 = vmatmul.msk.f32.gmra.mxu2 %vm283_vm7, %v1549_v20  ;;  %6221 = vmatmul.msk.f32.gmra.mxu3 %vm283_vm7, %v1549_v20 }
 0xcd4   :  { %6219 = vmatmul.msk.f32.gmra.mxu2 %vm283_vm7, %v1548_v16  ;;  %6222 = vmatmul.msk.f32.gmra.mxu3 %vm283_vm7, %v1548_v16 }
 0xd47   :  { %v1573_v21 = vpop.f32.mrf.mxu2  ;;  %v1599_v17 = vpop.f32.mrf.mxu3 }
 0xd48   :  { %v1608_v25 = vmax.f32 %v1573_v21, %v1599_v17 }
 0xd4f   :  { %v1576_v22 = vpop.f32.mrf.mxu2  ;;  %v1602_v27 = vpop.f32.mrf.mxu3 }
 0xd50   :  { %v1609_v24 = vmax.f32 %v1576_v22, %v1602_v27 }
 0xd57   :  { %v1579_v18 = vpop.f32.mrf.mxu2  ;;  %v1605_v19 = vpop.f32.mrf.mxu3 }
 0xd58   :  { %v1610_v23 = vmax.f32 %v1579_v18, %v1605_v19 }
 0xd5a   :  { %6223 = vmatpush.msk.msra.mxu0 %vm415_vm8, %v1610_v23  ;;  %6226 = vmatpush.msk.msrb.mxu2 %vm415_vm8, %v1610_v23 }
 0xd5c   :  { %1628 = vmatpush.msra.mxu0 %v1609_v24  ;;  %1651 = vmatpush.msrb.mxu2 %v1609_v24 }
 0xd5e   :  { %1629 = vmatpush.msra.mxu0 %v1608_v25  ;;  %1652 = vmatpush.msrb.mxu2 %v1608_v25 }
 0xd5f   :  { %6227 = vmatmul.msk.f32.vlgmr.msrb.gmra.mxu2 %vm482_vm9, %v6937_v28  ;;  %6224 = vmatmul.msk.f32.vlgmr.msra.gmra.mxu0 %vm482_vm9, %v6942_v29  ;;  %v7410_v28 = vld [vmem:[%s9286_s2 + $0x38] sm:$0xff]  ;;  %v7416_v29 = vld [vmem:[%s9286_s2 + $0x30] sm:$0xff] }
 0xd60   :  { %1740 = vmatpush.msra.mxu2 %v6965_v37 }
 0xd62   :  { %1741 = vmatpush.msra.mxu2 %v7022_v50 }
 0xd67   :  { %6228 = vmatmul.msk.f32.gmra.mxu2 %vm482_vm9, %v6951_v30  ;;  %6225 = vmatmul.msk.f32.gmra.mxu0 %vm482_vm9, %v6956_v31  ;;  %v7426_v30 = vld [vmem:[%s9286_s2 + $0x28] sm:$0xff]  ;;  %v7432_v31 = vld [vmem:[%s9286_s2 + $0x20] sm:$0xff] }
 0xddc   :  { %v1631_v26 = vpop.f32.mrf.mxu0 }
 0xde2   :  { %v1654_v36 = vpop.f32.mrf.mxu2 }
 0xde3   :  { %v1660_v32 = vmax.f32 %v1631_v26, %v1654_v36 }
 0xde4   :  { %v1634_v38 = vpop.f32.mrf.mxu0 }
 0xdea   :  { %v1657_v39 = vpop.f32.mrf.mxu2 }
 0xdeb   :  { %v1661_v40 = vmax.f32 %v1634_v38, %v1657_v39 }
 0xded   :  { %6229 = vmatpush.msk.msra.mxu3 %vm556_vm10, %v1661_v40  ;;  %6233 = vmatpush.msk.msrb.mxu0 %vm556_vm10, %v1661_v40  ;;  %v7504_v40 = vld [vmem:[%s9286_s2 + $0x18] sm:$0xff] }
 0xdef   :  { %1680 = vmatpush.msra.mxu3 %v1660_v32  ;;  %1706 = vmatpush.msrb.mxu0 %v1660_v32 }
 0xdf0   :  { %6230 = vmatmul.msk.f32.vlgmr.msra.gmra.mxu3 %vm546_vm11, %v6973_v43  ;;  %6234 = vmatmul.msk.f32.vlgmr.msrb.gmra.mxu0 %vm546_vm11, %v6978_v44 }
 0xdf1   :  { %6243 = vmatpush.msk.msra.mxu0 %vm415_vm8, %v1533_v59  ;;  %1775 = vmatpush.msrb.mxu3 %v6983_v45 }
 0xdf3   :  { %1776 = vmatpush.msrb.mxu3 %v7027_v51  ;;  %v2241_v51 = vld [vmem:[%s9286_s2 + $0x6f0] sm:$0xff] }
 0xdf5   :  { %2070 = vmatpush.msra.mxu3 %v7410_v28 }
 0xdf7   :  { %2071 = vmatpush.msra.mxu3 %v7416_v29 }
 0xdf8   :  { %6231 = vmatmul.msk.f32.gmra.mxu3 %vm546_vm11, %v6994_v46  ;;  %6235 = vmatmul.msk.f32.gmra.mxu0 %vm546_vm11, %v6999_v47 }
 0xdf9   :  { %2072 = vmatpush.msra.mxu3 %v7426_v30 }
 0xdfb   :  { %2073 = vmatpush.msra.mxu3 %v7432_v31 }
 0xe00   :  { %6232 = vmatmul.msk.f32.gmra.mxu3 %vm546_vm11, %v7008_v48  ;;  %6236 = vmatmul.msk.f32.gmra.mxu0 %vm546_vm11, %v7013_v49 }
 0xe6d   :  { %v1708_v37 = vpop.f32.mrf.mxu0 }
 0xe6e   :  { %6237 = vmatmul.msk.f32.vlgmr.msra.gmra.mxu2 %vm193_vm6, %v1708_v37  ;;  %v7510_v37 = vld [vmem:[%s9286_s2 + $0x10] sm:$0xff] }
 0xe73   :  { %v1682_v43 = vpop.f32.mrf.mxu3 }
 0xe74   :  { %6240 = vmatmul.msk.f32.vlgmr.msrb.gmra.mxu3 %vm193_vm6, %v1682_v43  ;;  %v7516_v43 = vld [vmem:[%s9286_s2 + $0x8] sm:$0xff] }
 0xe75   :  { %2207 = vmatpush.msrb.mxu3 %v7410_v28  ;;  %v1711_v44 = vpop.f32.mrf.mxu0 }
 0xe76   :  { %6238 = vmatmul.msk.f32.gmra.mxu2 %vm193_vm6, %v1711_v44 }
 0xe77   :  { %2208 = vmatpush.msrb.mxu3 %v7416_v29 }
 0xe79   :  { %2209 = vmatpush.msrb.mxu3 %v7426_v30 }
 0xe7b   :  { %v1685_v45 = vpop.f32.mrf.mxu3  ;;  %2210 = vmatpush.msrb.mxu3 %v7432_v31 }
 0xe7c   :  { %6241 = vmatmul.msk.f32.gmra.mxu3 %vm193_vm6, %v1685_v45  ;;  %v7523_v45 = vld [vmem:[%s9286_s2] sm:$0xff] }
 0xe7d   :  { %v1714_v46 = vpop.f32.mrf.mxu0 }
 0xe7e   :  { %6239 = vmatmul.msk.f32.gmra.mxu2 %vm193_vm6, %v1714_v46 }
 0xe83   :  { %v1688_v47 = vpop.f32.mrf.mxu3 }
 0xe84   :  { %6242 = vmatmul.msk.f32.gmra.mxu3 %vm193_vm6, %v1688_v47  ;;  %v1943_v47 = vld [vmem:[%s9286_s2 + $0x630] sm:$0x1] }
 0xe85   :  { %6602 = vpush %v1943_v47 }
 0xeb6   :  { %s6603_s9 = spop %6602 }
 0xef1   :  { %v1743_v48 = vpop.f32.mrf.mxu2 }
 0xef7   :  { %v1778_v49 = vpop.f32.mrf.mxu3 }
 0xef8   :  { %v7449_v50 = vadd.f32 %v1778_v49, %v1743_v48  ;;  %v1863_v49 = vld [vmem:[%s9286_s2 + $0x610] sm:$0xff] }
 0xefa   :  { %1787 = vxpose.xlu2.b32.start.end [1/1] (short) (narrow) %v7449_v50, 8  ;;  %v1870_v26 = vrot.slane %v7449_v50, 4  ;;  %v1864_v50 = vld [vmem:[%s9286_s2 + $0x618] sm:$0xff] }
 0xeff   :  { %v1781_v22 = vpop.f32.mrf.mxu3 }
 0xf07   :  { %v1784_v25 = vpop.f32.mrf.mxu3 }
 0xf63   :  { %2364 = vperm.xlu2 %6613, %v2241_v51   ;;  %v1865_v51 = vld [vmem:[%s9286_s2 + $0x620] sm:$0xff] }
 0xf6b   :  { %3727 = vperm.xlu2 %6613, %v3604_v33   ;;  %v1866_v33 = vld [vmem:[%s9286_s2 + $0x628] sm:$0xff] }
 0xf73   :  { %3864 = vperm.xlu2 %6613, %v3741_v34  }
 0xf7b   :  { %3996 = vperm.xlu2 %6613, %v3877_v35  }
 0xf83   :  { %4215 = vperm.xlu2 %6613, %v4022_v0  }
 0xf8b   :  { %4205 = vperm.xlu2 %6613, %v4020_v2   ;;  %v1946_v2 = vstv %s6603_s9 }
 0xf93   :  { %4821 = vperm.xlu2 %6613, %v4698_v4   ;;  %v1803_v6 = vpop.trf.xlu2 }
 0xf94   :  { %6244 = vmatmul.msk.f32.vlgmr.msra.gmra.mxu0 %vm723_vm12, %v1803_v6 }
 0xf9b   :  { %4816 = vperm.xlu2 %6613, %v4697_v41  }
 0xfa3   :  { %4958 = vperm.xlu2 %6613, %v4835_v63  }
 0xfab   :  { %4953 = vperm.xlu2 %6613, %v4834_v42  }
 0xfb3   :  { %5095 = vperm.xlu2 %6613, %v4972_v1  }
 0xfbb   :  { %5314 = vperm.xlu2 %6613, %v5117_v3  }
 0xfc3   :  { %5309 = vperm.xlu2 %6613, %v5116_v5  }
 0xfcb   :  { %5304 = vperm.xlu2 %6613, %v5115_v52  }
0x1011   :  { %v1841_v53 = vpop.f32.mrf.mxu0 }
0x1012   :  { %v1842_v55 = vadd.f32 %v1841_v53, %v7045_v10  ;;  %v1746_v10 = vpop.f32.mrf.mxu2 }
0x1013   :  { %v1782_v18 = vadd.f32 %v1781_v22, %v1746_v10 }
0x1014   :  { %v1844_v57 = vsel %vm283_vm7, %v1842_v55, -inf }
0x1015   :  { %v1845_v60 = vrot.slane %v1844_v57, 4  ;;  %v1871_v19 = vrot.slane %v1782_v18, 4 }
0x1017   :  { %v1846_v62 = vmax.f32 %v1844_v57, %v1845_v60  ;;  %v1872_v38 = vsel %vm415_vm8, %v1870_v26, %v1871_v19 }
0x1019   :  { %v1847_v54 = vrot.slane %v1846_v62, 2 }
0x101a   :  { %v1749_v24 = vpop.f32.mrf.mxu2 }
0x101b   :  { %v1848_v56 = vmax.f32 %v1846_v62, %v1847_v54  ;;  %v1785_v39 = vadd.f32 %v1784_v25, %v1749_v24  ;;  %v1960_v62 = vld [vmem:[%s9286_s2 + $0x638] sm:$0xff]  ;;  %v1961_v54 = vld [vmem:[%s9286_s2 + $0x640] sm:$0xff] }
0x101d   :  { %v1849_v58 = vrot.slane %v1848_v56, 1  ;;  %v1873_v32 = vrot.slane %v1785_v39, 4 }
0x101f   :  { %v1850_v59 = vmax.f32 %v1848_v56, %v1849_v58  ;;  %v1874_v44 = vsel %vm415_vm8, %v1871_v19, %v1873_v32  ;;  %v1962_v56 = vld [vmem:[%s9286_s2 + $0x648] sm:$0xff]  ;;  %v1963_v58 = vld [vmem:[%s9286_s2 + $0x650] sm:$0xff]  ;;  %v2097_v32 = vld [vmem:[%s9286_s2 + $0x678] sm:$0xff] }
0x1021   :  { %v1851_v12 = vsub.f32 %v1842_v55, %v1850_v59  ;;  %v1964_v59 = vld [vmem:[%s9286_s2 + $0x658] sm:$0xff] }
0x1023   :  { %v1852_v13 = vmul.f32 1.442695, %v1851_v12  ;;  %v1965_v12 = vld [vmem:[%s9286_s2 + $0x660] sm:$0xff] }
0x1025   :  { %6621 = vpow2.f32 %v1852_v13 }
0x102b   :  { %v6622_v14 = vpop.eup %6621 }
0x102c   :  { %v1854_v8 = vsel %vm283_vm7, %v6622_v14, 0.0 }
0x102d   :  { %v1855_v15 = vrot.slane %v1854_v8, 4 }
0x102f   :  { %v1856_v16 = vadd.f32 %v1855_v15, %v1854_v8 }
0x1031   :  { %v1857_v20 = vrot.slane %v1856_v16, 2 }
0x1033   :  { %v1858_v21 = vadd.f32 %v1857_v20, %v1856_v16 }
0x1035   :  { %v1859_v17 = vrot.slane %v1858_v21, 1 }
0x1037   :  { %v1860_v27 = vadd.f32 %v1859_v17, %v1858_v21  ;;  %v2091_v17 = vpop.permute.xlu1 %2090 }
0x1039   :  { %6623 = vrcp.f32 %v1860_v27 }
0x103f   :  { %v6624_v23 = vpop.eup %6623  ;;  %v2086_v25 = vpop.permute.xlu1 %2085 }
0x1040   :  { %v1862_v36 = vmul.f32 %v6624_v23, %v6622_v14 }
0x1042   :  { %1894 = vmatpush.msrb.mxu1 %v1862_v36 }
0x1043   :  { %6245 = vmatmul.msk.f32.vlgmr.msrb.gmra.mxu1 %vm780_vm13, %v1872_v38 }
0x1044   :  { %2039 = vmatpush.msra.mxu1 %v7504_v40 }
0x1046   :  { %2040 = vmatpush.msra.mxu1 %v7510_v37 }
0x1048   :  { %2041 = vmatpush.msra.mxu1 %v7516_v43 }
0x104a   :  { %2042 = vmatpush.msra.mxu1 %v7523_v45 }
0x104b   :  { %6246 = vmatmul.msk.f32.gmra.mxu1 %vm780_vm13, %v1874_v44  ;;  %v2098_v44 = vld [vmem:[%s9286_s2 + $0x680] sm:$0xff] }
0x104c   :  { %2545 = vmatpush.msrb.mxu1 %v7410_v28 }
0x104e   :  { %2546 = vmatpush.msrb.mxu1 %v7416_v29 }
0x1050   :  { %2547 = vmatpush.msrb.mxu1 %v7426_v30 }
0x1052   :  { %2548 = vmatpush.msrb.mxu1 %v7432_v31 }
0x10c0   :  { %v1896_v46 = vpop.f32.mrf.mxu1 }
0x10c8   :  { %v1899_v48 = vpop.f32.mrf.mxu1 }
0x10c9   :  { %1928 = vmatpush.msrb.mxu2 %v1899_v48 }
0x10cb   :  { %1929 = vmatpush.msrb.mxu2 %v1896_v46 }
0x10cc   :  { %6247 = vmatmul.msk.f32.vlgmr.msrb.gmra.mxu2 %vm193_vm6, %v1863_v49  ;;  %v2228_v49 = vpop.permute.xlu1 %2227 }
0x10cd   :  { %2176 = vmatpush.msra.mxu2 %v7504_v40 }
0x10cf   :  { %2177 = vmatpush.msra.mxu2 %v7510_v37 }
0x10d1   :  { %2178 = vmatpush.msra.mxu2 %v7516_v43 }
0x10d3   :  { %2179 = vmatpush.msra.mxu2 %v7523_v45 }
0x10d4   :  { %6248 = vmatmul.msk.f32.gmra.mxu2 %vm193_vm6, %v1864_v50 }
0x10dc   :  { %6249 = vmatmul.msk.f32.gmra.mxu2 %vm193_vm6, %v1865_v51 }
0x10e4   :  { %6250 = vmatmul.msk.f32.gmra.mxu2 %vm193_vm6, %v1866_v33 }
0x114f   :  { %v1931_v34 = vpop.f32.mrf.mxu2 }
0x1150   :  { %v1948_v42 = vmul.f32 %v1946_v2, %v1931_v34 }
0x1152   :  { %v1952_v53 = vadd.f32 %v1948_v42, %v7362_v11 }
0x1154   :  { %v1956_v60 = vadd.f32 %v1952_v53, %v7362_v11  ;;  %v2238_v53 = vld [vmem:[%s9286_s2 + $0x6d8] sm:$0xff] }
0x1157   :  { %v1934_v35 = vpop.f32.mrf.mxu2 }
0x1158   :  { %v1949_v41 = vmul.f32 %v1946_v2, %v1934_v35 }
0x115a   :  { %v1953_v5 = vadd.f32 %v1949_v41, %v7358_v9 }
0x115c   :  { %v1957_v57 = vadd.f32 %v1953_v5, %v7358_v9  ;;  %v2236_v5 = vld [vmem:[%s9286_s2 + $0x6c8] sm:$0xff] }
0x115f   :  { %v1937_v0 = vpop.f32.mrf.mxu2 }
0x1160   :  { %v1950_v4 = vmul.f32 %v1946_v2, %v1937_v0 }
0x1162   :  { %v1954_v1 = vadd.f32 %v1950_v4, %v7354_v7  ;;  %v2223_v4 = vpop.permute.xlu1 %2222 }
0x1164   :  { %v1958_v55 = vadd.f32 %v1954_v1, %v7354_v7  ;;  %v2234_v1 = vld [vmem:[%s9286_s2 + $0x6b8] sm:$0xff] }
0x1167   :  { %v1940_v6 = vpop.f32.mrf.mxu2 }
0x1168   :  { %v1951_v63 = vmul.f32 %v1946_v2, %v1940_v6 }
0x116a   :  { %v1955_v3 = vadd.f32 %v1951_v63, %v7351_v61 }
0x116c   :  { %v1959_v52 = vadd.f32 %v1955_v3, %v7351_v61  ;;  %v2235_v3 = vld [vmem:[%s9286_s2 + $0x6c0] sm:$0xff] }
0x116e   :  { %1998 = vmatpush.msrb.mxu0 %v1959_v52  ;;  %v2237_v52 = vld [vmem:[%s9286_s2 + $0x6d0] sm:$0xff] }
0x1170   :  { %1999 = vmatpush.msrb.mxu0 %v1958_v55  ;;  %v2239_v55 = vld [vmem:[%s9286_s2 + $0x6e0] sm:$0xff] }
0x1172   :  { %2000 = vmatpush.msrb.mxu0 %v1957_v57 }
0x1174   :  { %2001 = vmatpush.msrb.mxu0 %v1956_v60 }
0x1175   :  { %6251 = vmatmul.msk.f32.vlgmr.msrb.gmra.mxu0 %vm283_vm7, %v1960_v62 }
0x117d   :  { %6252 = vmatmul.msk.f32.gmra.mxu0 %vm283_vm7, %v1961_v54 }
0x1185   :  { %6253 = vmatmul.msk.f32.gmra.mxu0 %vm283_vm7, %v1962_v56 }
0x118d   :  { %6254 = vmatmul.msk.f32.gmra.mxu0 %vm283_vm7, %v1963_v58 }
0x1195   :  { %6255 = vmatmul.msk.f32.gmra.mxu0 %vm283_vm7, %v1964_v59 }
0x119d   :  { %6256 = vmatmul.msk.f32.gmra.mxu0 %vm283_vm7, %v1965_v12 }
0x11f2   :  { %v2003_v13 = vpop.f32.mrf.mxu0 }
0x11f3   :  { %6257 = vmatmul.msk.f32.vlgmr.msra.gmra.mxu1 %vm283_vm7, %v2003_v13 }
0x11fa   :  { %v2006_v14 = vpop.f32.mrf.mxu0 }
0x11fb   :  { %6258 = vmatmul.msk.f32.gmra.mxu1 %vm283_vm7, %v2006_v14 }
0x1202   :  { %v2009_v8 = vpop.f32.mrf.mxu0 }
0x120a   :  { %v2012_v15 = vpop.f32.mrf.mxu0 }
0x1212   :  { %v2015_v16 = vpop.f32.mrf.mxu0 }
0x1213   :  { %6259 = vmatmul.msk.f32.vlgmr.msra.gmra.mxu3 %vm283_vm7, %v2015_v16 }
0x1214   :  { %2313 = vmatpush.msra.mxu3 %v7504_v40 }
0x1216   :  { %2314 = vmatpush.msra.mxu3 %v7510_v37 }
0x1218   :  { %2315 = vmatpush.msra.mxu3 %v7516_v43 }
0x121a   :  { %v2018_v20 = vpop.f32.mrf.mxu0  ;;  %2316 = vmatpush.msra.mxu3 %v7523_v45 }
0x121b   :  { %6260 = vmatmul.msk.f32.gmra.mxu3 %vm283_vm7, %v2018_v20 }
0x1270   :  { %v2044_v21 = vpop.f32.mrf.mxu1 }
0x1271   :  { %v2050_v27 = vadd.f32 %v2044_v21, %v2009_v8  ;;  %v2360_v21 = vpop.permute.xlu1 %2359 }
0x1278   :  { %v2047_v22 = vpop.f32.mrf.mxu1 }
0x1279   :  { %v2051_v18 = vadd.f32 %v2047_v22, %v2012_v15 }
0x1296   :  { %v2075_v10 = vpop.f32.mrf.mxu3 }
0x1297   :  { %v2081_v19 = vadd.f32 %v2075_v10, %v2050_v27 }
0x1299   :  { %v2093_v26 = vadd.f32 %v2086_v25, %v2081_v19  ;;  %v2371_v19 = vld [vmem:[%s9286_s2 + $0x6f8] sm:$0xff]  ;;  %v2374_v25 = vld [vmem:[%s9286_s2 + $0x710] sm:$0xff] }
0x129b   :  { %v2095_v39 = vmax.f32 %v2093_v26, 0.0  ;;  %v2375_v26 = vld [vmem:[%s9286_s2 + $0x718] sm:$0xff] }
0x129e   :  { %v2078_v23 = vpop.f32.mrf.mxu3 }
0x129f   :  { %v2082_v24 = vadd.f32 %v2078_v23, %v2051_v18  ;;  %v2372_v23 = vld [vmem:[%s9286_s2 + $0x700] sm:$0xff] }
0x12a1   :  { %v2094_v36 = vadd.f32 %v2091_v17, %v2082_v24  ;;  %v2365_v17 = vpop.permute.xlu2 %2364  ;;  %v2373_v24 = vld [vmem:[%s9286_s2 + $0x708] sm:$0xff] }
0x12a3   :  { %v2096_v38 = vmax.f32 %v2094_v36, 0.0  ;;  %v2376_v36 = vld [vmem:[%s9286_s2 + $0x720] sm:$0xff] }
0x12a5   :  { %2137 = vmatpush.msra.mxu0 %v2096_v38  ;;  %v2377_v38 = vld [vmem:[%s9286_s2 + $0x728] sm:$0xff] }
0x12a7   :  { %2138 = vmatpush.msra.mxu0 %v2095_v39  ;;  %v2378_v39 = vld [vmem:[%s9286_s2 + $0x730] sm:$0xff] }
0x12a8   :  { %6261 = vmatmul.msk.f32.vlgmr.msra.gmra.mxu0 %vm193_vm6, %v2097_v32  ;;  %v2379_v32 = vld [vmem:[%s9286_s2 + $0x738] sm:$0xff] }
0x12a9   :  { %2344 = vmatpush.msrb.mxu0 %v7410_v28  ;;  %v2099_v28 = vld [vmem:[%s9286_s2 + $0x688] sm:$0xff] }
0x12ab   :  { %2345 = vmatpush.msrb.mxu0 %v7416_v29  ;;  %v2100_v29 = vld [vmem:[%s9286_s2 + $0x690] sm:$0xff] }
0x12ad   :  { %2346 = vmatpush.msrb.mxu0 %v7426_v30  ;;  %v2101_v30 = vld [vmem:[%s9286_s2 + $0x698] sm:$0xff] }
0x12af   :  { %2347 = vmatpush.msrb.mxu0 %v7432_v31  ;;  %v2102_v31 = vld [vmem:[%s9286_s2 + $0x6a0] sm:$0xff] }
0x12b0   :  { %6262 = vmatmul.msk.f32.gmra.mxu0 %vm193_vm6, %v2098_v44  ;;  %v2380_v44 = vld [vmem:[%s9286_s2 + $0x740] sm:$0xff] }
0x12b1   :  { %2500 = vmatpush.msra.mxu0 %v7504_v40 }
0x12b3   :  { %2501 = vmatpush.msra.mxu0 %v7510_v37 }
0x12b5   :  { %2502 = vmatpush.msra.mxu0 %v7516_v43 }
0x12b7   :  { %2503 = vmatpush.msra.mxu0 %v7523_v45 }
0x12b8   :  { %6263 = vmatmul.msk.f32.gmra.mxu0 %vm193_vm6, %v2099_v28  ;;  %v2381_v28 = vld [vmem:[%s9286_s2 + $0x748] sm:$0xff] }
0x12c0   :  { %6264 = vmatmul.msk.f32.gmra.mxu0 %vm193_vm6, %v2100_v29  ;;  %v2382_v29 = vld [vmem:[%s9286_s2 + $0x750] sm:$0xff] }
0x12c8   :  { %6265 = vmatmul.msk.f32.gmra.mxu0 %vm193_vm6, %v2101_v30 }
0x12d0   :  { %6266 = vmatmul.msk.f32.gmra.mxu0 %vm193_vm6, %v2102_v31 }
0x1325   :  { %v2140_v40 = vpop.f32.mrf.mxu0 }
0x1326   :  { %6267 = vmatmul.msk.f32.vlgmr.msra.gmra.mxu2 %vm283_vm7, %v2140_v40 }
0x132d   :  { %v2143_v37 = vpop.f32.mrf.mxu0 }
0x132e   :  { %6268 = vmatmul.msk.f32.gmra.mxu2 %vm283_vm7, %v2143_v37 }
0x1335   :  { %v2146_v43 = vpop.f32.mrf.mxu0 }
0x133d   :  { %v2149_v45 = vpop.f32.mrf.mxu0 }
0x1345   :  { %v2152_v46 = vpop.f32.mrf.mxu0 }
0x1346   :  { %6269 = vmatmul.msk.f32.vlgmr.msrb.gmra.mxu3 %vm283_vm7, %v2152_v46 }
0x134d   :  { %v2155_v47 = vpop.f32.mrf.mxu0 }
0x134e   :  { %6270 = vmatmul.msk.f32.gmra.mxu3 %vm283_vm7, %v2155_v47 }
0x13a9   :  { %v2181_v48 = vpop.f32.mrf.mxu2 }
0x13aa   :  { %v2187_v33 = vadd.f32 %v2181_v48, %v2146_v43 }
0x13b1   :  { %v2184_v51 = vpop.f32.mrf.mxu2 }
0x13b2   :  { %v2188_v34 = vadd.f32 %v2184_v51, %v2149_v45 }
0x13c9   :  { %v2212_v50 = vpop.f32.mrf.mxu3 }
0x13ca   :  { %v2218_v35 = vadd.f32 %v2212_v50, %v2187_v33 }
0x13cc   :  { %v2230_v6 = vadd.f32 %v2223_v4, %v2218_v35 }
0x13ce   :  { %v2232_v42 = vmax.f32 %v2230_v6, 0.0 }
0x13d1   :  { %v2215_v0 = vpop.f32.mrf.mxu3 }
0x13d2   :  { %v2219_v2 = vadd.f32 %v2215_v0, %v2188_v34  ;;  %v2569_v34 = vpop.permute.xlu1 %2568 }
0x13d4   :  { %v2231_v41 = vadd.f32 %v2228_v49, %v2219_v2 }
0x13d6   :  { %v2233_v63 = vmax.f32 %v2231_v41, 0.0 }
0x13d8   :  { %2274 = vmatpush.msrb.mxu2 %v2233_v63 }
0x13da   :  { %2275 = vmatpush.msrb.mxu2 %v2232_v42  ;;  %v2574_v63 = vpop.permute.xlu1 %2573 }
0x13db   :  { %6271 = vmatmul.msk.f32.vlgmr.msrb.gmra.mxu2 %vm193_vm6, %v2234_v1 }
0x13e3   :  { %6272 = vmatmul.msk.f32.gmra.mxu2 %vm193_vm6, %v2235_v3 }
0x13eb   :  { %6273 = vmatmul.msk.f32.gmra.mxu2 %vm193_vm6, %v2236_v5 }
0x13f3   :  { %6274 = vmatmul.msk.f32.gmra.mxu2 %vm193_vm6, %v2237_v52 }
0x13fb   :  { %6275 = vmatmul.msk.f32.gmra.mxu2 %vm193_vm6, %v2238_v53 }
0x1403   :  { %6276 = vmatmul.msk.f32.gmra.mxu2 %vm193_vm6, %v2239_v55 }
0x145e   :  { %v2277_v57 = vpop.f32.mrf.mxu2 }
0x145f   :  { %6277 = vmatmul.msk.f32.vlgmr.msra.gmra.mxu3 %vm283_vm7, %v2277_v57 }
0x1466   :  { %v2280_v60 = vpop.f32.mrf.mxu2 }
0x1467   :  { %6278 = vmatmul.msk.f32.gmra.mxu3 %vm283_vm7, %v2280_v60 }
0x146e   :  { %v2283_v62 = vpop.f32.mrf.mxu2 }
0x1476   :  { %v2286_v54 = vpop.f32.mrf.mxu2 }
0x147e   :  { %v2289_v56 = vpop.f32.mrf.mxu2 }
0x147f   :  { %6279 = vmatmul.msk.f32.vlgmr.msrb.gmra.mxu0 %vm283_vm7, %v2289_v56 }
0x1486   :  { %v2292_v58 = vpop.f32.mrf.mxu2 }
0x1487   :  { %6280 = vmatmul.msk.f32.gmra.mxu0 %vm283_vm7, %v2292_v58 }
0x14e2   :  { %v2318_v59 = vpop.f32.mrf.mxu3 }
0x14e3   :  { %v2324_v14 = vadd.f32 %v2318_v59, %v2283_v62  ;;  %v2579_v62 = vpop.permute.xlu1 %2578 }
0x14ea   :  { %v2321_v13 = vpop.f32.mrf.mxu3 }
0x14eb   :  { %v2325_v8 = vadd.f32 %v2321_v13, %v2286_v54 }
0x14fc   :  { %v2349_v12 = vpop.f32.mrf.mxu0 }
0x14fd   :  { %v2355_v15 = vadd.f32 %v2349_v12, %v2324_v14 }
0x14ff   :  { %v2367_v10 = vadd.f32 %v2360_v21, %v2355_v15  ;;  %v2584_v15 = vpop.permute.xlu1 %2583 }
0x1501   :  { %v2369_v18 = vmax.f32 %v2367_v10, 0.0  ;;  %v2635_v10 = vld [vmem:[%s9287_s3 + $0x68] sm:$0xff] }
0x1504   :  { %v2352_v16 = vpop.f32.mrf.mxu0 }
0x1505   :  { %v2356_v20 = vadd.f32 %v2352_v16, %v2325_v8 }
0x1507   :  { %v2368_v22 = vadd.f32 %v2365_v17, %v2356_v20  ;;  %v2637_v17 = vld [vmem:[%s9287_s3 + $0x78] sm:$0xff] }
0x1508   :  { %2692 = vmatpush.msrb.mxu0 %v2637_v17  ;;  %v7990_v17 = vld [vmem:[%s9286_s2 + $0x218] sm:$0xff] }
0x1509   :  { %v2370_v27 = vmax.f32 %v2368_v22, 0.0  ;;  %v2633_v22 = vld [vmem:[%s9287_s3 + $0x58] sm:$0xff] }
0x150a   :  { %2693 = vmatpush.msrb.mxu0 %v2635_v10  ;;  %v8010_v10 = vld [vmem:[%s9286_s2 + $0x208] sm:$0xff] }
0x150b   :  { %2437 = vmatpush.msrb.mxu3 %v2370_v27  ;;  %v2630_v27 = vld [vmem:[%s9287_s3 + $0x40] sm:$0xff] }
0x150c   :  { %2694 = vmatpush.msrb.mxu0 %v2633_v22  ;;  %v8034_v22 = vld [vmem:[%s9286_s2 + $0x1f8] sm:$0xff] }
0x150d   :  { %2438 = vmatpush.msrb.mxu3 %v2369_v18  ;;  %v2631_v18 = vld [vmem:[%s9287_s3 + $0x48] sm:$0xff] }
0x150e   :  { %6281 = vmatmul.msk.f32.vlgmr.msrb.gmra.mxu3 %vm193_vm6, %v2371_v19  ;;  %2695 = vmatpush.msrb.mxu0 %v2631_v18  ;;  %v3740_v19 = vld [vmem:[%s9286_s2 + $0x828] sm:$0xff]  ;;  %v8046_v18 = vld [vmem:[%s9286_s2 + $0x290] sm:$0xff] }
0x1516   :  { %6282 = vmatmul.msk.f32.gmra.mxu3 %vm193_vm6, %v2372_v23  ;;  %v5114_v23 = vld [vmem:[%s9286_s2 + $0xa58] sm:$0xff] }
0x151e   :  { %6283 = vmatmul.msk.f32.gmra.mxu3 %vm193_vm6, %v2373_v24 }
0x1526   :  { %6284 = vmatmul.msk.f32.gmra.mxu3 %vm193_vm6, %v2374_v25 }
0x152e   :  { %6285 = vmatmul.msk.f32.gmra.mxu3 %vm193_vm6, %v2375_v26 }
0x1536   :  { %6286 = vmatmul.msk.f32.gmra.mxu3 %vm193_vm6, %v2376_v36 }
0x153e   :  { %6287 = vmatmul.msk.f32.gmra.mxu3 %vm193_vm6, %v2377_v38 }
0x1546   :  { %6288 = vmatmul.msk.f32.gmra.mxu3 %vm193_vm6, %v2378_v39 }
0x154e   :  { %6289 = vmatmul.msk.f32.gmra.mxu3 %vm193_vm6, %v2379_v32 }
0x1556   :  { %6290 = vmatmul.msk.f32.gmra.mxu3 %vm193_vm6, %v2380_v44 }
0x155e   :  { %6291 = vmatmul.msk.f32.gmra.mxu3 %vm193_vm6, %v2381_v28 }
0x1566   :  { %6292 = vmatmul.msk.f32.gmra.mxu3 %vm193_vm6, %v2382_v29 }
0x1591   :  { %v2440_v30 = vpop.f32.mrf.mxu3 }
0x1592   :  { %6293 = vmatmul.msk.f32.vlgmr.msra.gmra.mxu0 %vm283_vm7, %v2440_v30  ;;  %v7775_v30 = vld [vmem:[%s9287_s3 + $0x30] sm:$0xff] }
0x1599   :  { %v2443_v31 = vpop.f32.mrf.mxu3 }
0x159a   :  { %6294 = vmatmul.msk.f32.gmra.mxu0 %vm283_vm7, %v2443_v31  ;;  %v7780_v31 = vld [vmem:[%s9287_s3 + $0x20] sm:$0xff] }
0x15a1   :  { %v2446_v40 = vpop.f32.mrf.mxu3 }
0x15a2   :  { %6295 = vmatmul.msk.f32.gmra.mxu0 %vm283_vm7, %v2446_v40 }
0x15a9   :  { %v2449_v37 = vpop.f32.mrf.mxu3 }
0x15aa   :  { %6296 = vmatmul.msk.f32.gmra.mxu0 %vm283_vm7, %v2449_v37 }
0x15b1   :  { %v2452_v43 = vpop.f32.mrf.mxu3 }
0x15b9   :  { %v2455_v45 = vpop.f32.mrf.mxu3 }
0x15c1   :  { %v2458_v46 = vpop.f32.mrf.mxu3 }
0x15c9   :  { %v2461_v47 = vpop.f32.mrf.mxu3 }
0x15d1   :  { %v2464_v48 = vpop.f32.mrf.mxu3 }
0x15d2   :  { %6297 = vmatmul.msk.f32.vlgmr.msrb.gmra.mxu1 %vm283_vm7, %v2464_v48  ;;  %v7798_v48 = vld [vmem:[%s9287_s3 + $0x38] sm:$0xff] }
0x15d9   :  { %v2467_v49 = vpop.f32.mrf.mxu3 }
0x15da   :  { %6298 = vmatmul.msk.f32.gmra.mxu1 %vm283_vm7, %v2467_v49 }
0x15e1   :  { %v2470_v50 = vpop.f32.mrf.mxu3 }
0x15e2   :  { %6299 = vmatmul.msk.f32.gmra.mxu1 %vm283_vm7, %v2470_v50 }
0x15e9   :  { %v2473_v51 = vpop.f32.mrf.mxu3 }
0x15ea   :  { %6300 = vmatmul.msk.f32.gmra.mxu1 %vm283_vm7, %v2473_v51  ;;  %v7804_v51 = vld [vmem:[%s9286_s2 + $0x2f8] sm:$0x3] }
0x160f   :  { %v2505_v33 = vpop.f32.mrf.mxu0 }
0x1610   :  { %v2517_v35 = vadd.f32 %v2505_v33, %v2452_v43  ;;  %v7786_v43 = vld [vmem:[%s9287_s3 + $0x10] sm:$0xff]  ;;  %v7809_v33 = vld [vmem:[%s9287_s3 + $0x28] sm:$0xff] }
0x1617   :  { %v2508_v0 = vpop.f32.mrf.mxu0 }
0x1618   :  { %v2518_v42 = vadd.f32 %v2508_v0, %v2455_v45 }
0x161f   :  { %v2511_v52 = vpop.f32.mrf.mxu0 }
0x1620   :  { %v2519_v57 = vadd.f32 %v2511_v52, %v2458_v46  ;;  %v7792_v46 = vld [vmem:[%s9287_s3] sm:$0xff] }
0x1621   :  { %v7857_v52 = vld [vmem:[%s9286_s2 + $0x260] sm:$0xff] }
0x1627   :  { %v2514_v59 = vpop.f32.mrf.mxu0 }
0x1628   :  { %v2520_v13 = vadd.f32 %v2514_v59, %v2461_v47  ;;  %v7913_v59 = vld [vmem:[%s9286_s2 + $0x2c8] sm:$0xff] }
0x164f   :  { %v2550_v2 = vpop.f32.mrf.mxu1 }
0x1650   :  { %v2562_v4 = vadd.f32 %v2550_v2, %v2517_v35  ;;  %v7815_v35 = vld [vmem:[%s9287_s3 + $0x18] sm:$0xff]  ;;  %v7823_v2 = vld [vmem:[%s9287_s3 + $0x8] sm:$0xff] }
0x1652   :  { %v2586_v6 = vadd.f32 %v2569_v34, %v2562_v4 }
0x1654   :  { %v2590_v41 = vmax.f32 %v2586_v6, 0.0 }
0x1656   :  { %v2594_v1 = vadd.f32 %v2590_v41, %v7362_v11  ;;  %v2807_v41 = vld [vmem:[%s9287_s3 + $0xb0] sm:$0xff] }
0x1657   :  { %v2553_v3 = vpop.f32.mrf.mxu1 }
0x1658   :  { %v2563_v5 = vadd.f32 %v2553_v3, %v2518_v42  ;;  %2598 = vxpose.xlu1.b32.start [1/4] (short) (narrow) %v2594_v1, 32  ;;  %v7838_v42 = vld [vmem:[%s9286_s2 + $0x270] sm:$0xff]  ;;  %v7843_v1 = vld [vmem:[%s9286_s2 + $0x268] sm:$0xff] }
0x1659   :  { %v7849_v3 = vld [vmem:[%s9286_s2 + $0x2f0] sm:$0xff] }
0x165a   :  { %v2587_v53 = vadd.f32 %v2574_v63, %v2563_v5  ;;  %v2805_v63 = vld [vmem:[%s9287_s3 + $0xa0] sm:$0xff]  ;;  %v2803_v5 = vld [vmem:[%s9287_s3 + $0x90] sm:$0xff]  ;;  %2781 = vmatpush.msra.mxu0 %v7849_v3  ;;  %2937 = vmatpush.msra.mxu3 %v7849_v3 }
0x165c   :  { %v2591_v55 = vmax.f32 %v2587_v53, 0.0  ;;  %v7863_v53 = vld [vmem:[%s9286_s2 + $0x2e8] sm:$0xff] }
0x165d   :  { %2782 = vmatpush.msra.mxu0 %v7863_v53  ;;  %2938 = vmatpush.msra.mxu3 %v7863_v53 }
0x165e   :  { %v2595_v60 = vadd.f32 %v2591_v55, %v7358_v9  ;;  %v2636_v9 = vld [vmem:[%s9287_s3 + $0x70] sm:$0xff]  ;;  %v7870_v55 = vld [vmem:[%s9286_s2 + $0x2e0] sm:$0xff] }
0x165f   :  { %v2556_v54 = vpop.f32.mrf.mxu1  ;;  %2663 = vmatpush.msra.mxu2 %v2636_v9  ;;  %2783 = vmatpush.msra.mxu0 %v7870_v55  ;;  %v7984_v9 = vld [vmem:[%s9286_s2 + $0x2a0] sm:$0xff] }
0x1660   :  { %v2564_v56 = vadd.f32 %v2556_v54, %v2519_v57  ;;  %2599 = vxpose.xlu1.b32.cont [2/4] (short) (narrow) %v2595_v60, 32  ;;  %v2801_v57 = vld [vmem:[%s9287_s3 + $0x80] sm:$0xff]  ;;  %v7878_v60 = vld [vmem:[%s9286_s2 + $0x258] sm:$0xff]  ;;  %v7891_v54 = vld [vmem:[%s9286_s2 + $0x250] sm:$0xff]  ;;  %2939 = vmatpush.msra.mxu3 %v7870_v55 }
0x1662   :  { %v2588_v58 = vadd.f32 %v2579_v62, %v2564_v56  ;;  %v7886_v62 = vld [vmem:[%s9286_s2 + $0x2d8] sm:$0xff]  ;;  %v7899_v56 = vld [vmem:[%s9286_s2 + $0x2d0] sm:$0xff] }
0x1663   :  { %2784 = vmatpush.msra.mxu0 %v7886_v62  ;;  %2940 = vmatpush.msra.mxu3 %v7886_v62 }
0x1664   :  { %v2592_v12 = vmax.f32 %v2588_v58, 0.0  ;;  %v7906_v58 = vld [vmem:[%s9286_s2 + $0x248] sm:$0xff] }
0x1665   :  { %2785 = vmatpush.msra.mxu0 %v7899_v56  ;;  %2941 = vmatpush.msra.mxu3 %v7899_v56 }
0x1666   :  { %v2596_v14 = vadd.f32 %v2592_v12, %v7354_v7  ;;  %v2634_v7 = vld [vmem:[%s9287_s3 + $0x60] sm:$0xff] }
0x1667   :  { %v2559_v11 = vpop.f32.mrf.mxu1  ;;  %2664 = vmatpush.msra.mxu2 %v2634_v7  ;;  %v7919_v12 = vld [vmem:[%s9286_s2 + $0x240] sm:$0xff]  ;;  %2786 = vmatpush.msra.mxu0 %v7913_v59  ;;  %v7999_v7 = vld [vmem:[%s9286_s2 + $0x210] sm:$0xff] }
0x1668   :  { %v2565_v8 = vadd.f32 %v2559_v11, %v2520_v13  ;;  %2600 = vxpose.xlu1.b32.cont [3/4] (short) (narrow) %v2596_v14, 32  ;;  %v7927_v13 = vld [vmem:[%s9286_s2 + $0x2c0] sm:$0xff]  ;;  %v7933_v14 = vld [vmem:[%s9286_s2 + $0x238] sm:$0xff]  ;;  %2942 = vmatpush.msra.mxu3 %v7913_v59 }
0x1669   :  { %v7941_v11 = vld [vmem:[%s9286_s2 + $0x2b8] sm:$0xff]  ;;  %2787 = vmatpush.msra.mxu0 %v7927_v13 }
0x166a   :  { %v2589_v16 = vadd.f32 %v2584_v15, %v2565_v8  ;;  %v7947_v8 = vld [vmem:[%s9286_s2 + $0x230] sm:$0xff]  ;;  %2943 = vmatpush.msra.mxu3 %v7927_v13 }
0x166b   :  { %v7955_v15 = vld [vmem:[%s9286_s2 + $0x2b0] sm:$0xff]  ;;  %2788 = vmatpush.msra.mxu0 %v7941_v11 }
0x166c   :  { %v2593_v20 = vmax.f32 %v2589_v16, 0.0  ;;  %v7963_v16 = vld [vmem:[%s9286_s2 + $0x228] sm:$0xff]  ;;  %2944 = vmatpush.msra.mxu3 %v7941_v11 }
0x166d   :  { %2789 = vmatpush.msra.mxu0 %v7955_v15 }
0x166e   :  { %v2597_v21 = vadd.f32 %v2593_v20, %v7351_v61  ;;  %v2632_v61 = vld [vmem:[%s9287_s3 + $0x50] sm:$0xff]  ;;  %v7970_v20 = vld [vmem:[%s9286_s2 + $0x2a8] sm:$0xff]  ;;  %2945 = vmatpush.msra.mxu3 %v7955_v15 }
0x166f   :  { %2665 = vmatpush.msra.mxu2 %v2632_v61  ;;  %2790 = vmatpush.msra.mxu0 %v7970_v20  ;;  %v8018_v61 = vld [vmem:[%s9286_s2 + $0x200] sm:$0xff] }
0x1670   :  { %2601 = vxpose.xlu1.b32.end [4/4] (short) (narrow) %v2597_v21, 32  ;;  %v7976_v21 = vld [vmem:[%s9286_s2 + $0x220] sm:$0xff]  ;;  %2946 = vmatpush.msra.mxu3 %v7970_v20 }
0x1671   :  { %2666 = vmatpush.msra.mxu2 %v2630_v27  ;;  %2791 = vmatpush.msra.mxu0 %v7984_v9  ;;  %v8039_v27 = vld [vmem:[%s9286_s2 + $0x298] sm:$0xff] }
0x1672   :  { %2947 = vmatpush.msra.mxu3 %v7984_v9 }
0x1673   :  { %2761 = vmatpush.msrb.mxu2 %v7838_v42  ;;  %2792 = vmatpush.msra.mxu0 %v8039_v27 }
0x1674   :  { %2948 = vmatpush.msra.mxu3 %v8039_v27 }
0x1675   :  { %2762 = vmatpush.msrb.mxu2 %v7843_v1  ;;  %2793 = vmatpush.msra.mxu0 %v8046_v18 }
0x1676   :  { %2949 = vmatpush.msra.mxu3 %v8046_v18 }
0x1677   :  { %2763 = vmatpush.msrb.mxu2 %v7857_v52 }
0x1679   :  { %2764 = vmatpush.msrb.mxu2 %v7878_v60 }
0x167b   :  { %2765 = vmatpush.msrb.mxu2 %v7891_v54 }
0x167d   :  { %2766 = vmatpush.msrb.mxu2 %v7906_v58 }
0x167f   :  { %2767 = vmatpush.msrb.mxu2 %v7919_v12 }
0x1681   :  { %2768 = vmatpush.msrb.mxu2 %v7933_v14 }
0x1683   :  { %2769 = vmatpush.msrb.mxu2 %v7947_v8 }
0x1685   :  { %2770 = vmatpush.msrb.mxu2 %v7963_v16 }
0x1687   :  { %2771 = vmatpush.msrb.mxu2 %v7976_v21 }
0x1689   :  { %2772 = vmatpush.msrb.mxu2 %v7990_v17 }
0x168b   :  { %2773 = vmatpush.msrb.mxu2 %v7999_v7 }
0x168d   :  { %2774 = vmatpush.msrb.mxu2 %v8010_v10 }
0x168f   :  { %2775 = vmatpush.msrb.mxu2 %v8018_v61 }
0x1691   :  { %2776 = vmatpush.msrb.mxu2 %v8034_v22 }
0x16ca   :  { %3859 = vperm.xlu1 %6612, %v3740_v19   ;;  %v2808_v19 = vld [vmem:[%s9287_s3 + $0xb8] sm:$0xff] }
0x16d2   :  { %5299 = vperm.xlu1 %6612, %v5114_v23   ;;  %v8054_v23 = vld [vmem:[%s9286_s2 + $0x288] sm:$0xff] }
0x16d3   :  { %2794 = vmatpush.msra.mxu0 %v8054_v23  ;;  %2950 = vmatpush.msra.mxu3 %v8054_v23 }
0x16fc   :  { %v7748_v24 = vpop.trf.xlu1 }
0x16fd   :  { %6301 = vmatmul.msk.f32.vlgmr.msra.gmra.mxu2 %vm283_vm7, %v7748_v24  ;;  %6305 = vmatmul.msk.f32.vlgmr.msrb.gmra.mxu0 %vm283_vm7, %v7748_v24 }
0x16fe   :  { %2851 = vmatpush.msra.mxu2 %v2808_v19 }
0x1704   :  { %v7754_v25 = vpop.trf.xlu1 }
0x1705   :  { %6302 = vmatmul.msk.f32.gmra.mxu2 %vm283_vm7, %v7754_v25  ;;  %6306 = vmatmul.msk.f32.gmra.mxu0 %vm283_vm7, %v7754_v25 }
0x170c   :  { %v7760_v26 = vpop.trf.xlu1 }
0x170d   :  { %6303 = vmatmul.msk.f32.gmra.mxu2 %vm283_vm7, %v7760_v26  ;;  %6307 = vmatmul.msk.f32.gmra.mxu0 %vm283_vm7, %v7760_v26 }
0x1714   :  { %v7766_v36 = vpop.trf.xlu1 }
0x1715   :  { %6304 = vmatmul.msk.f32.gmra.mxu2 %vm283_vm7, %v7766_v36  ;;  %6308 = vmatmul.msk.f32.gmra.mxu0 %vm283_vm7, %v7766_v36 }
0x177a   :  { %v2697_v38 = vpop.f32.mrf.mxu0 }
0x177b   :  { %v2710_v6 = vmul.f32 %v2697_v38, %v7823_v2  ;;  %v2806_v38 = vld [vmem:[%s9287_s3 + $0xa8] sm:$0xff] }
0x177c   :  { %2852 = vmatpush.msra.mxu2 %v2806_v38 }
0x1780   :  { %v2668_v39 = vpop.f32.mrf.mxu2 }
0x1781   :  { %v2709_v50 = vmul.f32 %v2668_v39, %v7792_v46  ;;  %v2804_v39 = vld [vmem:[%s9287_s3 + $0x98] sm:$0xff] }
0x1782   :  { %v2700_v44 = vpop.f32.mrf.mxu0  ;;  %2853 = vmatpush.msra.mxu2 %v2804_v39 }
0x1783   :  { %v2712_v4 = vmul.f32 %v2700_v44, %v7815_v35  ;;  %v8079_v44 = vld [vmem:[%s9286_s2 + $0x278] sm:$0xff] }
0x1788   :  { %v2671_v32 = vpop.f32.mrf.mxu2 }
0x1789   :  { %v2711_v47 = vmul.f32 %v2671_v32, %v7786_v43  ;;  %v8068_v32 = vld [vmem:[%s9286_s2 + $0x280] sm:$0xff] }
0x178a   :  { %v2703_v29 = vpop.f32.mrf.mxu0  ;;  %2795 = vmatpush.msra.mxu0 %v8068_v32  ;;  %2951 = vmatpush.msra.mxu3 %v8068_v32 }
0x178b   :  { %v2714_v0 = vmul.f32 %v2703_v29, %v7809_v33 }
0x178c   :  { %2796 = vmatpush.msra.mxu0 %v8079_v44  ;;  %2952 = vmatpush.msra.mxu3 %v8079_v44 }
0x1790   :  { %v2674_v28 = vpop.f32.mrf.mxu2 }
0x1791   :  { %v2713_v45 = vmul.f32 %v2674_v28, %v7780_v31  ;;  %v2802_v28 = vld [vmem:[%s9287_s3 + $0x88] sm:$0xff] }
0x1792   :  { %v2706_v49 = vpop.f32.mrf.mxu0  ;;  %2854 = vmatpush.msra.mxu2 %v2802_v28 }
0x1793   :  { %v2716_v34 = vmul.f32 %v2706_v49, %v7798_v48 }
0x1798   :  { %v2677_v40 = vpop.f32.mrf.mxu2 }
0x1799   :  { %v2715_v37 = vmul.f32 %v2677_v40, %v7775_v30 }
0x179b   :  { %2732 = vmatpush.msra.mxu1 %v2715_v37 }
0x179d   :  { %2733 = vmatpush.msra.mxu1 %v2713_v45 }
0x179f   :  { %2734 = vmatpush.msra.mxu1 %v2711_v47 }
0x17a1   :  { %2735 = vmatpush.msra.mxu1 %v2709_v50 }
0x17a2   :  { %6309 = vmatmul.msk.f32.vlgmr.msra.gmra.mxu1 %vm283_vm7, %v7804_v51 }
0x17a3   :  { %2752 = vmatpush.msrb.mxu1 %v2716_v34 }
0x17a5   :  { %2753 = vmatpush.msrb.mxu1 %v2714_v0 }
0x17a7   :  { %2754 = vmatpush.msrb.mxu1 %v2712_v4 }
0x17a9   :  { %2755 = vmatpush.msrb.mxu1 %v2710_v6 }
0x17aa   :  { %6310 = vmatmul.msk.f32.vlgmr.msrb.gmra.mxu1 %vm283_vm7, %v7804_v51 }
0x17ab   :  { %2822 = vmatpush.msra.mxu1 %v2807_v41 }
0x17ad   :  { %2823 = vmatpush.msra.mxu1 %v2805_v63 }
0x17af   :  { %2824 = vmatpush.msra.mxu1 %v2803_v5  ;;  %v6615_v5 = vld [vmem:[%s9286_s2 + $0x448] ss:$0 sm:$0xff] }
0x17b1   :  { %2825 = vmatpush.msra.mxu1 %v2801_v57  ;;  %v6616_v57 = vld [vmem:[%s9286_s2 + $0x450] ss:$0 sm:$0xff] }
0x17b2   :  { %6311 = vmatmul.msk.f32.vlgmr.msra.gmra.mxu1 %vm283_vm7, %v7748_v24 }
0x17b3   :  { %2917 = vmatpush.msrb.mxu1 %v7838_v42 }
0x17b5   :  { %2918 = vmatpush.msrb.mxu1 %v7843_v1 }
0x17b7   :  { %2919 = vmatpush.msrb.mxu1 %v7857_v52 }
0x17b9   :  { %2920 = vmatpush.msrb.mxu1 %v7878_v60 }
0x17ba   :  { %6312 = vmatmul.msk.f32.gmra.mxu1 %vm283_vm7, %v7754_v25 }
0x17bb   :  { %2921 = vmatpush.msrb.mxu1 %v7891_v54 }
0x17bd   :  { %2922 = vmatpush.msrb.mxu1 %v7906_v58 }
0x17bf   :  { %2923 = vmatpush.msrb.mxu1 %v7919_v12 }
0x17c1   :  { %2924 = vmatpush.msrb.mxu1 %v7933_v14 }
0x17c2   :  { %6313 = vmatmul.msk.f32.gmra.mxu1 %vm283_vm7, %v7760_v26 }
0x17c3   :  { %2925 = vmatpush.msrb.mxu1 %v7947_v8 }
0x17c5   :  { %2926 = vmatpush.msrb.mxu1 %v7963_v16 }
0x17c7   :  { %2927 = vmatpush.msrb.mxu1 %v7976_v21 }
0x17c9   :  { %2928 = vmatpush.msrb.mxu1 %v7990_v17 }
0x17ca   :  { %6314 = vmatmul.msk.f32.gmra.mxu1 %vm283_vm7, %v7766_v36 }
0x17cb   :  { %2929 = vmatpush.msrb.mxu1 %v7999_v7 }
0x17cd   :  { %2930 = vmatpush.msrb.mxu1 %v8010_v10 }
0x17cf   :  { %2931 = vmatpush.msrb.mxu1 %v8018_v61 }
0x17d1   :  { %2932 = vmatpush.msrb.mxu1 %v8034_v22 }
0x17d3   :  { %6354 = vmatpush.msk.msra.mxu1 %vm556_vm10, %v7804_v51 }
0x181f   :  { %v2737_v29 = vpop.f32.mrf.mxu1 }
0x1820   :  { %2777 = vmatmul.f32.vlgmr.msrb.gmra.mxu2 %v2737_v29 }
0x1827   :  { %v2757_v40 = vpop.f32.mrf.mxu1 }
0x1828   :  { %2797 = vmatmul.f32.vlgmr.msra.gmra.mxu0 %v2757_v40  ;;  %6315 = vmatmul.msk.f32.vlgmr.msra.gmra.mxu2 %vm283_vm7, %v7748_v24 }
0x182f   :  { %v2827_v37 = vpop.f32.mrf.mxu1 }
0x1830   :  { %6316 = vmatmul.msk.f32.gmra.mxu2 %vm283_vm7, %v7754_v25  ;;  %v2868_v0 = vmul.f32 %v2827_v37, %v7792_v46 }
0x1837   :  { %v2830_v45 = vpop.f32.mrf.mxu1 }
0x1838   :  { %6317 = vmatmul.msk.f32.gmra.mxu2 %vm283_vm7, %v7760_v26  ;;  %v2870_v24 = vmul.f32 %v2830_v45, %v7786_v43 }
0x183f   :  { %v2833_v47 = vpop.f32.mrf.mxu1 }
0x1840   :  { %6318 = vmatmul.msk.f32.gmra.mxu2 %vm283_vm7, %v7766_v36  ;;  %v2872_v34 = vmul.f32 %v2833_v47, %v7780_v31 }
0x1847   :  { %v2836_v49 = vpop.f32.mrf.mxu1 }
0x1848   :  { %v2874_v50 = vmul.f32 %v2836_v49, %v7775_v30 }
0x184a   :  { %2888 = vmatpush.msrb.mxu0 %v2874_v50  ;;  %v2957_v50 = vld [vmem:[%s9289_s1] sm:$0x3] }
0x184c   :  { %2889 = vmatpush.msrb.mxu0 %v2872_v34 }
0x184e   :  { %2890 = vmatpush.msrb.mxu0 %v2870_v24 }
0x1850   :  { %2891 = vmatpush.msrb.mxu0 %v2868_v0 }
0x1851   :  { %6319 = vmatmul.msk.f32.vlgmr.msrb.gmra.mxu0 %vm283_vm7, %v7804_v51 }
0x18a3   :  { %v2778_v25 = vpop.f32.mrf.mxu2 }
0x18a4   :  { %v2779_v38 = vadd.f32 %v6615_v5, %v2778_v25 }
0x18a5   :  { %v2798_v41 = vpop.f32.mrf.mxu0 }
0x18a6   :  { %v2799_v40 = vadd.f32 %v2798_v41, %v2779_v38 }
0x18ab   :  { %v2856_v26 = vpop.f32.mrf.mxu2 }
0x18ac   :  { %v2869_v46 = vmul.f32 %v2856_v26, %v7823_v2 }
0x18b3   :  { %v2859_v4 = vpop.f32.mrf.mxu2 }
0x18b4   :  { %v2871_v43 = vmul.f32 %v2859_v4, %v7815_v35  ;;  %v6657_v35 = vld [vmem:[%s9286_s2 + $0x68] sm:$0xff] }
0x18bb   :  { %v2862_v36 = vpop.f32.mrf.mxu2 }
0x18bc   :  { %v2873_v31 = vmul.f32 %v2862_v36, %v7809_v33  ;;  %v6656_v33 = vld [vmem:[%s9286_s2 + $0x70] sm:$0xff] }
0x18c3   :  { %v2865_v6 = vpop.f32.mrf.mxu2 }
0x18c4   :  { %v2875_v30 = vmul.f32 %v2865_v6, %v7798_v48  ;;  %v6655_v48 = vld [vmem:[%s9286_s2 + $0x78] sm:$0xff] }
0x18c6   :  { %2908 = vmatpush.msra.mxu0 %v2875_v30 }
0x18c8   :  { %2909 = vmatpush.msra.mxu0 %v2873_v31 }
0x18ca   :  { %2910 = vmatpush.msra.mxu0 %v2871_v43 }
0x18cc   :  { %2911 = vmatpush.msra.mxu0 %v2869_v46 }
0x18cd   :  { %6320 = vmatmul.msk.f32.vlgmr.msra.gmra.mxu0 %vm283_vm7, %v7804_v51  ;;  %v6658_v51 = vld [vmem:[%s9286_s2 + $0x60] sm:$0xff] }
0x18ce   :  { %v2893_v63 = vpop.f32.mrf.mxu0 }
0x18cf   :  { %2933 = vmatmul.f32.vlgmr.msrb.gmra.mxu1 %v2893_v63 }
0x18d0   :  { %4325 = vmatpush.msrb.mxu1 %v6655_v48 }
0x18d2   :  { %4326 = vmatpush.msrb.mxu1 %v6656_v33 }
0x18d4   :  { %4327 = vmatpush.msrb.mxu1 %v6657_v35 }
0x18d6   :  { %4328 = vmatpush.msrb.mxu1 %v6658_v51  ;;  %v73_v51 = vld [vmem:[%s9286_s2 + $0x170] sm:$0xff] }
0x194a   :  { %v2913_v2 = vpop.f32.mrf.mxu0 }
0x194b   :  { %2953 = vmatmul.f32.vlgmr.msra.gmra.mxu3 %v2913_v2  ;;  %v72_v2 = vld [vmem:[%s9286_s2 + $0x168] sm:$0xff] }
0x194c   :  { %v2934_v19 = vpop.f32.mrf.mxu1 }
0x194d   :  { %v2935_v39 = vadd.f32 %v6616_v57, %v2934_v19  ;;  %v71_v19 = vld [vmem:[%s9286_s2 + $0x160] sm:$0xff] }
0x19ce   :  { %v2954_v28 = vpop.f32.mrf.mxu3 }
0x19cf   :  { %v2955_v29 = vadd.f32 %v2954_v28, %v2935_v39  ;;  %v70_v28 = vld [vmem:[%s9286_s2 + $0x158] sm:$0xff] }
0x19d1   :  { %v2958_v37 = vmul.f32 0.5, %v2955_v29  ;;  %v6081_v45 = vrot.slane %v2955_v29, 6 }
0x19d3   :  { %v2959_v47 = vmul.f32 1.442695, %v2958_v37  ;;  %v6083_v49 = vsel %vm556_vm10, %v2799_v40, %v6081_v45  ;;  %v68_v45 = vld [vmem:[%s9286_s2 + $0x148] sm:$0xff] }
0x19d4   :  { %6085 = vst.msk [vmem:[%s9288_s5] sm:$0xf] %vm6084_vm14, %v6083_v49 }
0x19d5   :  { %6625 = vpow2.f32 %v2959_v47 }
0x19db   :  { %v6626_v34 = vpop.eup %6625 }
0x19dc   :  { %v2961_v24 = vmul.f32 %v6626_v34, %v2957_v50  ;;  %v67_v50 = vld [vmem:[%s9286_s2 + $0x140] sm:$0xff] }
0x19de   :  { %v2962_v0 = vadd.f32 %v2961_v24, %v2799_v40  ;;  %v69_v40 = vld [vmem:[%s9286_s2 + $0x150] sm:$0xff]  ;;  %v66_v24 = vld [vmem:[%s9286_s2 + $0x138] sm:$0xff] }
0x19e0   :  { %6321 = vmatpush.xpose.msk.msrb.mxu0 %vm193_vm6, %v2962_v0 }
0x19e3   :  { %6322 = vmatmul.msk.f32.vlgmr.msrb.gmra.mxu0 %vm193_vm6, %v8034_v22 }
0x19eb   :  { %6323 = vmatmul.msk.f32.gmra.mxu0 %vm193_vm6, %v8018_v61 }
0x19f3   :  { %6324 = vmatmul.msk.f32.gmra.mxu0 %vm193_vm6, %v8010_v10 }
0x19fb   :  { %6325 = vmatmul.msk.f32.gmra.mxu0 %vm193_vm6, %v7999_v7 }
0x1a03   :  { %6326 = vmatmul.msk.f32.gmra.mxu0 %vm193_vm6, %v7990_v17 }
0x1a0b   :  { %6327 = vmatmul.msk.f32.gmra.mxu0 %vm193_vm6, %v7976_v21 }
0x1a13   :  { %6328 = vmatmul.msk.f32.gmra.mxu0 %vm193_vm6, %v7963_v16 }
0x1a1b   :  { %6329 = vmatmul.msk.f32.gmra.mxu0 %vm193_vm6, %v7947_v8 }
0x1a23   :  { %6330 = vmatmul.msk.f32.gmra.mxu0 %vm193_vm6, %v7933_v14 }
0x1a2b   :  { %6331 = vmatmul.msk.f32.gmra.mxu0 %vm193_vm6, %v7919_v12 }
0x1a33   :  { %6332 = vmatmul.msk.f32.gmra.mxu0 %vm193_vm6, %v7906_v58 }
0x1a3b   :  { %6333 = vmatmul.msk.f32.gmra.mxu0 %vm193_vm6, %v7891_v54 }
0x1a43   :  { %6334 = vmatmul.msk.f32.gmra.mxu0 %vm193_vm6, %v7878_v60 }
0x1a4b   :  { %6335 = vmatmul.msk.f32.gmra.mxu0 %vm193_vm6, %v7857_v52 }
0x1a53   :  { %6336 = vmatmul.msk.f32.gmra.mxu0 %vm193_vm6, %v7843_v1 }
0x1a5b   :  { %6337 = vmatmul.msk.f32.gmra.mxu0 %vm193_vm6, %v7838_v42 }
0x1a60   :  { %v3079_v12 = vpop.f32.mrf.mxu0 }
0x1a61   :  { %6355 = vmatmul.msk.f32.vlgmr.msra.gmra.mxu1 %vm3175_vm15, %v3079_v12  ;;  %v65_v12 = vld [vmem:[%s9286_s2 + $0x130] sm:$0xff] }
0x1a63   :  { %6338 = vmatmul.msk.f32.gmra.mxu0 %vm193_vm6, %v8079_v44 }
0x1a68   :  { %v3082_v54 = vpop.f32.mrf.mxu0 }
0x1a69   :  { %6356 = vmatmul.msk.f32.gmra.mxu1 %vm3175_vm15, %v3082_v54 }
0x1a6b   :  { %6339 = vmatmul.msk.f32.gmra.mxu0 %vm193_vm6, %v8068_v32 }
0x1a70   :  { %v3085_v52 = vpop.f32.mrf.mxu0 }
0x1a71   :  { %6357 = vmatmul.msk.f32.gmra.mxu1 %vm3175_vm15, %v3085_v52  ;;  %v64_v52 = vld [vmem:[%s9286_s2 + $0x128] sm:$0xff] }
0x1a73   :  { %6340 = vmatmul.msk.f32.gmra.mxu0 %vm193_vm6, %v8054_v23 }
0x1a78   :  { %v3088_v42 = vpop.f32.mrf.mxu0 }
0x1a79   :  { %6358 = vmatmul.msk.f32.gmra.mxu1 %vm3175_vm15, %v3088_v42 }
0x1a7b   :  { %6341 = vmatmul.msk.f32.gmra.mxu0 %vm193_vm6, %v8046_v18 }
0x1a80   :  { %v3091_v1 = vpop.f32.mrf.mxu0 }
0x1a81   :  { %6359 = vmatmul.msk.f32.gmra.mxu1 %vm3175_vm15, %v3091_v1 }
0x1a83   :  { %6342 = vmatmul.msk.f32.gmra.mxu0 %vm193_vm6, %v8039_v27 }
0x1a88   :  { %v3094_v60 = vpop.f32.mrf.mxu0 }
0x1a89   :  { %6360 = vmatmul.msk.f32.gmra.mxu1 %vm3175_vm15, %v3094_v60  ;;  %v63_v60 = vld [vmem:[%s9286_s2 + $0x120] sm:$0xff] }
0x1a8b   :  { %6343 = vmatmul.msk.f32.gmra.mxu0 %vm193_vm6, %v7984_v9 }
0x1a90   :  { %v3097_v58 = vpop.f32.mrf.mxu0 }
0x1a91   :  { %6361 = vmatmul.msk.f32.gmra.mxu1 %vm3175_vm15, %v3097_v58 }
0x1a93   :  { %6344 = vmatmul.msk.f32.gmra.mxu0 %vm193_vm6, %v7970_v20 }
0x1a98   :  { %v3100_v14 = vpop.f32.mrf.mxu0 }
0x1a99   :  { %6362 = vmatmul.msk.f32.gmra.mxu1 %vm3175_vm15, %v3100_v14  ;;  %v62_v14 = vld [vmem:[%s9286_s2 + $0x118] sm:$0xff] }
0x1a9b   :  { %6345 = vmatmul.msk.f32.gmra.mxu0 %vm193_vm6, %v7955_v15 }
0x1aa0   :  { %v3103_v8 = vpop.f32.mrf.mxu0 }
0x1aa1   :  { %6363 = vmatmul.msk.f32.gmra.mxu1 %vm3175_vm15, %v3103_v8 }
0x1aa3   :  { %6346 = vmatmul.msk.f32.gmra.mxu0 %vm193_vm6, %v7941_v11 }
0x1aa8   :  { %v3106_v16 = vpop.f32.mrf.mxu0 }
0x1aa9   :  { %6364 = vmatmul.msk.f32.gmra.mxu1 %vm3175_vm15, %v3106_v16  ;;  %v61_v16 = vld [vmem:[%s9286_s2 + $0x110] sm:$0xff] }
0x1aab   :  { %6347 = vmatmul.msk.f32.gmra.mxu0 %vm193_vm6, %v7927_v13 }
0x1ab0   :  { %v3109_v21 = vpop.f32.mrf.mxu0 }
0x1ab1   :  { %6365 = vmatmul.msk.f32.gmra.mxu1 %vm3175_vm15, %v3109_v21 }
0x1ab3   :  { %6348 = vmatmul.msk.f32.gmra.mxu0 %vm193_vm6, %v7913_v59 }
0x1ab8   :  { %v3112_v20 = vpop.f32.mrf.mxu0 }
0x1ab9   :  { %6366 = vmatmul.msk.f32.gmra.mxu1 %vm3175_vm15, %v3112_v20  ;;  %v60_v20 = vld [vmem:[%s9286_s2 + $0x108] sm:$0xff] }
0x1abb   :  { %6349 = vmatmul.msk.f32.gmra.mxu0 %vm193_vm6, %v7899_v56 }
0x1ac0   :  { %v3115_v15 = vpop.f32.mrf.mxu0 }
0x1ac1   :  { %6367 = vmatmul.msk.f32.gmra.mxu1 %vm3175_vm15, %v3115_v15 }
0x1ac3   :  { %6350 = vmatmul.msk.f32.gmra.mxu0 %vm193_vm6, %v7886_v62 }
0x1ac8   :  { %v3118_v11 = vpop.f32.mrf.mxu0 }
0x1ac9   :  { %6368 = vmatmul.msk.f32.gmra.mxu1 %vm3175_vm15, %v3118_v11 }
0x1acb   :  { %6351 = vmatmul.msk.f32.gmra.mxu0 %vm193_vm6, %v7870_v55 }
0x1ad0   :  { %v3121_v13 = vpop.f32.mrf.mxu0 }
0x1ad1   :  { %6369 = vmatmul.msk.f32.gmra.mxu1 %vm3175_vm15, %v3121_v13  ;;  %v59_v13 = vld [vmem:[%s9286_s2 + $0x100] sm:$0xff] }
0x1ad3   :  { %6352 = vmatmul.msk.f32.gmra.mxu0 %vm193_vm6, %v7863_v53 }
0x1ad8   :  { %v3124_v59 = vpop.f32.mrf.mxu0 }
0x1ad9   :  { %6370 = vmatmul.msk.f32.gmra.mxu1 %vm3175_vm15, %v3124_v59 }
0x1adb   :  { %6353 = vmatmul.msk.f32.gmra.mxu0 %vm193_vm6, %v7849_v3 }
0x1ade   :  { %v8213_v56 = vpop.f32.mrf.mxu1 }
0x1ae0   :  { %v3127_v62 = vpop.f32.mrf.mxu0 }
0x1ae1   :  { %6371 = vmatmul.msk.f32.gmra.mxu1 %vm3175_vm15, %v3127_v62  ;;  %v58_v62 = vld [vmem:[%s9286_s2 + $0xf8] sm:$0xff] }
0x1ae6   :  { %v8216_v9 = vpop.f32.mrf.mxu1 }
0x1ae8   :  { %v3130_v55 = vpop.f32.mrf.mxu0 }
0x1ae9   :  { %6372 = vmatmul.msk.f32.gmra.mxu1 %vm3175_vm15, %v3130_v55  ;;  %v3388_v55 = vmul.f32 %v8216_v9, %v59_v13  ;;  %v89_v9 = vld [vmem:[%s9286_s2 + $0x1f0] sm:$0xff] }
0x1aea   :  { %v3430_v13 = vld [vmem:[%s9286_s2 + $0x470] sm:$0xff] }
0x1aee   :  { %v8219_v17 = vpop.f32.mrf.mxu1 }
0x1aef   :  { %v3389_v59 = vmul.f32 %v8219_v17, %v60_v20 }
0x1af0   :  { %v3133_v7 = vpop.f32.mrf.mxu0 }
0x1af1   :  { %6373 = vmatmul.msk.f32.gmra.mxu1 %vm3175_vm15, %v3133_v7  ;;  %v3387_v7 = vmul.f32 %v8213_v56, %v58_v62  ;;  %v3419_v56 = vld [vmem:[%s9287_s3 + $0xc0] sm:$0xff]  ;;  %v3429_v62 = vld [vmem:[%s9286_s2 + $0x468] sm:$0xff] }
0x1af6   :  { %v8222_v53 = vpop.f32.mrf.mxu1 }
0x1af7   :  { %v3390_v11 = vmul.f32 %v8222_v53, %v61_v16 }
0x1af8   :  { %v3136_v10 = vpop.f32.mrf.mxu0 }
0x1af9   :  { %6374 = vmatmul.msk.f32.gmra.mxu1 %vm3175_vm15, %v3136_v10 }
0x1afe   :  { %v8225_v3 = vpop.f32.mrf.mxu1 }
0x1aff   :  { %v3391_v21 = vmul.f32 %v8225_v3, %v62_v14  ;;  %v3422_v14 = vld [vmem:[%s9287_s3 + $0xd8] sm:$0xff] }
0x1b00   :  { %v3139_v61 = vpop.f32.mrf.mxu0 }
0x1b01   :  { %6375 = vmatmul.msk.f32.gmra.mxu1 %vm3175_vm15, %v3139_v61 }
0x1b06   :  { %v8228_v22 = vpop.f32.mrf.mxu1 }
0x1b07   :  { %v3392_v8 = vmul.f32 %v8228_v22, %v63_v60 }
0x1b08   :  { %v3142_v27 = vpop.f32.mrf.mxu0 }
0x1b09   :  { %6376 = vmatmul.msk.f32.gmra.mxu1 %vm3175_vm15, %v3142_v27 }
0x1b0e   :  { %v3309_v18 = vpop.f32.mrf.mxu1 }
0x1b0f   :  { %v3393_v58 = vmul.f32 %v3309_v18, %v64_v52  ;;  %v74_v52 = vld [vmem:[%s9286_s2 + $0x178] sm:$0xff] }
0x1b10   :  { %v3145_v23 = vpop.f32.mrf.mxu0 }
0x1b11   :  { %6377 = vmatmul.msk.f32.gmra.mxu1 %vm3175_vm15, %v3145_v23 }
0x1b16   :  { %v3312_v32 = vpop.f32.mrf.mxu1 }
0x1b17   :  { %v3394_v1 = vmul.f32 %v3312_v32, %v65_v12  ;;  %v75_v12 = vld [vmem:[%s9286_s2 + $0x180] sm:$0xff] }
0x1b18   :  { %v3148_v44 = vpop.f32.mrf.mxu0 }
0x1b19   :  { %6378 = vmatmul.msk.f32.gmra.mxu1 %vm3175_vm15, %v3148_v44 }
0x1b1e   :  { %v3315_v25 = vpop.f32.mrf.mxu1 }
0x1b1f   :  { %v3395_v54 = vmul.f32 %v3315_v25, %v66_v24  ;;  %v76_v24 = vld [vmem:[%s9286_s2 + $0x188] sm:$0xff] }
0x1b20   :  { %v3151_v26 = vpop.f32.mrf.mxu0 }
0x1b21   :  { %6379 = vmatmul.msk.f32.gmra.mxu1 %vm3175_vm15, %v3151_v26  ;;  %v88_v26 = vld [vmem:[%s9286_s2 + $0x1e8] sm:$0xff] }
0x1b26   :  { %v3318_v4 = vpop.f32.mrf.mxu1 }
0x1b27   :  { %v3396_v0 = vmul.f32 %v3318_v4, %v67_v50  ;;  %v77_v50 = vld [vmem:[%s9286_s2 + $0x190] sm:$0xff] }
0x1b28   :  { %v3154_v36 = vpop.f32.mrf.mxu0 }
0x1b29   :  { %6380 = vmatmul.msk.f32.gmra.mxu1 %vm3175_vm15, %v3154_v36 }
0x1b2e   :  { %v3321_v6 = vpop.f32.mrf.mxu1 }
0x1b2f   :  { %v3397_v34 = vmul.f32 %v3321_v6, %v68_v45  ;;  %v87_v6 = vld [vmem:[%s9286_s2 + $0x1e0] sm:$0xff] }
0x1b30   :  { %v3157_v30 = vpop.f32.mrf.mxu0 }
0x1b31   :  { %6381 = vmatmul.msk.f32.gmra.mxu1 %vm3175_vm15, %v3157_v30 }
0x1b36   :  { %v3324_v41 = vpop.f32.mrf.mxu1 }
0x1b37   :  { %v3398_v49 = vmul.f32 %v3324_v41, %v69_v40  ;;  %v86_v41 = vld [vmem:[%s9286_s2 + $0x1d8] sm:$0xff] }
0x1b38   :  { %v3160_v31 = vpop.f32.mrf.mxu0 }
0x1b39   :  { %6382 = vmatmul.msk.f32.gmra.mxu1 %vm3175_vm15, %v3160_v31 }
0x1b3e   :  { %v3327_v43 = vpop.f32.mrf.mxu1 }
0x1b3f   :  { %v3399_v37 = vmul.f32 %v3327_v43, %v70_v28  ;;  %v3421_v43 = vld [vmem:[%s9287_s3 + $0xd0] sm:$0xff] }
0x1b40   :  { %v3163_v46 = vpop.f32.mrf.mxu0 }
0x1b41   :  { %6383 = vmatmul.msk.f32.gmra.mxu1 %vm3175_vm15, %v3163_v46  ;;  %v85_v46 = vld [vmem:[%s9286_s2 + $0x1d0] sm:$0xff] }
0x1b46   :  { %v3330_v63 = vpop.f32.mrf.mxu1 }
0x1b47   :  { %v3400_v29 = vmul.f32 %v3330_v63, %v71_v19  ;;  %v81_v19 = vld [vmem:[%s9286_s2 + $0x1b0] sm:$0xff] }
0x1b48   :  { %v3166_v48 = vpop.f32.mrf.mxu0 }
0x1b49   :  { %6384 = vmatmul.msk.f32.gmra.mxu1 %vm3175_vm15, %v3166_v48  ;;  %v84_v48 = vld [vmem:[%s9286_s2 + $0x1c8] sm:$0xff] }
0x1b4e   :  { %v3333_v33 = vpop.f32.mrf.mxu1 }
0x1b4f   :  { %v3401_v39 = vmul.f32 %v3333_v33, %v72_v2  ;;  %v82_v2 = vld [vmem:[%s9286_s2 + $0x1b8] sm:$0xff] }
0x1b50   :  { %v3169_v35 = vpop.f32.mrf.mxu0 }
0x1b51   :  { %6385 = vmatmul.msk.f32.gmra.mxu1 %vm3175_vm15, %v3169_v35  ;;  %v83_v35 = vld [vmem:[%s9286_s2 + $0x1c0] sm:$0xff] }
0x1b56   :  { %v3336_v5 = vpop.f32.mrf.mxu1 }
0x1b57   :  { %v3402_v57 = vmul.f32 %v3336_v5, %v73_v51 }
0x1b58   :  { %v3172_v38 = vpop.f32.mrf.mxu0 }
0x1b59   :  { %6386 = vmatmul.msk.f32.gmra.mxu1 %vm3175_vm15, %v3172_v38  ;;  %3431 = vmatpush.msrb.mxu2 %v3402_v57  ;;  %v3423_v57 = vld [vmem:[%s9287_s3 + $0xe0] sm:$0xff] }
0x1b5b   :  { %3432 = vmatpush.msrb.mxu2 %v3401_v39  ;;  %v80_v39 = vld [vmem:[%s9286_s2 + $0x1a8] sm:$0xff] }
0x1b5d   :  { %3433 = vmatpush.msrb.mxu2 %v3400_v29  ;;  %v79_v29 = vld [vmem:[%s9286_s2 + $0x1a0] sm:$0xff] }
0x1b5e   :  { %v8259_v47 = vpop.f32.mrf.mxu1 }
0x1b5f   :  { %3434 = vmatpush.msrb.mxu2 %v3399_v37  ;;  %v78_v37 = vld [vmem:[%s9286_s2 + $0x198] sm:$0xff]  ;;  %v3403_v60 = vmul.f32 %v8259_v47, %v74_v52 }
0x1b60   :  { %v3426_v47 = vld [vmem:[%s9287_s3 + $0xf8] sm:$0xff] }
0x1b61   :  { %3435 = vmatpush.msrb.mxu2 %v3398_v49  ;;  %v3425_v49 = vld [vmem:[%s9287_s3 + $0xf0] sm:$0xff] }
0x1b63   :  { %3436 = vmatpush.msrb.mxu2 %v3397_v34 }
0x1b65   :  { %3437 = vmatpush.msrb.mxu2 %v3396_v0 }
0x1b66   :  { %v8273_v42 = vpop.f32.mrf.mxu1 }
0x1b67   :  { %3438 = vmatpush.msrb.mxu2 %v3395_v54 }
0x1b69   :  { %3439 = vmatpush.msrb.mxu2 %v3394_v1  ;;  %v3404_v1 = vmul.f32 %v8273_v42, %v75_v12 }
0x1b6b   :  { %3440 = vmatpush.msrb.mxu2 %v3393_v58  ;;  %v3420_v58 = vld [vmem:[%s9287_s3 + $0xc8] sm:$0xff] }
0x1b6d   :  { %3441 = vmatpush.msrb.mxu2 %v3392_v8  ;;  %v3424_v8 = vld [vmem:[%s9287_s3 + $0xe8] sm:$0xff] }
0x1b6e   :  { %v8289_v15 = vpop.f32.mrf.mxu1 }
0x1b6f   :  { %3442 = vmatpush.msrb.mxu2 %v3391_v21  ;;  %v3405_v54 = vmul.f32 %v8289_v15, %v76_v24 }
0x1b71   :  { %3443 = vmatpush.msrb.mxu2 %v3390_v11 }
0x1b73   :  { %3444 = vmatpush.msrb.mxu2 %v3389_v59 }
0x1b75   :  { %3445 = vmatpush.msrb.mxu2 %v3388_v55 }
0x1b76   :  { %v3348_v10 = vpop.f32.mrf.mxu1 }
0x1b77   :  { %3446 = vmatpush.msrb.mxu2 %v3387_v7  ;;  %v3406_v0 = vmul.f32 %v3348_v10, %v77_v50  ;;  %v3428_v7 = vld [vmem:[%s9286_s2 + $0x460] sm:$0xff] }
0x1b78   :  { %3447 = vmatmul.f32.vlgmr.msrb.gmra.mxu2 %v3419_v56  ;;  %v8410_v56 = vld [vmem:[%s9286_s2 + $0x8] sm:$0xff] }
0x1b7e   :  { %v3351_v53 = vpop.f32.mrf.mxu1 }
0x1b7f   :  { %v3407_v34 = vmul.f32 %v3351_v53, %v78_v37  ;;  %v3427_v53 = vld [vmem:[%s9286_s2 + $0x458] sm:$0xff] }
0x1b80   :  { %3450 = vmatmul.f32.gmra.mxu2 %v3421_v43  ;;  %v3515_v43 = vpop.permute.xlu0 %3514 }
0x1b86   :  { %v3354_v3 = vpop.f32.mrf.mxu1 }
0x1b87   :  { %v3408_v45 = vmul.f32 %v3354_v3, %v79_v29 }
0x1b88   :  { %3453 = vmatmul.f32.gmra.mxu2 %v3423_v57  ;;  %v6700_v57 = vmov 0.0  }
0x1b8e   :  { %v3357_v61 = vpop.f32.mrf.mxu1 }
0x1b8f   :  { %v3409_v40 = vmul.f32 %v3357_v61, %v80_v39 }
0x1b90   :  { %3456 = vmatmul.f32.gmra.mxu2 %v3425_v49 }
0x1b96   :  { %v3360_v22 = vpop.f32.mrf.mxu1 }
0x1b97   :  { %v3410_v28 = vmul.f32 %v3360_v22, %v81_v19 }
0x1b9e   :  { %v3363_v27 = vpop.f32.mrf.mxu1 }
0x1b9f   :  { %v3411_v38 = vmul.f32 %v3363_v27, %v82_v2 }
0x1ba6   :  { %v3366_v18 = vpop.f32.mrf.mxu1 }
0x1ba7   :  { %v3412_v5 = vmul.f32 %v3366_v18, %v83_v35 }
0x1bae   :  { %v3369_v17 = vpop.f32.mrf.mxu1 }
0x1baf   :  { %v3413_v51 = vmul.f32 %v3369_v17, %v84_v48 }
0x1bb6   :  { %v3372_v23 = vpop.f32.mrf.mxu1 }
0x1bb7   :  { %v3414_v33 = vmul.f32 %v3372_v23, %v85_v46  ;;  %v3510_v46 = vpop.permute.xlu0 %3509 }
0x1bbe   :  { %v3375_v32 = vpop.f32.mrf.mxu1 }
0x1bbf   :  { %v3415_v63 = vmul.f32 %v3375_v32, %v86_v41  ;;  %v3489_v32 = vld [vmem:[%s9286_s2 + $0x3e8] sm:$0xff]  ;;  %v8444_v41 = vld [vmem:[%s9286_s2 + $0x20] sm:$0xff] }
0x1bc6   :  { %v3378_v44 = vpop.f32.mrf.mxu1 }
0x1bc7   :  { %v3416_v31 = vmul.f32 %v3378_v44, %v87_v6  ;;  %v8395_v44 = vld [vmem:[%s9286_s2 + $0x18] sm:$0xff] }
0x1bc8   :  { %v3491_v6 = vld [vmem:[%s9286_s2 + $0x3f8] sm:$0xff] }
0x1bce   :  { %v3381_v25 = vpop.f32.mrf.mxu1 }
0x1bcf   :  { %v3417_v30 = vmul.f32 %v3381_v25, %v88_v26  ;;  %v8401_v25 = vld [vmem:[%s9286_s2 + $0x10] sm:$0xff]  ;;  %v8416_v26 = vld [vmem:[%s9286_s2] sm:$0xff] }
0x1bd6   :  { %v3384_v4 = vpop.f32.mrf.mxu1 }
0x1bd7   :  { %v3418_v36 = vmul.f32 %v3384_v4, %v89_v9  ;;  %v3490_v9 = vld [vmem:[%s9286_s2 + $0x3f0] sm:$0xff]  ;;  %v8423_v4 = vld [vmem:[%s9286_s2 + $0x38] sm:$0xff] }
0x1bd9   :  { %3460 = vmatpush.msrb.mxu3 %v3418_v36  ;;  %v8429_v36 = vld [vmem:[%s9286_s2 + $0x30] sm:$0xff] }
0x1bdb   :  { %3461 = vmatpush.msrb.mxu3 %v3417_v30  ;;  %v8438_v30 = vld [vmem:[%s9286_s2 + $0x28] sm:$0xff] }
0x1bdd   :  { %3462 = vmatpush.msrb.mxu3 %v3416_v31  ;;  %v3492_v31 = vld [vmem:[%s9286_s2 + $0x400] sm:$0xff] }
0x1bdf   :  { %3463 = vmatpush.msrb.mxu3 %v3415_v63  ;;  %v3505_v63 = vpop.permute.xlu0 %3504 }
0x1be1   :  { %3464 = vmatpush.msrb.mxu3 %v3414_v33 }
0x1be3   :  { %3465 = vmatpush.msrb.mxu3 %v3413_v51  ;;  %v123_v51 = vld [vmem:[%s9285_s0] sm:$0x1] }
0x1be4   :  { %vm146_vm0 = vcmp.le.s32.totalorder %v123_v51, 20  ;;  %v3738_v51 = vld [vmem:[%s9286_s2 + $0x818] sm:$0xff] }
0x1be5   :  { %3466 = vmatpush.msrb.mxu3 %v3412_v5  ;;  %v6099_v19 = vsel %vm146_vm0, 1.0, %v6700_v57 }
0x1be6   :  { %v3518_v39 = vperm.slane %v6099_v19, 0 }
0x1be7   :  { %3467 = vmatpush.msrb.mxu3 %v3411_v38  ;;  %v3587_v48 = vpop.permute.xlu0 %3586 }
0x1be8   :  { %v3522_v29 = vmul.f32 %v3518_v39, %v3510_v46  ;;  %v3521_v37 = vmul.f32 %v3518_v39, %v3505_v63  ;;  %v3734_v63 = vld [vmem:[%s9286_s2 + $0x7f8] sm:$0xff] }
0x1be9   :  { %3468 = vmatpush.msrb.mxu3 %v3410_v28 }
0x1beb   :  { %3469 = vmatpush.msrb.mxu3 %v3409_v40  ;;  %v3523_v40 = vmul.f32 %v3518_v39, %v3515_v43 }
0x1bed   :  { %3470 = vmatpush.msrb.mxu3 %v3408_v45 }
0x1bef   :  { %3471 = vmatpush.msrb.mxu3 %v3407_v34  ;;  %v3500_v33 = vpop.permute.xlu0 %3499 }
0x1bf0   :  { %v3520_v50 = vmul.f32 %v3518_v39, %v3500_v33  ;;  %v3736_v33 = vld [vmem:[%s9286_s2 + $0x808] sm:$0xff] }
0x1bf1   :  { %3472 = vmatpush.msrb.mxu3 %v3406_v0 }
0x1bf3   :  { %3473 = vmatpush.msrb.mxu3 %v3405_v54 }
0x1bf5   :  { %3474 = vmatpush.msrb.mxu3 %v3404_v1 }
0x1bf7   :  { %3475 = vmatpush.msrb.mxu3 %v3403_v60  ;;  %v3582_v5 = vpop.permute.xlu0 %3581 }
0x1bf8   :  { %3476 = vmatmul.f32.vlgmr.msrb.gmra.mxu3 %v3420_v58 }
0x1bfb   :  { %v3448_v42 = vpop.f32.mrf.mxu2 }
0x1bfc   :  { %v3449_v27 = vadd.f32 %v3448_v42, %v3427_v53  ;;  %v3597_v42 = vld [vmem:[%s9286_s2 + $0x7b8] sm:$0xff] }
0x1bff   :  { %v3577_v28 = vpop.permute.xlu0 %3576 }
0x1c00   :  { %3479 = vmatmul.f32.gmra.mxu3 %v3422_v14 }
0x1c03   :  { %v3451_v16 = vpop.f32.mrf.mxu2 }
0x1c04   :  { %v3452_v61 = vadd.f32 %v3451_v16, %v3428_v7  ;;  %v3598_v16 = vld [vmem:[%s9286_s2 + $0x7c0] sm:$0xff] }
0x1c07   :  { %v3572_v60 = vpop.permute.xlu0 %3571 }
0x1c08   :  { %3482 = vmatmul.f32.gmra.mxu3 %v3424_v8 }
0x1c0b   :  { %v3454_v15 = vpop.f32.mrf.mxu2 }
0x1c0c   :  { %v3455_v10 = vadd.f32 %v3454_v15, %v3429_v62  ;;  %v3601_v15 = vld [vmem:[%s9286_s2 + $0x7d8] sm:$0xff] }
0x1c10   :  { %3485 = vmatmul.f32.gmra.mxu3 %v3426_v47 }
0x1c13   :  { %v3457_v59 = vpop.f32.mrf.mxu2 }
0x1c14   :  { %v3458_v55 = vadd.f32 %v3457_v59, %v3430_v13 }
0x1c7b   :  { %v3477_v21 = vpop.f32.mrf.mxu3 }
0x1c7c   :  { %v3478_v23 = vadd.f32 %v3477_v21, %v3449_v27  ;;  %v3599_v21 = vld [vmem:[%s9286_s2 + $0x7c8] sm:$0xff] }
0x1c83   :  { %v3480_v20 = vpop.f32.mrf.mxu3 }
0x1c84   :  { %v3481_v17 = vadd.f32 %v3480_v20, %v3452_v61  ;;  %v3600_v20 = vld [vmem:[%s9286_s2 + $0x7d0] sm:$0xff] }
0x1c8b   :  { %v3483_v11 = vpop.f32.mrf.mxu3 }
0x1c8c   :  { %v3484_v18 = vadd.f32 %v3483_v11, %v3455_v10  ;;  %v3602_v11 = vld [vmem:[%s9286_s2 + $0x7e0] sm:$0xff] }
0x1c93   :  { %v3486_v3 = vpop.f32.mrf.mxu3 }
0x1c94   :  { %v3487_v22 = vadd.f32 %v3486_v3, %v3458_v55 }
0x1c96   :  { %3548 = vmatpush.msra.mxu2 %v3487_v22 }
0x1c98   :  { %3549 = vmatpush.msra.mxu2 %v3484_v18 }
0x1c9a   :  { %3550 = vmatpush.msra.mxu2 %v3481_v17 }
0x1c9c   :  { %3551 = vmatpush.msra.mxu2 %v3478_v23 }
0x1c9d   :  { %6387 = vmatmul.msk.f32.vlgmr.msra.gmra.mxu2 %vm283_vm7, %v3489_v32  ;;  %v3723_v32 = vpop.permute.xlu0 %3722 }
0x1c9e   :  { %3676 = vmatpush.msrb.mxu2 %v8395_v44 }
0x1ca0   :  { %3677 = vmatpush.msrb.mxu2 %v8401_v25 }
0x1ca2   :  { %3678 = vmatpush.msrb.mxu2 %v8410_v56 }
0x1ca4   :  { %3679 = vmatpush.msrb.mxu2 %v8416_v26 }
0x1ca5   :  { %6388 = vmatmul.msk.f32.gmra.mxu2 %vm283_vm7, %v3490_v9  ;;  %v3728_v9 = vpop.permute.xlu2 %3727 }
0x1ca6   :  { %3707 = vmatpush.msra.mxu2 %v8423_v4 }
0x1ca8   :  { %3708 = vmatpush.msra.mxu2 %v8429_v36 }
0x1caa   :  { %3709 = vmatpush.msra.mxu2 %v8438_v30 }
0x1cac   :  { %3710 = vmatpush.msra.mxu2 %v8444_v41 }
0x1cad   :  { %6389 = vmatmul.msk.f32.gmra.mxu2 %vm283_vm7, %v3491_v6 }
0x1cb5   :  { %6390 = vmatmul.msk.f32.gmra.mxu2 %vm283_vm7, %v3492_v31 }
0x1d20   :  { %v3553_v35 = vpop.f32.mrf.mxu2 }
0x1d21   :  { %v3554_v0 = vadd.f32 %v3553_v35, %v3520_v50  ;;  %v3737_v35 = vld [vmem:[%s9286_s2 + $0x810] sm:$0xff] }
0x1d23   :  { %v8462_v58 = vadd.f32 %v3572_v60, %v3554_v0  ;;  %v3865_v0 = vpop.permute.xlu2 %3864  ;;  %v3860_v60 = vpop.permute.xlu1 %3859 }
0x1d25   :  { %v3593_v47 = vmax.f32 %v8462_v58, 0.0 }
0x1d28   :  { %v3556_v2 = vpop.f32.mrf.mxu2 }
0x1d29   :  { %v3557_v34 = vadd.f32 %v3556_v2, %v3521_v37  ;;  %v3739_v2 = vld [vmem:[%s9286_s2 + $0x820] sm:$0xff] }
0x1d2b   :  { %v8459_v52 = vadd.f32 %v3577_v28, %v3557_v34 }
0x1d2d   :  { %v3594_v8 = vmax.f32 %v8459_v52, 0.0  ;;  %v4237_v52 = vld [vmem:[%s9286_s2 + $0x788] sm:$0xff] }
0x1d30   :  { %v3559_v38 = vpop.f32.mrf.mxu2 }
0x1d31   :  { %v3560_v45 = vadd.f32 %v3559_v38, %v3522_v29 }
0x1d33   :  { %v8455_v12 = vadd.f32 %v3582_v5, %v3560_v45 }
0x1d35   :  { %v3595_v14 = vmax.f32 %v8455_v12, 0.0  ;;  %v4236_v12 = vld [vmem:[%s9286_s2 + $0x780] sm:$0xff] }
0x1d38   :  { %v3562_v49 = vpop.f32.mrf.mxu2 }
0x1d39   :  { %v3563_v24 = vadd.f32 %v3562_v49, %v3523_v40 }
0x1d3b   :  { %v8457_v54 = vadd.f32 %v3587_v48, %v3563_v24  ;;  %v3735_v48 = vld [vmem:[%s9286_s2 + $0x800] sm:$0xff] }
0x1d3d   :  { %v3596_v1 = vmax.f32 %v8457_v54, 0.0 }
0x1d3f   :  { %3635 = vmatpush.msra.mxu3 %v3596_v1 }
0x1d41   :  { %3636 = vmatpush.msra.mxu3 %v3595_v14 }
0x1d43   :  { %3637 = vmatpush.msra.mxu3 %v3594_v8 }
0x1d45   :  { %3638 = vmatpush.msra.mxu3 %v3593_v47 }
0x1d46   :  { %6391 = vmatmul.msk.f32.vlgmr.msra.gmra.mxu3 %vm283_vm7, %v3597_v42 }
0x1d47   :  { %3813 = vmatpush.msrb.mxu3 %v8395_v44 }
0x1d49   :  { %3814 = vmatpush.msrb.mxu3 %v8401_v25 }
0x1d4b   :  { %3815 = vmatpush.msrb.mxu3 %v8410_v56 }
0x1d4d   :  { %3816 = vmatpush.msrb.mxu3 %v8416_v26 }
0x1d4e   :  { %6392 = vmatmul.msk.f32.gmra.mxu3 %vm283_vm7, %v3598_v16 }
0x1d4f   :  { %3844 = vmatpush.msra.mxu3 %v8423_v4 }
0x1d51   :  { %3845 = vmatpush.msra.mxu3 %v8429_v36 }
0x1d53   :  { %3846 = vmatpush.msra.mxu3 %v8438_v30 }
0x1d55   :  { %3847 = vmatpush.msra.mxu3 %v8444_v41 }
0x1d56   :  { %6393 = vmatmul.msk.f32.gmra.mxu3 %vm283_vm7, %v3599_v21 }
0x1d5e   :  { %6394 = vmatmul.msk.f32.gmra.mxu3 %vm283_vm7, %v3600_v20 }
0x1d66   :  { %6395 = vmatmul.msk.f32.gmra.mxu3 %vm283_vm7, %v3601_v15  ;;  %v3871_v15 = vld [vmem:[%s9286_s2 + $0x838] sm:$0xff] }
0x1d6e   :  { %6396 = vmatmul.msk.f32.gmra.mxu3 %vm283_vm7, %v3602_v11  ;;  %v3872_v11 = vld [vmem:[%s9286_s2 + $0x840] sm:$0xff] }
0x1dc9   :  { %v3640_v13 = vpop.f32.mrf.mxu3 }
0x1dca   :  { %6397 = vmatmul.msk.f32.vlgmr.msrb.gmra.mxu2 %vm283_vm7, %v3640_v13  ;;  %v3873_v13 = vld [vmem:[%s9286_s2 + $0x848] sm:$0xff] }
0x1dd1   :  { %v3643_v59 = vpop.f32.mrf.mxu3 }
0x1dd2   :  { %6398 = vmatmul.msk.f32.gmra.mxu2 %vm283_vm7, %v3643_v59  ;;  %v3874_v59 = vld [vmem:[%s9286_s2 + $0x850] sm:$0xff] }
0x1dd9   :  { %v3646_v62 = vpop.f32.mrf.mxu3 }
0x1de1   :  { %v3649_v55 = vpop.f32.mrf.mxu3 }
0x1de9   :  { %v3652_v7 = vpop.f32.mrf.mxu3 }
0x1dea   :  { %6399 = vmatmul.msk.f32.vlgmr.msra.gmra.mxu2 %vm283_vm7, %v3652_v7 }
0x1df1   :  { %v3655_v10 = vpop.f32.mrf.mxu3 }
0x1df2   :  { %6400 = vmatmul.msk.f32.gmra.mxu2 %vm283_vm7, %v3655_v10 }
0x1e4d   :  { %v3681_v53 = vpop.f32.mrf.mxu2 }
0x1e4e   :  { %v3687_v22 = vadd.f32 %v3681_v53, %v3646_v62  ;;  %v3875_v62 = vld [vmem:[%s9286_s2 + $0x858] sm:$0xff] }
0x1e55   :  { %v3684_v3 = vpop.f32.mrf.mxu2 }
0x1e56   :  { %v3688_v27 = vadd.f32 %v3684_v3, %v3649_v55  ;;  %v3876_v55 = vld [vmem:[%s9286_s2 + $0x860] sm:$0xff] }
0x1e6d   :  { %v3712_v61 = vpop.f32.mrf.mxu2 }
0x1e6e   :  { %v3718_v18 = vadd.f32 %v3712_v61, %v3687_v22 }
0x1e70   :  { %v3730_v6 = vadd.f32 %v3723_v32, %v3718_v18 }
0x1e72   :  { %v3732_v46 = vmax.f32 %v3730_v6, 0.0 }
0x1e75   :  { %v3715_v17 = vpop.f32.mrf.mxu2 }
0x1e76   :  { %v3719_v23 = vadd.f32 %v3715_v17, %v3688_v27 }
0x1e78   :  { %v3731_v31 = vadd.f32 %v3728_v9, %v3719_v23 }
0x1e7a   :  { %v3733_v43 = vmax.f32 %v3731_v31, 0.0 }
0x1e7c   :  { %3774 = vmatpush.msrb.mxu2 %v3733_v43  ;;  %v4002_v43 = vpop.permute.xlu0 %4001 }
0x1e7e   :  { %3775 = vmatpush.msrb.mxu2 %v3732_v46  ;;  %v3997_v46 = vpop.permute.xlu2 %3996 }
0x1e7f   :  { %6401 = vmatmul.msk.f32.vlgmr.msrb.gmra.mxu2 %vm193_vm6, %v3734_v63 }
0x1e80   :  { %3950 = vmatpush.msra.mxu2 %v8395_v44 }
0x1e82   :  { %3951 = vmatpush.msra.mxu2 %v8401_v25 }
0x1e84   :  { %3952 = vmatpush.msra.mxu2 %v8410_v56 }
0x1e86   :  { %3953 = vmatpush.msra.mxu2 %v8416_v26 }
0x1e87   :  { %6402 = vmatmul.msk.f32.gmra.mxu2 %vm193_vm6, %v3735_v48 }
0x1e88   :  { %3981 = vmatpush.msrb.mxu2 %v8423_v4 }
0x1e8a   :  { %3982 = vmatpush.msrb.mxu2 %v8429_v36 }
0x1e8c   :  { %3983 = vmatpush.msrb.mxu2 %v8438_v30 }
0x1e8e   :  { %3984 = vmatpush.msrb.mxu2 %v8444_v41 }
0x1e8f   :  { %6403 = vmatmul.msk.f32.gmra.mxu2 %vm193_vm6, %v3736_v33 }
0x1e97   :  { %6404 = vmatmul.msk.f32.gmra.mxu2 %vm193_vm6, %v3737_v35 }
0x1e9f   :  { %6405 = vmatmul.msk.f32.gmra.mxu2 %vm193_vm6, %v3738_v51  ;;  %v4008_v51 = vld [vmem:[%s9286_s2 + $0x878] sm:$0xff] }
0x1ea7   :  { %6406 = vmatmul.msk.f32.gmra.mxu2 %vm193_vm6, %v3739_v2  ;;  %v4009_v2 = vld [vmem:[%s9286_s2 + $0x880] sm:$0xff] }
0x1f02   :  { %v3777_v5 = vpop.f32.mrf.mxu2 }
0x1f03   :  { %6407 = vmatmul.msk.f32.vlgmr.msrb.gmra.mxu3 %vm283_vm7, %v3777_v5  ;;  %v4010_v5 = vld [vmem:[%s9286_s2 + $0x888] sm:$0xff] }
0x1f0a   :  { %v3780_v57 = vpop.f32.mrf.mxu2 }
0x1f0b   :  { %6408 = vmatmul.msk.f32.gmra.mxu3 %vm283_vm7, %v3780_v57  ;;  %v4011_v57 = vld [vmem:[%s9286_s2 + $0x890] sm:$0xff] }
0x1f12   :  { %v3783_v19 = vpop.f32.mrf.mxu2 }
0x1f1a   :  { %v3786_v38 = vpop.f32.mrf.mxu2 }
0x1f22   :  { %v3789_v39 = vpop.f32.mrf.mxu2 }
0x1f23   :  { %6409 = vmatmul.msk.f32.vlgmr.msra.gmra.mxu3 %vm283_vm7, %v3789_v39  ;;  %v4014_v39 = vld [vmem:[%s9286_s2 + $0x8a8] sm:$0xff] }
0x1f2a   :  { %v3792_v28 = vpop.f32.mrf.mxu2 }
0x1f2b   :  { %6410 = vmatmul.msk.f32.gmra.mxu3 %vm283_vm7, %v3792_v28  ;;  %v4015_v28 = vld [vmem:[%s9286_s2 + $0x8b0] sm:$0xff] }
0x1f86   :  { %v3818_v29 = vpop.f32.mrf.mxu3 }
0x1f87   :  { %v3824_v45 = vadd.f32 %v3818_v29, %v3783_v19  ;;  %v4012_v19 = vld [vmem:[%s9286_s2 + $0x898] sm:$0xff] }
0x1f88   :  { %v4016_v29 = vld [vmem:[%s9286_s2 + $0x8b8] sm:$0xff] }
0x1f8e   :  { %v3821_v40 = vpop.f32.mrf.mxu3 }
0x1f8f   :  { %v3825_v49 = vadd.f32 %v3821_v40, %v3786_v38  ;;  %v4013_v38 = vld [vmem:[%s9286_s2 + $0x8a0] sm:$0xff] }
0x1f90   :  { %v4017_v40 = vld [vmem:[%s9286_s2 + $0x8c0] sm:$0xff] }
0x1fa6   :  { %v3849_v37 = vpop.f32.mrf.mxu3 }
0x1fa7   :  { %v3855_v50 = vadd.f32 %v3849_v37, %v3824_v45  ;;  %v4018_v37 = vld [vmem:[%s9286_s2 + $0x8c8] sm:$0xff]  ;;  %v4019_v45 = vld [vmem:[%s9286_s2 + $0x8d0] sm:$0xff] }
0x1fa9   :  { %v3867_v42 = vadd.f32 %v3860_v60, %v3855_v50  ;;  %v8635_v50 = vld [vmem:[%s9286_s2 + $0x58] sm:$0xff]  ;;  %v8653_v60 = vld [vmem:[%s9286_s2 + $0x40] sm:$0xff] }
0x1fab   :  { %v3869_v20 = vmax.f32 %v3867_v42, 0.0 }
0x1fae   :  { %v3852_v34 = vpop.f32.mrf.mxu3 }
0x1faf   :  { %v3856_v24 = vadd.f32 %v3852_v34, %v3825_v49  ;;  %v8641_v34 = vld [vmem:[%s9286_s2 + $0x50] sm:$0xff] }
0x1fb1   :  { %v3868_v16 = vadd.f32 %v3865_v0, %v3856_v24  ;;  %v8647_v24 = vld [vmem:[%s9286_s2 + $0x48] sm:$0xff] }
0x1fb3   :  { %v3870_v21 = vmax.f32 %v3868_v16, 0.0 }
0x1fb5   :  { %3911 = vmatpush.msrb.mxu3 %v3870_v21 }
0x1fb7   :  { %3912 = vmatpush.msrb.mxu3 %v3869_v20 }
0x1fb8   :  { %6411 = vmatmul.msk.f32.vlgmr.msrb.gmra.mxu3 %vm193_vm6, %v3871_v15 }
0x1fb9   :  { %4137 = vmatpush.msra.mxu3 %v8395_v44 }
0x1fbb   :  { %4138 = vmatpush.msra.mxu3 %v8401_v25 }
0x1fbd   :  { %4139 = vmatpush.msra.mxu3 %v8410_v56 }
0x1fbf   :  { %4140 = vmatpush.msra.mxu3 %v8416_v26 }
0x1fc0   :  { %6412 = vmatmul.msk.f32.gmra.mxu3 %vm193_vm6, %v3872_v11 }
0x1fc1   :  { %4182 = vmatpush.msrb.mxu3 %v8423_v4 }
0x1fc3   :  { %4183 = vmatpush.msrb.mxu3 %v8429_v36 }
0x1fc5   :  { %4184 = vmatpush.msrb.mxu3 %v8438_v30 }
0x1fc7   :  { %4185 = vmatpush.msrb.mxu3 %v8444_v41 }
0x1fc8   :  { %6413 = vmatmul.msk.f32.gmra.mxu3 %vm193_vm6, %v3873_v13 }
0x1fd0   :  { %6414 = vmatmul.msk.f32.gmra.mxu3 %vm193_vm6, %v3874_v59 }
0x1fd8   :  { %6415 = vmatmul.msk.f32.gmra.mxu3 %vm193_vm6, %v3875_v62 }
0x1fe0   :  { %6416 = vmatmul.msk.f32.gmra.mxu3 %vm193_vm6, %v3876_v55 }
0x203b   :  { %v3914_v7 = vpop.f32.mrf.mxu3 }
0x203c   :  { %6417 = vmatmul.msk.f32.vlgmr.msra.gmra.mxu2 %vm283_vm7, %v3914_v7 }
0x2043   :  { %v3917_v10 = vpop.f32.mrf.mxu3 }
0x2044   :  { %6418 = vmatmul.msk.f32.gmra.mxu2 %vm283_vm7, %v3917_v10 }
0x204b   :  { %v3920_v53 = vpop.f32.mrf.mxu3 }
0x2053   :  { %v3923_v3 = vpop.f32.mrf.mxu3 }
0x205b   :  { %v3926_v61 = vpop.f32.mrf.mxu3 }
0x205c   :  { %6419 = vmatmul.msk.f32.vlgmr.msrb.gmra.mxu2 %vm283_vm7, %v3926_v61 }
0x2063   :  { %v3929_v22 = vpop.f32.mrf.mxu3 }
0x2064   :  { %6420 = vmatmul.msk.f32.gmra.mxu2 %vm283_vm7, %v3929_v22 }
0x20bf   :  { %v3955_v27 = vpop.f32.mrf.mxu2 }
0x20c0   :  { %v3961_v23 = vadd.f32 %v3955_v27, %v3920_v53  ;;  %v4221_v27 = vpop.permute.xlu0 %4220 }
0x20c7   :  { %v3958_v18 = vpop.f32.mrf.mxu2 }
0x20c8   :  { %v3962_v32 = vadd.f32 %v3958_v18, %v3923_v3 }
0x20df   :  { %v3986_v17 = vpop.f32.mrf.mxu2 }
0x20e0   :  { %v3992_v9 = vadd.f32 %v3986_v17, %v3961_v23  ;;  %v4216_v17 = vpop.permute.xlu2 %4215 }
0x20e2   :  { %v4004_v63 = vadd.f32 %v3997_v46, %v3992_v9 }
0x20e4   :  { %v4006_v35 = vmax.f32 %v4004_v63, 0.0 }
0x20e7   :  { %v3989_v6 = vpop.f32.mrf.mxu2 }
0x20e8   :  { %v3993_v31 = vadd.f32 %v3989_v6, %v3962_v32 }
0x20ea   :  { %v4005_v48 = vadd.f32 %v4002_v43, %v3993_v31 }
0x20ec   :  { %v4007_v33 = vmax.f32 %v4005_v48, 0.0 }
0x20ee   :  { %4074 = vmatpush.msra.mxu2 %v4007_v33 }
0x20f0   :  { %4075 = vmatpush.msra.mxu2 %v4006_v35  ;;  %v4211_v35 = vpop.permute.xlu0 %4210 }
0x20f1   :  { %6421 = vmatmul.msk.f32.vlgmr.msra.gmra.mxu2 %vm193_vm6, %v4008_v51 }
0x20f9   :  { %6422 = vmatmul.msk.f32.gmra.mxu2 %vm193_vm6, %v4009_v2 }
0x2101   :  { %6423 = vmatmul.msk.f32.gmra.mxu2 %vm193_vm6, %v4010_v5  ;;  %v4206_v5 = vpop.permute.xlu2 %4205 }
0x2109   :  { %6424 = vmatmul.msk.f32.gmra.mxu2 %vm193_vm6, %v4011_v57 }
0x2111   :  { %6425 = vmatmul.msk.f32.gmra.mxu2 %vm193_vm6, %v4012_v19 }
0x2119   :  { %6426 = vmatmul.msk.f32.gmra.mxu2 %vm193_vm6, %v4013_v38 }
0x2121   :  { %6427 = vmatmul.msk.f32.gmra.mxu2 %vm193_vm6, %v4014_v39 }
0x2129   :  { %6428 = vmatmul.msk.f32.gmra.mxu2 %vm193_vm6, %v4015_v28 }
0x2131   :  { %6429 = vmatmul.msk.f32.gmra.mxu2 %vm193_vm6, %v4016_v29 }
0x2139   :  { %6430 = vmatmul.msk.f32.gmra.mxu2 %vm193_vm6, %v4017_v40 }
0x2141   :  { %6431 = vmatmul.msk.f32.gmra.mxu2 %vm193_vm6, %v4018_v37 }
0x2149   :  { %6432 = vmatmul.msk.f32.gmra.mxu2 %vm193_vm6, %v4019_v45 }
0x2174   :  { %v4077_v49 = vpop.f32.mrf.mxu2 }
0x2175   :  { %6433 = vmatmul.msk.f32.vlgmr.msra.gmra.mxu3 %vm283_vm7, %v4077_v49 }
0x2176   :  { %4299 = vmatpush.msra.mxu3 %v8635_v50 }
0x2178   :  { %4300 = vmatpush.msra.mxu3 %v8641_v34 }
0x217a   :  { %4301 = vmatpush.msra.mxu3 %v8647_v24 }
0x217c   :  { %v4080_v0 = vpop.f32.mrf.mxu2  ;;  %4302 = vmatpush.msra.mxu3 %v8653_v60 }
0x217d   :  { %6434 = vmatmul.msk.f32.gmra.mxu3 %vm283_vm7, %v4080_v0 }
0x2184   :  { %v4083_v42 = vpop.f32.mrf.mxu2 }
0x2185   :  { %6435 = vmatmul.msk.f32.gmra.mxu3 %vm283_vm7, %v4083_v42 }
0x218c   :  { %v4086_v16 = vpop.f32.mrf.mxu2 }
0x218d   :  { %6436 = vmatmul.msk.f32.gmra.mxu3 %vm283_vm7, %v4086_v16 }
0x2194   :  { %v4089_v21 = vpop.f32.mrf.mxu2 }
0x219c   :  { %v4092_v20 = vpop.f32.mrf.mxu2 }
0x21a4   :  { %v4095_v15 = vpop.f32.mrf.mxu2 }
0x21ac   :  { %v4098_v11 = vpop.f32.mrf.mxu2 }
0x21b4   :  { %v4101_v13 = vpop.f32.mrf.mxu2 }
0x21b5   :  { %6437 = vmatmul.msk.f32.vlgmr.msrb.gmra.mxu3 %vm283_vm7, %v4101_v13 }
0x21bc   :  { %v4104_v59 = vpop.f32.mrf.mxu2 }
0x21bd   :  { %6438 = vmatmul.msk.f32.gmra.mxu3 %vm283_vm7, %v4104_v59 }
0x21c4   :  { %v4107_v62 = vpop.f32.mrf.mxu2 }
0x21c5   :  { %6439 = vmatmul.msk.f32.gmra.mxu3 %vm283_vm7, %v4107_v62 }
0x21cc   :  { %v4110_v55 = vpop.f32.mrf.mxu2 }
0x21cd   :  { %6440 = vmatmul.msk.f32.gmra.mxu3 %vm283_vm7, %v4110_v55 }
0x21f8   :  { %v4142_v7 = vpop.f32.mrf.mxu3 }
0x21f9   :  { %v4154_v6 = vadd.f32 %v4142_v7, %v4089_v21  ;;  %v8711_v7 = vld [vmem:[%s9286_s2 + $0x90] sm:$0xff] }
0x2200   :  { %v4145_v10 = vpop.f32.mrf.mxu3 }
0x2201   :  { %v4155_v32 = vadd.f32 %v4145_v10, %v4092_v20  ;;  %v8718_v10 = vld [vmem:[%s9286_s2 + $0x80] sm:$0xff] }
0x2208   :  { %v4148_v53 = vpop.f32.mrf.mxu3 }
0x2209   :  { %v4156_v23 = vadd.f32 %v4148_v53, %v4095_v15  ;;  %v8725_v53 = vld [vmem:[%s9286_s2 + $0xd8] sm:$0xff] }
0x2210   :  { %v4151_v3 = vpop.f32.mrf.mxu3 }
0x2211   :  { %v4157_v31 = vadd.f32 %v4151_v3, %v4098_v11  ;;  %v8731_v3 = vld [vmem:[%s9286_s2 + $0xe8] sm:$0xff] }
0x2238   :  { %v4187_v61 = vpop.f32.mrf.mxu3 }
0x2239   :  { %v4199_v63 = vadd.f32 %v4187_v61, %v4154_v6  ;;  %v8737_v61 = vld [vmem:[%s9286_s2 + $0xd0] sm:$0xff] }
0x223b   :  { %v4223_v57 = vadd.f32 %v4206_v5, %v4199_v63  ;;  %v8785_v63 = vld [vmem:[%s9286_s2 + $0xa8] sm:$0xff] }
0x223d   :  { %v4227_v29 = vmax.f32 %v4223_v57, 0.0 }
0x223f   :  { %v8680_v54 = vadd.f32 %v4227_v29, %v3593_v47  ;;  %v4971_v29 = vld [vmem:[%s9286_s2 + $0x9e8] sm:$0xff] }
0x2240   :  { %v4190_v22 = vpop.f32.mrf.mxu3 }
0x2241   :  { %v4200_v43 = vadd.f32 %v4190_v22, %v4155_v32  ;;  %v8743_v22 = vld [vmem:[%s9286_s2 + $0xe0] sm:$0xff] }
0x2243   :  { %v4224_v51 = vadd.f32 %v4211_v35, %v4200_v43  ;;  %v8769_v43 = vld [vmem:[%s9286_s2 + $0xa0] sm:$0xff]  ;;  %v8806_v35 = vld [vmem:[%s9286_s2 + $0xc8] sm:$0xf] }
0x2245   :  { %v4228_v39 = vmax.f32 %v4224_v51, 0.0 }
0x2247   :  { %v8675_v37 = vadd.f32 %v4228_v39, %v3594_v8 }
0x2248   :  { %v4193_v18 = vpop.f32.mrf.mxu3 }
0x2249   :  { %v4201_v9 = vadd.f32 %v4193_v18, %v4156_v23  ;;  %v8758_v18 = vld [vmem:[%s9286_s2 + $0x88] sm:$0x3] }
0x224b   :  { %v4225_v48 = vadd.f32 %v4216_v17, %v4201_v9 }
0x224d   :  { %v4229_v19 = vmax.f32 %v4225_v48, 0.0  ;;  %v8792_v48 = vld [vmem:[%s9286_s2 + $0xc0] sm:$0xff] }
0x224f   :  { %v8670_v40 = vadd.f32 %v4229_v19, %v3595_v14 }
0x2250   :  { %v4196_v46 = vpop.f32.mrf.mxu3 }
0x2251   :  { %v4202_v33 = vadd.f32 %v4196_v46, %v4157_v31  ;;  %v8776_v46 = vld [vmem:[%s9286_s2 + $0xb8] sm:$0xff] }
0x2253   :  { %v4226_v2 = vadd.f32 %v4221_v27, %v4202_v33  ;;  %v8751_v27 = vld [vmem:[%s9286_s2 + $0x98] sm:$0x3]  ;;  %v8799_v33 = vld [vmem:[%s9286_s2 + $0xb0] sm:$0xf] }
0x2255   :  { %v4230_v38 = vmax.f32 %v4226_v2, 0.0 }
0x2257   :  { %v8665_v28 = vadd.f32 %v4230_v38, %v3596_v1  ;;  %v4235_v1 = vld [vmem:[%s9286_s2 + $0x778] sm:$0xff] }
0x2259   :  { %4259 = vmatpush.msra.mxu0 %v8665_v28 }
0x225b   :  { %4260 = vmatpush.msra.mxu0 %v8670_v40 }
0x225d   :  { %4261 = vmatpush.msra.mxu0 %v8675_v37 }
0x225f   :  { %4262 = vmatpush.msra.mxu0 %v8680_v54 }
0x2260   :  { %6441 = vmatmul.msk.f32.vlgmr.msra.gmra.mxu0 %vm283_vm7, %v4235_v1 }
0x2268   :  { %6442 = vmatmul.msk.f32.gmra.mxu0 %vm283_vm7, %v4236_v12 }
0x2270   :  { %6443 = vmatmul.msk.f32.gmra.mxu0 %vm283_vm7, %v4237_v52 }
0x22dd   :  { %v8695_v58 = vpop.f32.mrf.mxu0 }
0x22de   :  { %v4276_v8 = vrot.slane %v8695_v58, 4 }
0x22e5   :  { %v4267_v14 = vpop.f32.mrf.mxu0 }
0x22e6   :  { %v4277_v47 = vrot.slane %v4267_v14, 4  ;;  %v8823_v14 = vld [vmem:[%s9286_s2 + $0xf0] sm:$0xff] }
0x22e8   :  { %v4278_v45 = vsel %vm415_vm8, %v4276_v8, %v4277_v47 }
0x22e9   :  { %6444 = vmatmul.msk.f32.vlgmr.msra.gmra.mxu3 %vm283_vm7, %v4278_v45  ;;  %6447 = vmatmul.msk.f32.vlgmr.msrb.gmra.mxu1 %vm283_vm7, %v4278_v45 }
0x22ed   :  { %v4270_v49 = vpop.f32.mrf.mxu0 }
0x22ee   :  { %v4279_v0 = vrot.slane %v4270_v49, 4 }
0x22f0   :  { %v4280_v42 = vsel %vm415_vm8, %v4277_v47, %v4279_v0 }
0x22f1   :  { %6445 = vmatmul.msk.f32.gmra.mxu3 %vm283_vm7, %v4280_v42  ;;  %6448 = vmatmul.msk.f32.gmra.mxu1 %vm283_vm7, %v4280_v42 }
0x22f9   :  { %6446 = vmatmul.msk.f32.gmra.mxu3 %vm283_vm7, %v4279_v0  ;;  %6449 = vmatmul.msk.f32.gmra.mxu1 %vm283_vm7, %v4279_v0 }
0x2366   :  { %v4330_v16 = vpop.f32.mrf.mxu1 }
0x236c   :  { %v4304_v21 = vpop.f32.mrf.mxu3 }
0x236d   :  { %v4339_v55 = vmax.f32 %v4304_v21, %v4330_v16 }
0x236e   :  { %v4333_v20 = vpop.f32.mrf.mxu1 }
0x2374   :  { %v4307_v15 = vpop.f32.mrf.mxu3 }
0x2375   :  { %v4340_v62 = vmax.f32 %v4307_v15, %v4333_v20 }
0x2376   :  { %v4336_v13 = vpop.f32.mrf.mxu1 }
0x237c   :  { %v4310_v11 = vpop.f32.mrf.mxu3 }
0x237d   :  { %v4341_v59 = vmax.f32 %v4310_v11, %v4336_v13 }
0x237f   :  { %6453 = vmatpush.msk.msrb.mxu2 %vm415_vm8, %v4341_v59  ;;  %6450 = vmatpush.msk.msrb.mxu0 %vm415_vm8, %v4341_v59 }
0x2381   :  { %4382 = vmatpush.msrb.mxu2 %v4340_v62  ;;  %4359 = vmatpush.msrb.mxu0 %v4340_v62 }
0x2383   :  { %4383 = vmatpush.msrb.mxu2 %v4339_v55  ;;  %4360 = vmatpush.msrb.mxu0 %v4339_v55 }
0x2384   :  { %6454 = vmatmul.msk.f32.vlgmr.msrb.gmra.mxu2 %vm482_vm9, %v8711_v7  ;;  %6451 = vmatmul.msk.f32.vlgmr.msrb.gmra.mxu0 %vm482_vm9, %v8718_v10 }
0x2385   :  { %4506 = vmatpush.msra.mxu2 %v8725_v53  ;;  %4471 = vmatpush.msra.mxu0 %v8731_v3 }
0x2387   :  { %4507 = vmatpush.msra.mxu2 %v8737_v61  ;;  %4472 = vmatpush.msra.mxu0 %v8743_v22 }
0x2389   :  { %4770 = vmatpush.msrb.mxu2 %v8395_v44 }
0x238b   :  { %4771 = vmatpush.msrb.mxu2 %v8401_v25 }
0x238c   :  { %6455 = vmatmul.msk.f32.gmra.mxu2 %vm482_vm9, %v8751_v27  ;;  %6452 = vmatmul.msk.f32.gmra.mxu0 %vm482_vm9, %v8758_v18 }
0x238d   :  { %4772 = vmatpush.msrb.mxu2 %v8410_v56 }
0x238f   :  { %4773 = vmatpush.msrb.mxu2 %v8416_v26 }
0x2401   :  { %v4362_v17 = vpop.f32.mrf.mxu0 }
0x2407   :  { %v4385_v23 = vpop.f32.mrf.mxu2 }
0x2408   :  { %v4391_v31 = vmax.f32 %v4362_v17, %v4385_v23 }
0x2409   :  { %v4365_v32 = vpop.f32.mrf.mxu0 }
0x240f   :  { %v4388_v9 = vpop.f32.mrf.mxu2 }
0x2410   :  { %v4392_v6 = vmax.f32 %v4365_v32, %v4388_v9 }
0x2412   :  { %6456 = vmatpush.msk.msrb.mxu3 %vm556_vm10, %v4392_v6  ;;  %6460 = vmatpush.msk.msra.mxu1 %vm556_vm10, %v4392_v6 }
0x2414   :  { %4411 = vmatpush.msrb.mxu3 %v4391_v31  ;;  %4437 = vmatpush.msra.mxu1 %v4391_v31 }
0x2415   :  { %6457 = vmatmul.msk.f32.vlgmr.msrb.gmra.mxu3 %vm546_vm11, %v8769_v43  ;;  %6461 = vmatmul.msk.f32.vlgmr.msra.gmra.mxu1 %vm546_vm11, %v8776_v46 }
0x2416   :  { %6470 = vmatpush.msk.msra.mxu3 %vm415_vm8, %v8695_v58 }
0x241d   :  { %6458 = vmatmul.msk.f32.gmra.mxu3 %vm546_vm11, %v8785_v63  ;;  %6462 = vmatmul.msk.f32.gmra.mxu1 %vm546_vm11, %v8792_v48 }
0x2425   :  { %6459 = vmatmul.msk.f32.gmra.mxu3 %vm546_vm11, %v8799_v33  ;;  %6463 = vmatmul.msk.f32.gmra.mxu1 %vm546_vm11, %v8806_v35 }
0x2492   :  { %v4439_v51 = vpop.f32.mrf.mxu1 }
0x2493   :  { %6464 = vmatmul.msk.f32.vlgmr.msra.gmra.mxu0 %vm193_vm6, %v4439_v51 }
0x2498   :  { %v4413_v2 = vpop.f32.mrf.mxu3 }
0x2499   :  { %6467 = vmatmul.msk.f32.vlgmr.msra.gmra.mxu2 %vm193_vm6, %v4413_v2 }
0x249a   :  { %v4442_v5 = vpop.f32.mrf.mxu1 }
0x249b   :  { %6465 = vmatmul.msk.f32.gmra.mxu0 %vm193_vm6, %v4442_v5 }
0x24a0   :  { %v4416_v57 = vpop.f32.mrf.mxu3 }
0x24a1   :  { %6468 = vmatmul.msk.f32.gmra.mxu2 %vm193_vm6, %v4416_v57 }
0x24a2   :  { %v4445_v12 = vpop.f32.mrf.mxu1 }
0x24a3   :  { %6466 = vmatmul.msk.f32.gmra.mxu0 %vm193_vm6, %v4445_v12 }
0x24a8   :  { %v4419_v1 = vpop.f32.mrf.mxu3 }
0x24a9   :  { %6469 = vmatmul.msk.f32.gmra.mxu2 %vm193_vm6, %v4419_v1 }
0x2510   :  { %v4474_v19 = vpop.f32.mrf.mxu0 }
0x2518   :  { %v4477_v32 = vpop.f32.mrf.mxu0 }
0x251c   :  { %v4509_v38 = vpop.f32.mrf.mxu2 }
0x251d   :  { %v4510_v39 = vadd.f32 %v4509_v38, %v4474_v19 }
0x251f   :  { %4518 = vxpose.xlu0.b32.start.end [1/1] (short) (narrow) %v4510_v39, 8  ;;  %v4601_v19 = vrot.slane %v4510_v39, 4 }
0x2520   :  { %v4480_v5 = vpop.f32.mrf.mxu0 }
0x2524   :  { %v4512_v9 = vpop.f32.mrf.mxu2 }
0x2525   :  { %v4513_v31 = vadd.f32 %v4512_v9, %v4477_v32 }
0x2527   :  { %v4602_v51 = vrot.slane %v4513_v31, 4 }
0x252c   :  { %v4515_v57 = vpop.f32.mrf.mxu2 }
0x252d   :  { %v4516_v1 = vadd.f32 %v4515_v57, %v4480_v5 }
0x252f   :  { %v4604_v12 = vrot.slane %v4516_v1, 4 }
0x258d   :  { %5090 = vperm.xlu0 %6611, %v4971_v29   ;;  %v4603_v29 = vsel %vm415_vm8, %v4601_v19, %v4602_v51 }
0x25c3   :  { %v4534_v52 = vpop.trf.xlu0 }
0x25c4   :  { %6471 = vmatmul.msk.f32.vlgmr.msra.gmra.mxu3 %vm723_vm12, %v4534_v52  ;;  %v4605_v52 = vsel %vm415_vm8, %v4602_v51, %v4604_v12 }
0x2647   :  { %v4572_v58 = vpop.f32.mrf.mxu3 }
0x2648   :  { %v4573_v8 = vadd.f32 %v8823_v14, %v4572_v58  ;;  %v4674_v58 = vld [vmem:[%s9286_s2 + $0x7b0] sm:$0x1] }
0x2649   :  { %6604 = vpush %v4674_v58 }
0x264a   :  { %v4575_v47 = vsel %vm283_vm7, %v4573_v8, -inf }
0x264b   :  { %v4576_v45 = vrot.slane %v4575_v47, 4 }
0x264d   :  { %v4577_v49 = vmax.f32 %v4575_v47, %v4576_v45  ;;  %v4594_v47 = vld [vmem:[%s9286_s2 + $0x790] sm:$0xff]  ;;  %v4595_v45 = vld [vmem:[%s9286_s2 + $0x798] sm:$0xff] }
0x264f   :  { %v4578_v0 = vrot.slane %v4577_v49, 2 }
0x2651   :  { %v4579_v42 = vmax.f32 %v4577_v49, %v4578_v0  ;;  %v4596_v49 = vld [vmem:[%s9286_s2 + $0x7a0] sm:$0xff]  ;;  %v4597_v0 = vld [vmem:[%s9286_s2 + $0x7a8] sm:$0xff] }
0x2653   :  { %v4580_v16 = vrot.slane %v4579_v42, 1 }
0x2655   :  { %v4581_v21 = vmax.f32 %v4579_v42, %v4580_v16 }
0x2657   :  { %v4582_v20 = vsub.f32 %v4573_v8, %v4581_v21 }
0x2659   :  { %v4583_v15 = vmul.f32 1.442695, %v4582_v20 }
0x265b   :  { %6627 = vpow2.f32 %v4583_v15 }
0x2661   :  { %v6628_v11 = vpop.eup %6627 }
0x2662   :  { %v4585_v13 = vsel %vm283_vm7, %v6628_v11, 0.0 }
0x2663   :  { %v4586_v59 = vrot.slane %v4585_v13, 4 }
0x2665   :  { %v4587_v62 = vadd.f32 %v4586_v59, %v4585_v13 }
0x2667   :  { %v4588_v55 = vrot.slane %v4587_v62, 2 }
0x2669   :  { %v4589_v17 = vadd.f32 %v4588_v55, %v4587_v62 }
0x266b   :  { %v4590_v23 = vrot.slane %v4589_v17, 1 }
0x266d   :  { %v4591_v6 = vadd.f32 %v4590_v23, %v4589_v17 }
0x266f   :  { %6629 = vrcp.f32 %v4591_v6 }
0x2675   :  { %v6630_v2 = vpop.eup %6629 }
0x2676   :  { %v4593_v38 = vmul.f32 %v6630_v2, %v6628_v11 }
0x2678   :  { %4625 = vmatpush.msrb.mxu1 %v4593_v38 }
0x2679   :  { %6472 = vmatmul.msk.f32.vlgmr.msrb.gmra.mxu1 %vm780_vm13, %v4603_v29  ;;  %v4822_v29 = vpop.permute.xlu2 %4821 }
0x267a   :  { %4801 = vmatpush.msra.mxu1 %v8423_v4  ;;  %s6605_s0 = spop %6604 }
0x267b   :  { %v4677_v20 = vstv %s6605_s0 }
0x267c   :  { %4802 = vmatpush.msra.mxu1 %v8429_v36 }
0x267e   :  { %4803 = vmatpush.msra.mxu1 %v8438_v30 }
0x2680   :  { %4804 = vmatpush.msra.mxu1 %v8444_v41 }
0x2681   :  { %6473 = vmatmul.msk.f32.gmra.mxu1 %vm780_vm13, %v4605_v52 }
0x2682   :  { %4907 = vmatpush.msrb.mxu1 %v8395_v44 }
0x2684   :  { %4908 = vmatpush.msrb.mxu1 %v8401_v25 }
0x2686   :  { %4909 = vmatpush.msrb.mxu1 %v8410_v56 }
0x2688   :  { %4910 = vmatpush.msrb.mxu1 %v8416_v26 }
0x26f6   :  { %v4627_v39 = vpop.f32.mrf.mxu1 }
0x26fe   :  { %v4630_v8 = vpop.f32.mrf.mxu1 }
0x26ff   :  { %4659 = vmatpush.msrb.mxu3 %v4630_v8 }
0x2701   :  { %4660 = vmatpush.msrb.mxu3 %v4627_v39 }
0x2702   :  { %6474 = vmatmul.msk.f32.vlgmr.msrb.gmra.mxu3 %vm193_vm6, %v4594_v47 }
0x2703   :  { %4938 = vmatpush.msra.mxu3 %v8423_v4 }
0x2705   :  { %4939 = vmatpush.msra.mxu3 %v8429_v36 }
0x2707   :  { %4940 = vmatpush.msra.mxu3 %v8438_v30 }
0x2709   :  { %4941 = vmatpush.msra.mxu3 %v8444_v41 }
0x270a   :  { %6475 = vmatmul.msk.f32.gmra.mxu3 %vm193_vm6, %v4595_v45  ;;  %v4817_v45 = vpop.permute.xlu2 %4816 }
0x270b   :  { %5044 = vmatpush.msrb.mxu3 %v8395_v44 }
0x270d   :  { %5045 = vmatpush.msrb.mxu3 %v8401_v25 }
0x270f   :  { %5046 = vmatpush.msrb.mxu3 %v8410_v56 }
0x2711   :  { %5047 = vmatpush.msrb.mxu3 %v8416_v26 }
0x2712   :  { %6476 = vmatmul.msk.f32.gmra.mxu3 %vm193_vm6, %v4596_v49 }
0x271a   :  { %6477 = vmatmul.msk.f32.gmra.mxu3 %vm193_vm6, %v4597_v0 }
0x2785   :  { %v4662_v42 = vpop.f32.mrf.mxu3 }
0x2786   :  { %v4679_v62 = vmul.f32 %v4677_v20, %v4662_v42 }
0x2788   :  { %v4683_v9 = vadd.f32 %v4679_v62, %v8680_v54 }
0x278a   :  { %v8884_v51 = vadd.f32 %v4683_v9, %v8680_v54  ;;  %v4694_v54 = vld [vmem:[%s9286_s2 + $0x950] sm:$0xff] }
0x278d   :  { %v4665_v16 = vpop.f32.mrf.mxu3 }
0x278e   :  { %v4680_v13 = vmul.f32 %v4677_v20, %v4665_v16 }
0x2790   :  { %v4684_v23 = vadd.f32 %v4680_v13, %v8675_v37  ;;  %v4832_v13 = vld [vmem:[%s9286_s2 + $0x998] sm:$0xff] }
0x2792   :  { %v8880_v31 = vadd.f32 %v4684_v23, %v8675_v37  ;;  %v4693_v37 = vld [vmem:[%s9286_s2 + $0x948] sm:$0xff] }
0x2795   :  { %v4668_v21 = vpop.f32.mrf.mxu3 }
0x2796   :  { %v4681_v15 = vmul.f32 %v4677_v20, %v4668_v21  ;;  %v4828_v21 = vld [vmem:[%s9286_s2 + $0x978] sm:$0xff] }
0x2798   :  { %v4685_v55 = vadd.f32 %v4681_v15, %v8670_v40  ;;  %v6686_v15 = vld [vmem:[%s9286_s2 + $0x78] sm:$0xff] }
0x279a   :  { %v8876_v6 = vadd.f32 %v4685_v55, %v8670_v40  ;;  %v4692_v40 = vld [vmem:[%s9286_s2 + $0x940] sm:$0xff] }
0x279d   :  { %v4671_v11 = vpop.f32.mrf.mxu3 }
0x279e   :  { %v4682_v59 = vmul.f32 %v4677_v20, %v4671_v11  ;;  %v4829_v20 = vld [vmem:[%s9286_s2 + $0x980] sm:$0xff]  ;;  %v4831_v11 = vld [vmem:[%s9286_s2 + $0x990] sm:$0xff] }
0x27a0   :  { %v4686_v17 = vadd.f32 %v4682_v59, %v8665_v28  ;;  %v4833_v59 = vld [vmem:[%s9286_s2 + $0x9a0] sm:$0xff] }
0x27a2   :  { %v8871_v32 = vadd.f32 %v4686_v17, %v8665_v28  ;;  %v4691_v28 = vld [vmem:[%s9286_s2 + $0x938] sm:$0xff] }
0x27a4   :  { %4729 = vmatpush.msrb.mxu0 %v8871_v32 }
0x27a6   :  { %4730 = vmatpush.msrb.mxu0 %v8876_v6 }
0x27a8   :  { %4731 = vmatpush.msrb.mxu0 %v8880_v31 }
0x27aa   :  { %4732 = vmatpush.msrb.mxu0 %v8884_v51 }
0x27ab   :  { %6478 = vmatmul.msk.f32.vlgmr.msrb.gmra.mxu0 %vm283_vm7, %v4691_v28 }
0x27ac   :  { %5075 = vmatpush.msra.mxu0 %v8423_v4 }
0x27ae   :  { %5076 = vmatpush.msra.mxu0 %v8429_v36 }
0x27b0   :  { %5077 = vmatpush.msra.mxu0 %v8438_v30 }
0x27b2   :  { %5078 = vmatpush.msra.mxu0 %v8444_v41 }
0x27b3   :  { %6479 = vmatmul.msk.f32.gmra.mxu0 %vm283_vm7, %v4692_v40 }
0x27b4   :  { %5231 = vmatpush.msrb.mxu0 %v8395_v44  ;;  %v4695_v44 = vld [vmem:[%s9286_s2 + $0x958] sm:$0xff] }
0x27b6   :  { %5232 = vmatpush.msrb.mxu0 %v8401_v25  ;;  %v4696_v25 = vld [vmem:[%s9286_s2 + $0x960] sm:$0xff] }
0x27b8   :  { %5233 = vmatpush.msrb.mxu0 %v8410_v56 }
0x27ba   :  { %5234 = vmatpush.msrb.mxu0 %v8416_v26 }
0x27bb   :  { %6480 = vmatmul.msk.f32.gmra.mxu0 %vm283_vm7, %v4693_v37  ;;  %v4959_v37 = vpop.permute.xlu2 %4958 }
0x27c3   :  { %6481 = vmatmul.msk.f32.gmra.mxu0 %vm283_vm7, %v4694_v54 }
0x27cb   :  { %6482 = vmatmul.msk.f32.gmra.mxu0 %vm283_vm7, %v4695_v44 }
0x27d3   :  { %6483 = vmatmul.msk.f32.gmra.mxu0 %vm283_vm7, %v4696_v25 }
0x2828   :  { %v4734_v56 = vpop.f32.mrf.mxu0 }
0x2829   :  { %6484 = vmatmul.msk.f32.vlgmr.msrb.gmra.mxu2 %vm283_vm7, %v4734_v56 }
0x2830   :  { %v4737_v26 = vpop.f32.mrf.mxu0 }
0x2831   :  { %6485 = vmatmul.msk.f32.gmra.mxu2 %vm283_vm7, %v4737_v26 }
0x2838   :  { %v4740_v2 = vpop.f32.mrf.mxu0 }
0x2840   :  { %v4743_v5 = vpop.f32.mrf.mxu0 }
0x2848   :  { %v4746_v57 = vpop.f32.mrf.mxu0 }
0x2849   :  { %6486 = vmatmul.msk.f32.vlgmr.msra.gmra.mxu1 %vm283_vm7, %v4746_v57  ;;  %v4954_v57 = vpop.permute.xlu2 %4953 }
0x2850   :  { %v4749_v19 = vpop.f32.mrf.mxu0 }
0x2851   :  { %6487 = vmatmul.msk.f32.gmra.mxu1 %vm283_vm7, %v4749_v19 }
0x28ac   :  { %v4775_v38 = vpop.f32.mrf.mxu2 }
0x28ad   :  { %v4781_v52 = vadd.f32 %v4775_v38, %v4740_v2 }
0x28b4   :  { %v4778_v12 = vpop.f32.mrf.mxu2 }
0x28b5   :  { %v4782_v58 = vadd.f32 %v4778_v12, %v4743_v5  ;;  %v4965_v12 = vld [vmem:[%s9286_s2 + $0x9b8] sm:$0xff] }
0x28c6   :  { %v4806_v1 = vpop.f32.mrf.mxu1 }
0x28c7   :  { %v4812_v39 = vadd.f32 %v4806_v1, %v4781_v52  ;;  %v4966_v52 = vld [vmem:[%s9286_s2 + $0x9c0] sm:$0xff] }
0x28c9   :  { %v4824_v49 = vadd.f32 %v4817_v45, %v4812_v39  ;;  %v4967_v39 = vld [vmem:[%s9286_s2 + $0x9c8] sm:$0xff] }
0x28cb   :  { %v4826_v16 = vmax.f32 %v4824_v49, 0.0 }
0x28ce   :  { %v4809_v8 = vpop.f32.mrf.mxu1 }
0x28cf   :  { %v4813_v47 = vadd.f32 %v4809_v8, %v4782_v58  ;;  %v4968_v58 = vld [vmem:[%s9286_s2 + $0x9d0] sm:$0xff]  ;;  %v4969_v8 = vld [vmem:[%s9286_s2 + $0x9d8] sm:$0xff] }
0x28d1   :  { %v4825_v0 = vadd.f32 %v4822_v29, %v4813_v47  ;;  %v4970_v47 = vld [vmem:[%s9286_s2 + $0x9e0] sm:$0xff] }
0x28d3   :  { %v4827_v42 = vmax.f32 %v4825_v0, 0.0 }
0x28d5   :  { %4868 = vmatpush.msra.mxu2 %v4827_v42 }
0x28d7   :  { %4869 = vmatpush.msra.mxu2 %v4826_v16 }
0x28d8   :  { %6488 = vmatmul.msk.f32.vlgmr.msra.gmra.mxu2 %vm193_vm6, %v4828_v21 }
0x28d9   :  { %5276 = vmatpush.msrb.mxu2 %v8423_v4  ;;  %v6687_v4 = vld [vmem:[%s9286_s2 + $0x70] sm:$0xff] }
0x28db   :  { %5277 = vmatpush.msrb.mxu2 %v8429_v36  ;;  %v4830_v36 = vld [vmem:[%s9286_s2 + $0x988] sm:$0xff] }
0x28dd   :  { %5278 = vmatpush.msrb.mxu2 %v8438_v30  ;;  %v6688_v30 = vld [vmem:[%s9286_s2 + $0x68] sm:$0xff] }
0x28df   :  { %5279 = vmatpush.msrb.mxu2 %v8444_v41  ;;  %v6689_v41 = vld [vmem:[%s9286_s2 + $0x60] sm:$0xff] }
0x28e0   :  { %6489 = vmatmul.msk.f32.gmra.mxu2 %vm193_vm6, %v4829_v20 }
0x28e1   :  { %5419 = vmatpush.msra.mxu2 %v6686_v15 }
0x28e3   :  { %5420 = vmatpush.msra.mxu2 %v6687_v4 }
0x28e5   :  { %5421 = vmatpush.msra.mxu2 %v6688_v30 }
0x28e7   :  { %5422 = vmatpush.msra.mxu2 %v6689_v41 }
0x28e8   :  { %6490 = vmatmul.msk.f32.gmra.mxu2 %vm193_vm6, %v4830_v36 }
0x28f0   :  { %6491 = vmatmul.msk.f32.gmra.mxu2 %vm193_vm6, %v4831_v11 }
0x28f8   :  { %6492 = vmatmul.msk.f32.gmra.mxu2 %vm193_vm6, %v4832_v13 }
0x2900   :  { %6493 = vmatmul.msk.f32.gmra.mxu2 %vm193_vm6, %v4833_v59  ;;  %v5096_v59 = vpop.permute.xlu2 %5095 }
0x295b   :  { %v4871_v62 = vpop.f32.mrf.mxu2 }
0x295c   :  { %6494 = vmatmul.msk.f32.vlgmr.msrb.gmra.mxu1 %vm283_vm7, %v4871_v62  ;;  %v5091_v62 = vpop.permute.xlu0 %5090 }
0x2963   :  { %v4874_v55 = vpop.f32.mrf.mxu2 }
0x2964   :  { %6495 = vmatmul.msk.f32.gmra.mxu1 %vm283_vm7, %v4874_v55 }
0x296b   :  { %v4877_v17 = vpop.f32.mrf.mxu2 }
0x2973   :  { %v4880_v23 = vpop.f32.mrf.mxu2 }
0x297b   :  { %v4883_v9 = vpop.f32.mrf.mxu2 }
0x297c   :  { %6496 = vmatmul.msk.f32.vlgmr.msra.gmra.mxu3 %vm283_vm7, %v4883_v9  ;;  %v5105_v9 = vld [vmem:[%s9286_s2 + $0xa10] sm:$0xff] }
0x2983   :  { %v4886_v28 = vpop.f32.mrf.mxu2 }
0x2984   :  { %6497 = vmatmul.msk.f32.gmra.mxu3 %vm283_vm7, %v4886_v28  ;;  %v5106_v28 = vld [vmem:[%s9286_s2 + $0xa18] sm:$0xff] }
0x29d9   :  { %v4912_v40 = vpop.f32.mrf.mxu1 }
0x29da   :  { %v4918_v25 = vadd.f32 %v4912_v40, %v4877_v17  ;;  %v5107_v40 = vld [vmem:[%s9286_s2 + $0xa20] sm:$0xff] }
0x29e1   :  { %v4915_v44 = vpop.f32.mrf.mxu1 }
0x29e2   :  { %v4919_v26 = vadd.f32 %v4915_v44, %v4880_v23  ;;  %v5104_v23 = vld [vmem:[%s9286_s2 + $0xa08] sm:$0xff]  ;;  %v5110_v44 = vld [vmem:[%s9286_s2 + $0xa38] sm:$0xff] }
0x29ff   :  { %v4943_v54 = vpop.f32.mrf.mxu3 }
0x2a00   :  { %v4949_v56 = vadd.f32 %v4943_v54, %v4918_v25  ;;  %v5109_v54 = vld [vmem:[%s9286_s2 + $0xa30] sm:$0xff]  ;;  %v5111_v25 = vld [vmem:[%s9286_s2 + $0xa40] sm:$0xff] }
0x2a02   :  { %v4961_v19 = vadd.f32 %v4954_v57, %v4949_v56  ;;  %v5112_v56 = vld [vmem:[%s9286_s2 + $0xa48] sm:$0xff] }
0x2a04   :  { %v4963_v1 = vmax.f32 %v4961_v19, 0.0 }
0x2a07   :  { %v4946_v2 = vpop.f32.mrf.mxu3 }
0x2a08   :  { %v4950_v5 = vadd.f32 %v4946_v2, %v4919_v26  ;;  %v5113_v26 = vld [vmem:[%s9286_s2 + $0xa50] sm:$0xff] }
0x2a0a   :  { %v4962_v38 = vadd.f32 %v4959_v37, %v4950_v5  ;;  %v5108_v37 = vld [vmem:[%s9286_s2 + $0xa28] sm:$0xff] }
0x2a0c   :  { %v4964_v29 = vmax.f32 %v4962_v38, 0.0 }
0x2a0e   :  { %5005 = vmatpush.msra.mxu1 %v4964_v29 }
0x2a10   :  { %5006 = vmatpush.msra.mxu1 %v4963_v1 }
0x2a11   :  { %6498 = vmatmul.msk.f32.vlgmr.msra.gmra.mxu1 %vm193_vm6, %v4965_v12 }
0x2a19   :  { %6499 = vmatmul.msk.f32.gmra.mxu1 %vm193_vm6, %v4966_v52 }
0x2a21   :  { %6500 = vmatmul.msk.f32.gmra.mxu1 %vm193_vm6, %v4967_v39 }
0x2a29   :  { %6501 = vmatmul.msk.f32.gmra.mxu1 %vm193_vm6, %v4968_v58 }
0x2a31   :  { %6502 = vmatmul.msk.f32.gmra.mxu1 %vm193_vm6, %v4969_v8 }
0x2a39   :  { %6503 = vmatmul.msk.f32.gmra.mxu1 %vm193_vm6, %v4970_v47 }
0x2a8e   :  { %v5008_v45 = vpop.f32.mrf.mxu1 }
0x2a8f   :  { %6504 = vmatmul.msk.f32.vlgmr.msrb.gmra.mxu3 %vm283_vm7, %v5008_v45 }
0x2a96   :  { %v5011_v49 = vpop.f32.mrf.mxu1 }
0x2a97   :  { %6505 = vmatmul.msk.f32.gmra.mxu3 %vm283_vm7, %v5011_v49 }
0x2a9e   :  { %v5014_v0 = vpop.f32.mrf.mxu1 }
0x2aa6   :  { %v5017_v42 = vpop.f32.mrf.mxu1 }
0x2aae   :  { %v5020_v16 = vpop.f32.mrf.mxu1 }
0x2aaf   :  { %6506 = vmatmul.msk.f32.vlgmr.msra.gmra.mxu0 %vm283_vm7, %v5020_v16 }
0x2ab0   :  { %5393 = vmatpush.msra.mxu0 %v8635_v50 }
0x2ab2   :  { %5394 = vmatpush.msra.mxu0 %v8641_v34 }
0x2ab4   :  { %5395 = vmatpush.msra.mxu0 %v8647_v24  ;;  %v5102_v24 = vld [vmem:[%s9286_s2 + $0x9f8] sm:$0xff] }
0x2ab6   :  { %v5023_v21 = vpop.f32.mrf.mxu1  ;;  %5396 = vmatpush.msra.mxu0 %v8653_v60  ;;  %v5103_v60 = vld [vmem:[%s9286_s2 + $0xa00] sm:$0xff] }
0x2ab7   :  { %6507 = vmatmul.msk.f32.gmra.mxu0 %vm283_vm7, %v5023_v21 }
0x2b12   :  { %v5049_v20 = vpop.f32.mrf.mxu3 }
0x2b13   :  { %v5055_v36 = vadd.f32 %v5049_v20, %v5014_v0  ;;  %v5315_v0 = vpop.permute.xlu2 %5314 }
0x2b1a   :  { %v5052_v4 = vpop.f32.mrf.mxu3 }
0x2b1b   :  { %v5056_v41 = vadd.f32 %v5052_v4, %v5017_v42  ;;  %v5310_v21 = vpop.permute.xlu2 %5309 }
0x2b2c   :  { %v5080_v15 = vpop.f32.mrf.mxu0 }
0x2b2d   :  { %v5086_v30 = vadd.f32 %v5080_v15, %v5055_v36 }
0x2b2f   :  { %v5098_v50 = vadd.f32 %v5091_v62, %v5086_v30 }
0x2b31   :  { %v5100_v17 = vmax.f32 %v5098_v50, 0.0 }
0x2b34   :  { %v5083_v11 = vpop.f32.mrf.mxu0 }
0x2b35   :  { %v5087_v13 = vadd.f32 %v5083_v11, %v5056_v41 }
0x2b37   :  { %v5099_v55 = vadd.f32 %v5096_v59, %v5087_v13 }
0x2b39   :  { %v5101_v34 = vmax.f32 %v5099_v55, 0.0 }
0x2b3b   :  { %5168 = vmatpush.msra.mxu3 %v5101_v34  ;;  %v5305_v34 = vpop.permute.xlu2 %5304 }
0x2b3d   :  { %5169 = vmatpush.msra.mxu3 %v5100_v17 }
0x2b3e   :  { %6508 = vmatmul.msk.f32.vlgmr.msra.gmra.mxu3 %vm193_vm6, %v5102_v24 }
0x2b46   :  { %6509 = vmatmul.msk.f32.gmra.mxu3 %vm193_vm6, %v5103_v60  ;;  %v5300_v60 = vpop.permute.xlu1 %5299 }
0x2b4e   :  { %6510 = vmatmul.msk.f32.gmra.mxu3 %vm193_vm6, %v5104_v23 }
0x2b56   :  { %6511 = vmatmul.msk.f32.gmra.mxu3 %vm193_vm6, %v5105_v9 }
0x2b5e   :  { %6512 = vmatmul.msk.f32.gmra.mxu3 %vm193_vm6, %v5106_v28 }
0x2b66   :  { %6513 = vmatmul.msk.f32.gmra.mxu3 %vm193_vm6, %v5107_v40 }
0x2b6e   :  { %6514 = vmatmul.msk.f32.gmra.mxu3 %vm193_vm6, %v5108_v37 }
0x2b76   :  { %6515 = vmatmul.msk.f32.gmra.mxu3 %vm193_vm6, %v5109_v54 }
0x2b7e   :  { %6516 = vmatmul.msk.f32.gmra.mxu3 %vm193_vm6, %v5110_v44 }
0x2b86   :  { %6517 = vmatmul.msk.f32.gmra.mxu3 %vm193_vm6, %v5111_v25 }
0x2b8e   :  { %6518 = vmatmul.msk.f32.gmra.mxu3 %vm193_vm6, %v5112_v56 }
0x2b96   :  { %6519 = vmatmul.msk.f32.gmra.mxu3 %vm193_vm6, %v5113_v26 }
0x2bc1   :  { %v5171_v2 = vpop.f32.mrf.mxu3 }
0x2bc2   :  { %6520 = vmatmul.msk.f32.vlgmr.msrb.gmra.mxu0 %vm283_vm7, %v5171_v2 }
0x2bc9   :  { %v5174_v5 = vpop.f32.mrf.mxu3 }
0x2bca   :  { %6521 = vmatmul.msk.f32.gmra.mxu0 %vm283_vm7, %v5174_v5 }
0x2bd1   :  { %v5177_v57 = vpop.f32.mrf.mxu3 }
0x2bd2   :  { %6522 = vmatmul.msk.f32.gmra.mxu0 %vm283_vm7, %v5177_v57 }
0x2bd9   :  { %v5180_v19 = vpop.f32.mrf.mxu3 }
0x2bda   :  { %6523 = vmatmul.msk.f32.gmra.mxu0 %vm283_vm7, %v5180_v19 }
0x2be1   :  { %v5183_v38 = vpop.f32.mrf.mxu3 }
0x2be9   :  { %v5186_v29 = vpop.f32.mrf.mxu3 }
0x2bf1   :  { %v5189_v1 = vpop.f32.mrf.mxu3 }
0x2bf9   :  { %v5192_v12 = vpop.f32.mrf.mxu3 }
0x2c01   :  { %v5195_v52 = vpop.f32.mrf.mxu3 }
0x2c02   :  { %6524 = vmatmul.msk.f32.vlgmr.msrb.gmra.mxu2 %vm283_vm7, %v5195_v52 }
0x2c09   :  { %v5198_v39 = vpop.f32.mrf.mxu3 }
0x2c0a   :  { %6525 = vmatmul.msk.f32.gmra.mxu2 %vm283_vm7, %v5198_v39 }
0x2c11   :  { %v5201_v58 = vpop.f32.mrf.mxu3 }
0x2c12   :  { %6526 = vmatmul.msk.f32.gmra.mxu2 %vm283_vm7, %v5201_v58 }
0x2c19   :  { %v5204_v8 = vpop.f32.mrf.mxu3 }
0x2c1a   :  { %6527 = vmatmul.msk.f32.gmra.mxu2 %vm283_vm7, %v5204_v8 }
0x2c3f   :  { %v5236_v47 = vpop.f32.mrf.mxu0 }
0x2c40   :  { %v5248_v41 = vadd.f32 %v5236_v47, %v5183_v38 }
0x2c47   :  { %v5239_v45 = vpop.f32.mrf.mxu0 }
0x2c48   :  { %v5249_v36 = vadd.f32 %v5239_v45, %v5186_v29 }
0x2c4f   :  { %v5242_v16 = vpop.f32.mrf.mxu0 }
0x2c50   :  { %v5250_v15 = vadd.f32 %v5242_v16, %v5189_v1 }
0x2c57   :  { %v5245_v4 = vpop.f32.mrf.mxu0 }
0x2c58   :  { %v5251_v13 = vadd.f32 %v5245_v4, %v5192_v12 }
0x2c85   :  { %v5281_v49 = vpop.f32.mrf.mxu2 }
0x2c86   :  { %v5293_v62 = vadd.f32 %v5281_v49, %v5248_v41 }
0x2c88   :  { %v5317_v23 = vadd.f32 %v5300_v60, %v5293_v62 }
0x2c8a   :  { %v5321_v54 = vmax.f32 %v5317_v23, 0.0 }
0x2c8c   :  { %v9068_v56 = vadd.f32 %v5321_v54, %v8884_v51 }
0x2c8d   :  { %v5284_v42 = vpop.f32.mrf.mxu2 }
0x2c8e   :  { %v5294_v11 = vadd.f32 %v5284_v42, %v5249_v36 }
0x2c90   :  { %v5318_v17 = vadd.f32 %v5305_v34, %v5294_v11 }
0x2c92   :  { %v5322_v40 = vmax.f32 %v5318_v17, 0.0 }
0x2c94   :  { %v9064_v25 = vadd.f32 %v5322_v40, %v8880_v31  ;;  %v5331_v31 = vld [vmem:[%s9286_s2 + $0x908] sm:$0xff] }
0x2c95   :  { %v5287_v20 = vpop.f32.mrf.mxu2 }
0x2c96   :  { %v5295_v30 = vadd.f32 %v5287_v20, %v5250_v15 }
0x2c98   :  { %v5319_v50 = vadd.f32 %v5310_v21, %v5295_v30 }
0x2c9a   :  { %v5323_v9 = vmax.f32 %v5319_v50, 0.0 }
0x2c9c   :  { %v9060_v44 = vadd.f32 %v5323_v9, %v8876_v6  ;;  %v5330_v6 = vld [vmem:[%s9286_s2 + $0x900] sm:$0xff] }
0x2c9d   :  { %v5290_v59 = vpop.f32.mrf.mxu2 }
0x2c9e   :  { %v5296_v55 = vadd.f32 %v5290_v59, %v5251_v13 }
0x2ca0   :  { %v5320_v24 = vadd.f32 %v5315_v0, %v5296_v55 }
0x2ca2   :  { %v5324_v28 = vmax.f32 %v5320_v24, 0.0 }
0x2ca4   :  { %v9056_v37 = vadd.f32 %v5324_v28, %v8871_v32  ;;  %v5329_v32 = vld [vmem:[%s9286_s2 + $0x8f8] sm:$0xff] }
0x2ca6   :  { %5353 = vmatpush.msrb.mxu1 %v9056_v37 }
0x2ca8   :  { %5354 = vmatpush.msrb.mxu1 %v9060_v44 }
0x2caa   :  { %5355 = vmatpush.msrb.mxu1 %v9064_v25 }
0x2cac   :  { %5356 = vmatpush.msrb.mxu1 %v9068_v56 }
0x2cad   :  { %6528 = vmatmul.msk.f32.vlgmr.msrb.gmra.mxu1 %vm283_vm7, %v5329_v32 }
0x2cb5   :  { %6529 = vmatmul.msk.f32.gmra.mxu1 %vm283_vm7, %v5330_v6 }
0x2cbd   :  { %6530 = vmatmul.msk.f32.gmra.mxu1 %vm283_vm7, %v5331_v31 }
0x2d2a   :  { %v5358_v51 = vpop.f32.mrf.mxu1 }
0x2d2b   :  { %v5370_v2 = vrot.slane %v5358_v51, 4 }
0x2d32   :  { %v5361_v26 = vpop.f32.mrf.mxu1 }
0x2d33   :  { %v5371_v5 = vrot.slane %v5361_v26, 4 }
0x2d35   :  { %v5372_v57 = vsel %vm415_vm8, %v5370_v2, %v5371_v5 }
0x2d36   :  { %6534 = vmatmul.msk.f32.vlgmr.msra.gmra.mxu2 %vm283_vm7, %v5372_v57  ;;  %6531 = vmatmul.msk.f32.vlgmr.msra.gmra.mxu0 %vm283_vm7, %v5372_v57 }
0x2d3a   :  { %v5364_v19 = vpop.f32.mrf.mxu1 }
0x2d3b   :  { %v5373_v38 = vrot.slane %v5364_v19, 4 }
0x2d3d   :  { %v5374_v29 = vsel %vm415_vm8, %v5371_v5, %v5373_v38 }
0x2d3e   :  { %6535 = vmatmul.msk.f32.gmra.mxu2 %vm283_vm7, %v5374_v29  ;;  %6532 = vmatmul.msk.f32.gmra.mxu0 %vm283_vm7, %v5374_v29  ;;  %v6694_v29 = vld [vmem:[%s9286_s2 + $0x38] sm:$0xff] }
0x2d46   :  { %6536 = vmatmul.msk.f32.gmra.mxu2 %vm283_vm7, %v5373_v38  ;;  %6533 = vmatmul.msk.f32.gmra.mxu0 %vm283_vm7, %v5373_v38 }
0x2db3   :  { %v5398_v1 = vpop.f32.mrf.mxu0 }
0x2db9   :  { %v5424_v12 = vpop.f32.mrf.mxu2 }
0x2dba   :  { %v5433_v49 = vmax.f32 %v5398_v1, %v5424_v12  ;;  %v6695_v12 = vld [vmem:[%s9286_s2 + $0x30] sm:$0xff] }
0x2dbb   :  { %v5401_v52 = vpop.f32.mrf.mxu0 }
0x2dc1   :  { %v5427_v39 = vpop.f32.mrf.mxu2 }
0x2dc2   :  { %v5434_v45 = vmax.f32 %v5401_v52, %v5427_v39  ;;  %v6696_v52 = vld [vmem:[%s9286_s2 + $0x28] sm:$0xff] }
0x2dc3   :  { %v5404_v58 = vpop.f32.mrf.mxu0 }
0x2dc9   :  { %v5430_v8 = vpop.f32.mrf.mxu2 }
0x2dca   :  { %v5435_v47 = vmax.f32 %v5404_v58, %v5430_v8  ;;  %v6697_v58 = vld [vmem:[%s9286_s2 + $0x20] sm:$0xff] }
0x2dcc   :  { %6537 = vmatpush.msk.msra.mxu1 %vm415_vm8, %v5435_v47  ;;  %6540 = vmatpush.msk.msrb.mxu0 %vm415_vm8, %v5435_v47  ;;  %v5768_v47 = vld [vmem:[%s9286_s2 + $0x930] sm:$0x1] }
0x2dcd   :  { %6606 = vpush %v5768_v47 }
0x2dce   :  { %5453 = vmatpush.msra.mxu1 %v5434_v45  ;;  %5476 = vmatpush.msrb.mxu0 %v5434_v45 }
0x2dd0   :  { %5454 = vmatpush.msra.mxu1 %v5433_v49  ;;  %5477 = vmatpush.msrb.mxu0 %v5433_v49  ;;  %v5688_v49 = vld [vmem:[%s9286_s2 + $0x910] sm:$0xff] }
0x2dd1   :  { %6538 = vmatmul.msk.f32.vlgmr.msra.gmra.mxu1 %vm482_vm9, %v8718_v10  ;;  %6541 = vmatmul.msk.f32.vlgmr.msrb.gmra.mxu0 %vm482_vm9, %v8711_v7  ;;  %v6690_v7 = vld [vmem:[%s9286_s2 + $0x18] sm:$0xff]  ;;  %v6691_v10 = vld [vmem:[%s9286_s2 + $0x10] sm:$0xff] }
0x2dd2   :  { %5565 = vmatpush.msra.mxu0 %v8731_v3  ;;  %v6693_v3 = vld [vmem:[%s9286_s2] sm:$0xff] }
0x2dd4   :  { %5566 = vmatpush.msra.mxu0 %v8743_v22 }
0x2dd9   :  { %6539 = vmatmul.msk.f32.gmra.mxu1 %vm482_vm9, %v8758_v18  ;;  %6542 = vmatmul.msk.f32.gmra.mxu0 %vm482_vm9, %v8751_v27 }
0x2dfe   :  { %s6607_s19 = spop %6606 }
0x2e4e   :  { %v5456_v0 = vpop.f32.mrf.mxu1  ;;  %v5479_v42 = vpop.f32.mrf.mxu0 }
0x2e4f   :  { %v5485_v15 = vmax.f32 %v5456_v0, %v5479_v42  ;;  %v5689_v0 = vld [vmem:[%s9286_s2 + $0x918] sm:$0xff]  ;;  %v5690_v42 = vld [vmem:[%s9286_s2 + $0x920] sm:$0xff] }
0x2e56   :  { %v5459_v16 = vpop.f32.mrf.mxu1  ;;  %v5482_v21 = vpop.f32.mrf.mxu0 }
0x2e57   :  { %v5486_v20 = vmax.f32 %v5459_v16, %v5482_v21  ;;  %v5691_v16 = vld [vmem:[%s9286_s2 + $0x928] sm:$0xff] }
0x2e59   :  { %6543 = vmatpush.msk.msrb.mxu2 %vm556_vm10, %v5486_v20  ;;  %6547 = vmatpush.msk.msrb.mxu1 %vm556_vm10, %v5486_v20 }
0x2e5b   :  { %5505 = vmatpush.msrb.mxu2 %v5485_v15  ;;  %5531 = vmatpush.msrb.mxu1 %v5485_v15 }
0x2e5c   :  { %6544 = vmatmul.msk.f32.vlgmr.msrb.gmra.mxu2 %vm546_vm11, %v8769_v43  ;;  %6548 = vmatmul.msk.f32.vlgmr.msrb.gmra.mxu1 %vm546_vm11, %v8776_v46 }
0x2e5d   :  { %6557 = vmatpush.msk.msra.mxu1 %vm415_vm8, %v5358_v51  ;;  %5600 = vmatpush.msra.mxu2 %v8725_v53  ;;  %v6692_v53 = vld [vmem:[%s9286_s2 + $0x8] sm:$0xff] }
0x2e5f   :  { %5601 = vmatpush.msra.mxu2 %v8737_v61 }
0x2e61   :  { %5934 = vmatpush.msrb.mxu2 %v6690_v7  ;;  %v5771_v7 = vstv %s6607_s19 }
0x2e63   :  { %5935 = vmatpush.msrb.mxu2 %v6691_v10 }
0x2e64   :  { %6545 = vmatmul.msk.f32.gmra.mxu2 %vm546_vm11, %v8785_v63  ;;  %6549 = vmatmul.msk.f32.gmra.mxu1 %vm546_vm11, %v8792_v48 }
0x2e65   :  { %5936 = vmatpush.msrb.mxu2 %v6692_v53 }
0x2e67   :  { %5937 = vmatpush.msrb.mxu2 %v6693_v3 }
0x2e6c   :  { %6546 = vmatmul.msk.f32.gmra.mxu2 %vm546_vm11, %v8799_v33  ;;  %6550 = vmatmul.msk.f32.gmra.mxu1 %vm546_vm11, %v8806_v35 }
0x2ed9   :  { %v5533_v61 = vpop.f32.mrf.mxu1 }
0x2eda   :  { %6551 = vmatmul.msk.f32.vlgmr.msra.gmra.mxu0 %vm193_vm6, %v5533_v61 }
0x2edf   :  { %v5507_v22 = vpop.f32.mrf.mxu2 }
0x2ee0   :  { %6554 = vmatmul.msk.f32.vlgmr.msra.gmra.mxu2 %vm193_vm6, %v5507_v22 }
0x2ee1   :  { %v5536_v27 = vpop.f32.mrf.mxu1 }
0x2ee2   :  { %6552 = vmatmul.msk.f32.gmra.mxu0 %vm193_vm6, %v5536_v27 }
0x2ee7   :  { %v5510_v18 = vpop.f32.mrf.mxu2 }
0x2ee8   :  { %6555 = vmatmul.msk.f32.gmra.mxu2 %vm193_vm6, %v5510_v18 }
0x2ee9   :  { %v5539_v46 = vpop.f32.mrf.mxu1 }
0x2eea   :  { %6553 = vmatmul.msk.f32.gmra.mxu0 %vm193_vm6, %v5539_v46 }
0x2eef   :  { %v5513_v43 = vpop.f32.mrf.mxu2 }
0x2ef0   :  { %6556 = vmatmul.msk.f32.gmra.mxu2 %vm193_vm6, %v5513_v43 }
0x2f57   :  { %v5568_v63 = vpop.f32.mrf.mxu0 }
0x2f63   :  { %v5603_v48 = vpop.f32.mrf.mxu2 }
0x2f64   :  { %v5604_v33 = vadd.f32 %v5603_v48, %v5568_v63 }
0x2f66   :  { %5612 = vxpose.xlu2.b32.start.end [1/1] (short) (narrow) %v5604_v33, 8  ;;  %v5695_v5 = vrot.slane %v5604_v33, 4 }
0x2f6b   :  { %v5606_v54 = vpop.f32.mrf.mxu2 }
0x2f73   :  { %v5609_v2 = vpop.f32.mrf.mxu2 }
0x2fff   :  { %v5628_v35 = vpop.trf.xlu2 }
0x3000   :  { %6558 = vmatmul.msk.f32.vlgmr.msra.gmra.mxu1 %vm723_vm12, %v5628_v35 }
0x307d   :  { %v5666_v4 = vpop.f32.mrf.mxu1 }
0x307e   :  { %v5667_v36 = vadd.f32 %v8823_v14, %v5666_v4  ;;  %v5571_v14 = vpop.f32.mrf.mxu0  ;;  %v5785_v4 = vld [vmem:[%s9286_s2 + $0x370] sm:$0xff] }
0x307f   :  { %v5607_v6 = vadd.f32 %v5606_v54, %v5571_v14 }
0x3080   :  { %v5669_v30 = vsel %vm283_vm7, %v5667_v36, -inf }
0x3081   :  { %v5670_v41 = vrot.slane %v5669_v30, 4  ;;  %v5696_v31 = vrot.slane %v5607_v6, 4 }
0x3083   :  { %v5671_v11 = vmax.f32 %v5669_v30, %v5670_v41  ;;  %v5697_v19 = vsel %vm415_vm8, %v5695_v5, %v5696_v31  ;;  %v5791_v30 = vld [vmem:[%s9286_s2 + $0x3a0] sm:$0xff]  ;;  %v5792_v41 = vld [vmem:[%s9286_s2 + $0x3a8] sm:$0xff] }
0x3085   :  { %v5672_v13 = vrot.slane %v5671_v11, 2 }
0x3086   :  { %v5574_v26 = vpop.f32.mrf.mxu0 }
0x3087   :  { %v5673_v59 = vmax.f32 %v5671_v11, %v5672_v13  ;;  %v5610_v38 = vadd.f32 %v5609_v2, %v5574_v26  ;;  %v5793_v11 = vld [vmem:[%s9286_s2 + $0x3b0] sm:$0xff]  ;;  %v5794_v13 = vld [vmem:[%s9286_s2 + $0x3b8] sm:$0xff] }
0x3089   :  { %v5674_v62 = vrot.slane %v5673_v59, 1  ;;  %v5698_v1 = vrot.slane %v5610_v38, 4 }
0x308b   :  { %v5675_v50 = vmax.f32 %v5673_v59, %v5674_v62  ;;  %v5699_v39 = vsel %vm415_vm8, %v5696_v31, %v5698_v1  ;;  %v5795_v59 = vld [vmem:[%s9286_s2 + $0x3c0] sm:$0xff]  ;;  %v5796_v62 = vld [vmem:[%s9286_s2 + $0x3c8] sm:$0xff] }
0x308d   :  { %v5676_v55 = vsub.f32 %v5667_v36, %v5675_v50  ;;  %v5790_v36 = vld [vmem:[%s9286_s2 + $0x398] sm:$0xff]  ;;  %v5797_v50 = vld [vmem:[%s9286_s2 + $0x3d0] sm:$0xff] }
0x308f   :  { %v5677_v34 = vmul.f32 1.442695, %v5676_v55  ;;  %v5798_v55 = vld [vmem:[%s9286_s2 + $0x3d8] sm:$0xff] }
0x3091   :  { %6631 = vpow2.f32 %v5677_v34  ;;  %v5799_v34 = vld [vmem:[%s9286_s2 + $0x3e0] sm:$0xff] }
0x3097   :  { %v6632_v17 = vpop.eup %6631 }
0x3098   :  { %v5679_v24 = vsel %vm283_vm7, %v6632_v17, 0.0 }
0x3099   :  { %v5680_v60 = vrot.slane %v5679_v24, 4 }
0x309b   :  { %v5681_v23 = vadd.f32 %v5680_v60, %v5679_v24 }
0x309d   :  { %v5682_v9 = vrot.slane %v5681_v23, 2 }
0x309f   :  { %v5683_v28 = vadd.f32 %v5682_v9, %v5681_v23 }
0x30a1   :  { %v5684_v40 = vrot.slane %v5683_v28, 1 }
0x30a3   :  { %v5685_v32 = vadd.f32 %v5684_v40, %v5683_v28 }
0x30a5   :  { %6633 = vrcp.f32 %v5685_v32 }
0x30ab   :  { %v6634_v51 = vpop.eup %6633 }
0x30ac   :  { %v5687_v57 = vmul.f32 %v6634_v51, %v6632_v17 }
0x30ae   :  { %5719 = vmatpush.msrb.mxu3 %v5687_v57 }
0x30af   :  { %6559 = vmatmul.msk.f32.vlgmr.msrb.gmra.mxu3 %vm780_vm13, %v5697_v19 }
0x30b0   :  { %5986 = vmatpush.msra.mxu3 %v6694_v29 }
0x30b2   :  { %5987 = vmatpush.msra.mxu3 %v6695_v12 }
0x30b4   :  { %5988 = vmatpush.msra.mxu3 %v6696_v52 }
0x30b6   :  { %5989 = vmatpush.msra.mxu3 %v6697_v58 }
0x30b7   :  { %6560 = vmatmul.msk.f32.gmra.mxu3 %vm780_vm13, %v5699_v39 }
0x3132   :  { %v5721_v8 = vpop.f32.mrf.mxu3 }
0x313a   :  { %v5724_v45 = vpop.f32.mrf.mxu3 }
0x313b   :  { %5753 = vmatpush.msrb.mxu0 %v5724_v45 }
0x313d   :  { %5754 = vmatpush.msrb.mxu0 %v5721_v8 }
0x313e   :  { %6561 = vmatmul.msk.f32.vlgmr.msrb.gmra.mxu0 %vm193_vm6, %v5688_v49 }
0x3146   :  { %6562 = vmatmul.msk.f32.gmra.mxu0 %vm193_vm6, %v5689_v0 }
0x314e   :  { %6563 = vmatmul.msk.f32.gmra.mxu0 %vm193_vm6, %v5690_v42 }
0x3156   :  { %6564 = vmatmul.msk.f32.gmra.mxu0 %vm193_vm6, %v5691_v16 }
0x31bb   :  { %v5756_v21 = vpop.f32.mrf.mxu0 }
0x31bc   :  { %v5773_v22 = vmul.f32 %v5771_v7, %v5756_v21 }
0x31be   :  { %v5777_v63 = vadd.f32 %v5773_v22, %v9068_v56 }
0x31c0   :  { %v5781_v35 = vadd.f32 %v5777_v63, %v9068_v56  ;;  %v5789_v56 = vld [vmem:[%s9286_s2 + $0x390] sm:$0xff] }
0x31c3   :  { %v5759_v20 = vpop.f32.mrf.mxu0 }
0x31c4   :  { %v5774_v3 = vmul.f32 %v5771_v7, %v5759_v20 }
0x31c6   :  { %v5778_v43 = vadd.f32 %v5774_v3, %v9064_v25 }
0x31c8   :  { %v5782_v33 = vadd.f32 %v5778_v43, %v9064_v25  ;;  %v5788_v25 = vld [vmem:[%s9286_s2 + $0x388] sm:$0xff] }
0x31cb   :  { %v5762_v15 = vpop.f32.mrf.mxu0 }
0x31cc   :  { %v5775_v10 = vmul.f32 %v5771_v7, %v5762_v15 }
0x31ce   :  { %v5779_v27 = vadd.f32 %v5775_v10, %v9060_v44 }
0x31d0   :  { %v5783_v48 = vadd.f32 %v5779_v27, %v9060_v44  ;;  %v5787_v44 = vld [vmem:[%s9286_s2 + $0x380] sm:$0xff] }
0x31d3   :  { %v5765_v53 = vpop.f32.mrf.mxu0 }
0x31d4   :  { %v5776_v61 = vmul.f32 %v5771_v7, %v5765_v53 }
0x31d6   :  { %v5780_v18 = vadd.f32 %v5776_v61, %v9056_v37 }
0x31d8   :  { %v5784_v46 = vadd.f32 %v5780_v18, %v9056_v37  ;;  %v5786_v37 = vld [vmem:[%s9286_s2 + $0x378] sm:$0xff] }
0x31da   :  { %5857 = vmatpush.msrb.mxu1 %v5784_v46 }
0x31dc   :  { %5858 = vmatpush.msrb.mxu1 %v5783_v48 }
0x31de   :  { %5859 = vmatpush.msrb.mxu1 %v5782_v33 }
0x31e0   :  { %5860 = vmatpush.msrb.mxu1 %v5781_v35 }
0x31e1   :  { %6565 = vmatmul.msk.f32.vlgmr.msrb.gmra.mxu1 %vm283_vm7, %v5785_v4 }
0x31e9   :  { %6566 = vmatmul.msk.f32.gmra.mxu1 %vm283_vm7, %v5786_v37 }
0x31f1   :  { %6567 = vmatmul.msk.f32.gmra.mxu1 %vm283_vm7, %v5787_v44 }
0x31f9   :  { %6568 = vmatmul.msk.f32.gmra.mxu1 %vm283_vm7, %v5788_v25 }
0x3201   :  { %6569 = vmatmul.msk.f32.gmra.mxu1 %vm283_vm7, %v5789_v56 }
0x3209   :  { %6570 = vmatmul.msk.f32.gmra.mxu1 %vm283_vm7, %v5790_v36 }
0x3211   :  { %6571 = vmatmul.msk.f32.gmra.mxu1 %vm283_vm7, %v5791_v30 }
0x3219   :  { %6572 = vmatmul.msk.f32.gmra.mxu1 %vm283_vm7, %v5792_v41 }
0x3221   :  { %6573 = vmatmul.msk.f32.gmra.mxu1 %vm283_vm7, %v5793_v11 }
0x3229   :  { %6574 = vmatmul.msk.f32.gmra.mxu1 %vm283_vm7, %v5794_v13 }
0x3231   :  { %6575 = vmatmul.msk.f32.gmra.mxu1 %vm283_vm7, %v5795_v59 }
0x3239   :  { %6576 = vmatmul.msk.f32.gmra.mxu1 %vm283_vm7, %v5796_v62 }
0x3241   :  { %6577 = vmatmul.msk.f32.gmra.mxu1 %vm283_vm7, %v5797_v50 }
0x3249   :  { %6578 = vmatmul.msk.f32.gmra.mxu1 %vm283_vm7, %v5798_v55 }
0x3251   :  { %6579 = vmatmul.msk.f32.gmra.mxu1 %vm283_vm7, %v5799_v34 }
0x325e   :  { %v5862_v17 = vpop.f32.mrf.mxu1 }
0x325f   :  { %6580 = vmatmul.msk.f32.vlgmr.msrb.gmra.mxu2 %vm283_vm7, %v5862_v17 }
0x3266   :  { %v5865_v24 = vpop.f32.mrf.mxu1 }
0x3267   :  { %6581 = vmatmul.msk.f32.gmra.mxu2 %vm283_vm7, %v5865_v24 }
0x326e   :  { %v5868_v60 = vpop.f32.mrf.mxu1 }
0x326f   :  { %6582 = vmatmul.msk.f32.gmra.mxu2 %vm283_vm7, %v5868_v60 }
0x3276   :  { %v5871_v23 = vpop.f32.mrf.mxu1 }
0x3277   :  { %6583 = vmatmul.msk.f32.gmra.mxu2 %vm283_vm7, %v5871_v23 }
0x327e   :  { %v5874_v9 = vpop.f32.mrf.mxu1 }
0x327f   :  { %6584 = vmatmul.msk.f32.gmra.mxu2 %vm283_vm7, %v5874_v9 }
0x3286   :  { %v5877_v28 = vpop.f32.mrf.mxu1 }
0x328e   :  { %v5880_v40 = vpop.f32.mrf.mxu1 }
0x3296   :  { %v5883_v14 = vpop.f32.mrf.mxu1 }
0x329e   :  { %v5886_v54 = vpop.f32.mrf.mxu1 }
0x32a6   :  { %v5889_v32 = vpop.f32.mrf.mxu1 }
0x32ae   :  { %v5892_v6 = vpop.f32.mrf.mxu1 }
0x32af   :  { %6585 = vmatmul.msk.f32.vlgmr.msra.gmra.mxu3 %vm283_vm7, %v5892_v6 }
0x32b6   :  { %v5895_v31 = vpop.f32.mrf.mxu1 }
0x32b7   :  { %6586 = vmatmul.msk.f32.gmra.mxu3 %vm283_vm7, %v5895_v31 }
0x32be   :  { %v5898_v51 = vpop.f32.mrf.mxu1 }
0x32bf   :  { %6587 = vmatmul.msk.f32.gmra.mxu3 %vm283_vm7, %v5898_v51 }
0x32c6   :  { %v5901_v26 = vpop.f32.mrf.mxu1 }
0x32c7   :  { %6588 = vmatmul.msk.f32.gmra.mxu3 %vm283_vm7, %v5901_v26 }
0x32ce   :  { %v5904_v2 = vpop.f32.mrf.mxu1 }
0x32cf   :  { %6589 = vmatmul.msk.f32.gmra.mxu3 %vm283_vm7, %v5904_v2 }
0x32e2   :  { %v5939_v5 = vpop.f32.mrf.mxu2 }
0x32e3   :  { %v5954_v58 = vadd.f32 %v5939_v5, %v5877_v28 }
0x32ea   :  { %v5942_v57 = vpop.f32.mrf.mxu2 }
0x32eb   :  { %v5955_v47 = vadd.f32 %v5942_v57, %v5880_v40 }
0x32f2   :  { %v5945_v29 = vpop.f32.mrf.mxu2 }
0x32f3   :  { %v5956_v49 = vadd.f32 %v5945_v29, %v5883_v14 }
0x32fa   :  { %v5948_v12 = vpop.f32.mrf.mxu2 }
0x32fb   :  { %v5957_v8 = vadd.f32 %v5948_v12, %v5886_v54 }
0x3302   :  { %v5951_v39 = vpop.f32.mrf.mxu2 }
0x3303   :  { %v5958_v42 = vadd.f32 %v5951_v39, %v5889_v32 }
0x3332   :  { %v5991_v19 = vpop.f32.mrf.mxu3 }
0x3333   :  { %v6006_v45 = vadd.f32 %v5991_v19, %v5954_v58 }
0x3335   :  { %v6011_v7 = vsel %vm283_vm7, %v6006_v45, -inf }
0x333a   :  { %v5994_v38 = vpop.f32.mrf.mxu3 }
0x333b   :  { %v6007_v21 = vadd.f32 %v5994_v38, %v5955_v47 }
0x333d   :  { %v6012_v61 = vsel %vm283_vm7, %v6007_v21, -inf }
0x3342   :  { %v5997_v1 = vpop.f32.mrf.mxu3 }
0x3343   :  { %v6008_v20 = vadd.f32 %v5997_v1, %v5956_v49 }
0x3345   :  { %v6013_v22 = vsel %vm283_vm7, %v6008_v20, -inf }
0x334a   :  { %v6000_v52 = vpop.f32.mrf.mxu3 }
0x334b   :  { %v6009_v0 = vadd.f32 %v6000_v52, %v5957_v8 }
0x334d   :  { %v6014_v10 = vsel %vm283_vm7, %v6009_v0, -inf }
0x334e   :  { %v6018_v27 = vmax.f32 %v6013_v22, %v6014_v10 }
0x3352   :  { %v6003_v16 = vpop.f32.mrf.mxu3 }
0x3353   :  { %v6010_v15 = vadd.f32 %v6003_v16, %v5958_v42 }
0x3355   :  { %v6015_v53 = vsel %vm283_vm7, %v6010_v15, -inf }
0x3356   :  { %v6016_v3 = vmax.f32 %v6011_v7, %v6015_v53 }
0x3358   :  { %v6017_v18 = vmax.f32 %v6016_v3, %v6012_v61 }
0x335a   :  { %v6019_v43 = vmax.f32 %v6017_v18, %v6018_v27 }
0x335c   :  { %v6020_v46 = vrot.slane %v6019_v43, 4 }
0x335e   :  { %v6021_v63 = vmax.f32 %v6019_v43, %v6020_v46 }
0x3360   :  { %v6022_v48 = vrot.slane %v6021_v63, 2 }
0x3362   :  { %v6023_v33 = vmax.f32 %v6021_v63, %v6022_v48 }
0x3364   :  { %v6024_v35 = vrot.slane %v6023_v33, 1 }
0x3366   :  { %v6025_v4 = vmax.f32 %v6023_v33, %v6024_v35 }
0x3368   :  { %v6026_v37 = vsub.f32 %v6006_v45, %v6025_v4  ;;  %v6027_v44 = vsub.f32 %v6007_v21, %v6025_v4  ;;  %v6028_v25 = vsub.f32 %v6008_v20, %v6025_v4  ;;  %v6029_v56 = vsub.f32 %v6009_v0, %v6025_v4 }
0x3369   :  { %v6030_v36 = vsub.f32 %v6010_v15, %v6025_v4 }
0x336a   :  { %v6031_v30 = vmul.f32 1.442695, %v6026_v37  ;;  %v6033_v41 = vmul.f32 1.442695, %v6027_v44  ;;  %v6035_v11 = vmul.f32 1.442695, %v6028_v25 }
0x336b   :  { %v6037_v13 = vmul.f32 1.442695, %v6029_v56  ;;  %v6039_v59 = vmul.f32 1.442695, %v6030_v36 }
0x336c   :  { %6635 = vpow2.f32 %v6031_v30 }
0x336d   :  { %6637 = vpow2.f32 %v6033_v41 }
0x336e   :  { %6639 = vpow2.f32 %v6035_v11 }
0x336f   :  { %6641 = vpow2.f32 %v6037_v13 }
0x3370   :  { %6643 = vpow2.f32 %v6039_v59 }
0x3372   :  { %v6636_v62 = vpop.eup %6635 }
0x3373   :  { %v6638_v50 = vpop.eup %6637  ;;  %v6041_v55 = vsel %vm283_vm7, %v6636_v62, 0.0 }
0x3374   :  { %v6640_v34 = vpop.eup %6639  ;;  %v6042_v17 = vsel %vm283_vm7, %v6638_v50, 0.0 }
0x3375   :  { %v6642_v24 = vpop.eup %6641  ;;  %v6043_v60 = vadd.f32 %v6042_v17, %v6041_v55  ;;  %v6044_v23 = vsel %vm283_vm7, %v6640_v34, 0.0 }
0x3376   :  { %v6644_v9 = vpop.eup %6643  ;;  %v6046_v40 = vsel %vm283_vm7, %v6642_v24, 0.0 }
0x3377   :  { %v6045_v28 = vadd.f32 %v6044_v23, %v6043_v60  ;;  %v6048_v54 = vsel %vm283_vm7, %v6644_v9, 0.0 }
0x3379   :  { %v6047_v14 = vadd.f32 %v6046_v40, %v6045_v28 }
0x337b   :  { %v6049_v32 = vadd.f32 %v6048_v54, %v6047_v14 }
0x337d   :  { %v6050_v6 = vrot.slane %v6049_v32, 4 }
0x337f   :  { %v6051_v31 = vadd.f32 %v6050_v6, %v6049_v32 }
0x3381   :  { %v6052_v51 = vrot.slane %v6051_v31, 2 }
0x3383   :  { %v6053_v26 = vadd.f32 %v6052_v51, %v6051_v31 }
0x3385   :  { %v6054_v2 = vrot.slane %v6053_v26, 1 }
0x3387   :  { %v6055_v5 = vadd.f32 %v6054_v2, %v6053_v26 }
0x3389   :  { %6645 = vrcp.f32 %v6055_v5  ;;  %v6067_v29 = vand.u32 2147483648, %v6055_v5  ;;  %v6065_v12 = vand.u32 2147483647, %v6055_v5  ;;  %vm6061_vm2 = vweird.f32 %v6055_v5 }
0x338b   :  { %v6068_v39 = vor.u32 1.1754944e-38, %v6067_v29  ;;  %vm6066_vm4 = vcmp.eq.f32.partialorder %v6065_v12, 8.507059e+37 }
0x338f   :  { %v6646_v57 = vpop.eup %6645 }
0x3390   :  { %v6057_v19 = vmul.f32 %v6646_v57, %v6055_v5  ;;  %vm6062_vm1 = vweird.f32 %v6646_v57 }
0x3391   :  { %vm6063_vm3 = vmor %vm6061_vm2, %vm6062_vm1 }
0x3392   :  { %v6058_v38 = vsub.f32 1.0, %v6057_v19 }
0x3394   :  { %v6059_v1 = vmul.f32 %v6646_v57, %v6058_v38 }
0x3396   :  { %v6060_v52 = vadd.f32 %v6646_v57, %v6059_v1 }
0x3398   :  { %v6064_v58 = vsel %vm6063_vm3, %v6646_v57, %v6060_v52 }
0x3399   :  { %v6069_v8 = vsel %vm6066_vm4, %v6068_v39, %v6064_v58 }
0x339a   :  { %v6070_v47 = vmul.f32 %v6636_v62, %v6069_v8  ;;  %v6071_v45 = vmul.f32 %v6638_v50, %v6069_v8  ;;  %v6072_v49 = vmul.f32 %v6640_v34, %v6069_v8  ;;  %v6073_v0 = vmul.f32 %v6642_v24, %v6069_v8 }
0x339b   :  { %v6074_v42 = vmul.f32 %v6644_v9, %v6069_v8 }
0x339c   :  { %6075 = vst.msk [vmem:[%s9290_s4] sm:$0xff] %vm283_vm7, %v6070_v47 }
0x339d   :  { %6076 = vst.msk [vmem:[%s9290_s4 + $0x8] sm:$0xff] %vm283_vm7, %v6071_v45 }
0x339e   :  { %6077 = vst.msk [vmem:[%s9290_s4 + $0x10] sm:$0xff] %vm283_vm7, %v6072_v49 }
0x339f   :  { %6078 = vst.msk [vmem:[%s9290_s4 + $0x18] sm:$0xff] %vm283_vm7, %v6073_v0 }
0x33a0   :  { %6079 = vst.msk [vmem:[%s9290_s4 + $0x20] sm:$0xff] %vm283_vm7, %v6074_v42 }

</bundles_post_ra>
